<compile_context>
chip_gen: v7x
topology: tpu7x:2x2x1
jax: 0.10.0
libtpu: 0.0.40
codegen_flags: <defaults>
</compile_context>

<pallas_src>
import numpy as np

import jax
import jax.numpy as jnp
from jax.experimental import pallas as pl
from jax.experimental.pallas import tpu as pltpu


CIN_PAD = 8      # input image channels are zero-padded 3 -> 8 (sublane-aligned taps)
EPS = 1e-5


def _round_up(x, m):
    return (x + m - 1) // m * m


# ---------------------------------------------------------------------------
# In-kernel building blocks (operate on values + refs inside a pallas kernel)
# ---------------------------------------------------------------------------
def _conv3x3(x_pf, w_ref, wp, lv, im2col):
    """3x3 conv on a padded-flat (Cin, Lp_pad) bf16 value via ONE MXU dot.

    The 9 taps are lane-shifted windows of the zero-padded, flattened input.
    They are packed into the (9*Cin, Lv) region of the bf16 VMEM scratch
    `im2col` and contracted against the (Cout, 9*Cin) weight in a single
    jnp.dot with f32 accumulation.
    Returns the (Cout, Lv) f32 conv-output window.
    """
    cin = x_pf.shape[0]
    offsets = tuple(di * wp + dj for di in range(3) for dj in range(3))
    for k, off in enumerate(offsets):
        im2col[pl.ds(k * cin, cin), pl.ds(0, lv)] = x_pf[:, off:off + lv]
    patch = im2col[pl.ds(0, 9 * cin), pl.ds(0, lv)]
    return jnp.dot(w_ref[...], patch, preferred_element_type=jnp.float32)


def _inorm(acc, gamma, beta, mask, inv_cnt):
    """InstanceNorm / AdaIN with masked lane reductions (f32 moments)."""
    am = acc * mask
    mean = jnp.sum(am, axis=1, keepdims=True) * inv_cnt
    msq = jnp.sum(am * acc, axis=1, keepdims=True) * inv_cnt
    var = jnp.maximum(msq - mean * mean, 0.0)
    scale = gamma * jax.lax.rsqrt(var + EPS)
    return acc * scale + (beta - mean * scale)


def _relayout(y_f32, g_ref):
    """Window -> padded-flat (same-res / stride-2 / 2x NN upsample) via a 0/1
    gather-matrix matmul on the MXU; invalid border lanes are dropped and the
    destination borders / lane padding come out as exact zeros."""
    return jnp.dot(y_f32.astype(jnp.bfloat16), g_ref[...],
                   preferred_element_type=jnp.float32).astype(jnp.bfloat16)


# ---------------------------------------------------------------------------
# Fused encoder kernel: conv+IN+ReLU x3 with two stride-2 downsamples
# ---------------------------------------------------------------------------
def _make_encoder_kernel(h, w):
    wp, wp2 = w + 2, w // 2 + 2
    lv_full = (h + 2) * wp - 2 * (wp + 1)
    lv_half = (h // 2 + 2) * wp2 - 2 * (wp2 + 1)
    inv_full = 1.0 / (h * w)
    inv_half = 1.0 / ((h // 2) * (w // 2))
    inv_quarter = 1.0 / ((h // 4) * (w // 4))

    def kernel(x_ref, w0_ref, w1_ref, w2_ref,
               g0_ref, b0_ref, g1_ref, b1_ref, g2_ref, b2_ref,
               m0_ref, m1_ref, m2_ref,
               gs16_ref, gd16_ref, gd8_ref,
               h0_ref, h1_ref, c_ref, im2col):
        x = x_ref[0]                                          # (8, 384) bf16
        # enc0: conv + IN + ReLU at full resolution
        a = _conv3x3(x, w0_ref, wp, lv_full, im2col)
        y = jnp.maximum(_inorm(a, g0_ref[...], b0_ref[...], m0_ref[...], inv_full), 0.0)
        h0 = _relayout(y, gs16_ref)                           # (C1, 384) padded-flat
        h0_ref[0] = h0
        # enc1: stride-2 conv + IN + ReLU (full -> half); stats over strided grid
        a = _conv3x3(h0, w1_ref, wp, lv_full, im2col)
        y = jnp.maximum(_inorm(a, g1_ref[...], b1_ref[...], m1_ref[...], inv_half), 0.0)
        h1 = _relayout(y, gd16_ref)                           # (C2, 128) half-res padded-flat
        h1_ref[0] = h1
        # enc2: stride-2 conv + IN + ReLU (half -> quarter)
        a = _conv3x3(h1, w2_ref, wp2, lv_half, im2col)
        y = jnp.maximum(_inorm(a, g2_ref[...], b2_ref[...], m2_ref[...], inv_quarter), 0.0)
        c_ref[0] = _relayout(y, gd8_ref)                      # (C4, 128) quarter-res padded-flat

    return kernel


# ---------------------------------------------------------------------------
# Fused decoder kernel: AdaIN res-block + 2 upsampling convs (+ skips) + out
# ---------------------------------------------------------------------------
def _make_decoder_kernel(h, w, c4):
    h4, w4, h8, w8 = h // 4, w // 4, h // 2, w // 2
    wp4, wp8, wp16 = w4 + 2, w8 + 2, w + 2
    s4, s8, s16 = wp4 + 1, wp8 + 1, wp16 + 1
    lv4 = (h4 + 2) * wp4 - 2 * s4
    lv8 = (h8 + 2) * wp8 - 2 * s8
    lv16 = (h + 2) * wp16 - 2 * s16
    inv4, inv8, inv16 = 1.0 / (h4 * w4), 1.0 / (h8 * w8), 1.0 / (h * w)

    def kernel(c_ref, h1_ref, h0_ref, ad_ref,
               wr0_ref, wr1_ref, wd1_ref, wd2_ref, wo_ref,
               d1g_ref, d1b_ref, d2g_ref, d2b_ref, ob_ref,
               m4_ref, m8_ref, m16_ref,
               gs4_ref, gu4_ref, gu8_ref, gs16_ref, go_ref,
               o_ref, im2col):
        c_pf = c_ref[0]                                       # (C4, 128) bf16
        h1_pf = h1_ref[0]                                     # (C2, 128) bf16
        h0_pf = h0_ref[0]                                     # (C1, 384) bf16
        ad = ad_ref[0]                                        # (4*C4, 1) f32
        g1, b1 = ad[0:c4], ad[c4:2 * c4]
        g2, b2 = ad[2 * c4:3 * c4], ad[3 * c4:4 * c4]

        # AdaIN residual block on the content code (quarter resolution)
        a = _conv3x3(c_pf, wr0_ref, wp4, lv4, im2col)
        y = jnp.maximum(_inorm(a, g1, b1, m4_ref[...], inv4), 0.0)
        r_pf = _relayout(y, gs4_ref)
        a = _conv3x3(r_pf, wr1_ref, wp4, lv4, im2col)
        y = _inorm(a, g2, b2, m4_ref[...], inv4)
        y = y + c_pf[:, s4:s4 + lv4].astype(jnp.float32)      # x = content + r
        x8 = _relayout(y, gu4_ref)                            # NN upsample -> 8x8 padded-flat

        # dec1: conv + IN + ReLU + encoder skip (half resolution)
        a = _conv3x3(x8, wd1_ref, wp8, lv8, im2col)
        y = jnp.maximum(_inorm(a, d1g_ref[...], d1b_ref[...], m8_ref[...], inv8), 0.0)
        y = y + h1_pf[:, s8:s8 + lv8].astype(jnp.float32)
        x16 = _relayout(y, gu8_ref)                           # NN upsample -> 16x16 padded-flat

        # dec2: conv + IN + ReLU + encoder skip (full resolution)
        a = _conv3x3(x16, wd2_ref, wp16, lv16, im2col)
        y = jnp.maximum(_inorm(a, d2g_ref[...], d2b_ref[...], m16_ref[...], inv16), 0.0)
        y = y + h0_pf[:, s16:s16 + lv16].astype(jnp.float32)
        xo = _relayout(y, gs16_ref)                           # same-res re-pad

        # output conv + bias + tanh, written lane-dense as unpadded (3, h*w)
        a = _conv3x3(xo, wo_ref, wp16, lv16, im2col) + ob_ref[...]
        img = jnp.tanh(a)
        o_ref[0] = jnp.dot(img, go_ref[...], preferred_element_type=jnp.float32)

    return kernel


# ---------------------------------------------------------------------------
# pallas_call wrappers
# ---------------------------------------------------------------------------
def run_encoder(packed, x_pf, h, w):
    n, cp, lp16p = x_pf.shape
    c1 = packed["w_enc0"].shape[0]
    c2 = packed["w_enc1"].shape[0]
    c4 = packed["w_enc2"].shape[0]
    lp8p = packed["g_down16"].shape[1]
    lp4p = packed["g_down8"].shape[1]
    lv16 = packed["g_same16"].shape[0]

    names = ("w_enc0", "w_enc1", "w_enc2",
             "enc0_g", "enc0_beta", "enc1_g", "enc1_beta", "enc2_g", "enc2_beta",
             "m16_s1", "m16_s2", "m8_s2",
             "g_same16", "g_down16", "g_down8")
    const_args = [packed[k] for k in names]

    in_specs = ([pl.BlockSpec((1, cp, lp16p), lambda i: (i, 0, 0))]
                + [pl.BlockSpec(a.shape, lambda i: (0, 0)) for a in const_args])
    out_shape = (jax.ShapeDtypeStruct((n, c1, lp16p), jnp.bfloat16),
                 jax.ShapeDtypeStruct((n, c2, lp8p), jnp.bfloat16),
                 jax.ShapeDtypeStruct((n, c4, lp4p), jnp.bfloat16))
    out_specs = (pl.BlockSpec((1, c1, lp16p), lambda i: (i, 0, 0)),
                 pl.BlockSpec((1, c2, lp8p), lambda i: (i, 0, 0)),
                 pl.BlockSpec((1, c4, lp4p), lambda i: (i, 0, 0)))
    scratch = [pltpu.VMEM((9 * max(cp, c1, c2), _round_up(lv16, 128)), jnp.bfloat16)]

    return pl.pallas_call(
        _make_encoder_kernel(h, w),
        out_shape=out_shape,
        grid=(n,),
        in_specs=in_specs,
        out_specs=out_specs,
        scratch_shapes=scratch,
        compiler_params=pltpu.CompilerParams(dimension_semantics=("parallel",)),
    )(x_pf, *const_args)


def run_decoder(packed, content, h1, h0, adain, h, w):
    n, c4, lp4p = content.shape
    c2, lp8p = h1.shape[1], h1.shape[2]
    c1, lp16p = h0.shape[1], h0.shape[2]
    co = packed["w_out"].shape[0]
    hw = packed["g_out"].shape[1]
    lv16 = packed["g_same16"].shape[0]

    names = ("w_res0", "w_res1", "w_dec1", "w_dec2", "w_out",
             "dec1_g", "dec1_beta", "dec2_g", "dec2_beta", "out_b",
             "m4_s1", "m8_s1", "m16_s1",
             "g_same4", "g_up4", "g_up8", "g_same16", "g_out")
    const_args = [packed[k] for k in names]

    in_specs = ([pl.BlockSpec((1, c4, lp4p), lambda i: (i, 0, 0)),
                 pl.BlockSpec((1, c2, lp8p), lambda i: (i, 0, 0)),
                 pl.BlockSpec((1, c1, lp16p), lambda i: (i, 0, 0)),
                 pl.BlockSpec((1, adain.shape[1], 1), lambda i: (i, 0, 0))]
                + [pl.BlockSpec(a.shape, lambda i: (0, 0)) for a in const_args])
    out_shape = jax.ShapeDtypeStruct((n, co, hw), jnp.float32)
    out_specs = pl.BlockSpec((1, co, hw), lambda i: (i, 0, 0))
    scratch = [pltpu.VMEM((9 * max(c4, c2, c1), _round_up(lv16, 128)), jnp.bfloat16)]

    return pl.pallas_call(
        _make_decoder_kernel(h, w, c4),
        out_shape=out_shape,
        grid=(n,),
        in_specs=in_specs,
        out_specs=out_specs,
        scratch_shapes=scratch,
        compiler_params=pltpu.CompilerParams(dimension_semantics=("parallel",)),
    )(content, h1, h0, adain, *const_args)


# ---------------------------------------------------------------------------
# Host-side constants: masks and window->padded-flat gather matrices (numpy)
# ---------------------------------------------------------------------------
def _valid_ij(h, w):
    wp = w + 2
    s = wp + 1
    lv = (h + 2) * wp - 2 * s
    p = s + np.arange(lv)
    i, j = p // wp, p % wp
    valid = (j >= 1) & (j <= w)
    return i, j, valid, lv


def _make_mask(h, w, stride):
    i, j, valid, lv = _valid_ij(h, w)
    if stride == 2:
        valid = valid & (i % 2 == 1) & (j % 2 == 1)
    return jnp.asarray(valid.astype(np.float32)[None, :])


def _make_g_same(h, w, lp_pad):
    i, j, valid, lv = _valid_ij(h, w)
    s = w + 3
    g = np.zeros((lv, lp_pad), np.float32)
    t = np.arange(lv)
    g[t[valid], (s + t)[valid]] = 1.0
    return g


def _make_g_down(h, w, lp_pad):
    i, j, valid, lv = _valid_ij(h, w)
    valid = valid & (i % 2 == 1) & (j % 2 == 1)
    wp2 = w // 2 + 2
    dest = ((i - 1) // 2 + 1) * wp2 + ((j - 1) // 2 + 1)
    g = np.zeros((lv, lp_pad), np.float32)
    t = np.arange(lv)
    g[t[valid], dest[valid]] = 1.0
    return g


def _make_g_up(h, w, lp_pad):
    i, j, valid, lv = _valid_ij(h, w)
    wp2 = 2 * w + 2
    g = np.zeros((lv, lp_pad), np.float32)
    t = np.arange(lv)
    for di in (0, 1):
        for dj in (0, 1):
            dest = (2 * (i - 1) + di + 1) * wp2 + (2 * (j - 1) + dj + 1)
            g[t[valid], dest[valid]] = 1.0
    return g


def _make_g_dense(h, w):
    i, j, valid, lv = _valid_ij(h, w)
    dest = (i - 1) * w + (j - 1)
    g = np.zeros((lv, h * w), np.float32)
    t = np.arange(lv)
    g[t[valid], dest[valid]] = 1.0
    return g


# ---------------------------------------------------------------------------
# Parameters (synthetic generator) and one-time prep of kernel-ready constants
# ---------------------------------------------------------------------------
def init_params(key, cin=3, base=8, style_hidden=16):
    c1, c2, c4 = base, base * 2, base * 4
    ks = iter(jax.random.split(key, 16))

    def convw(ci, co):
        return 0.1 * jax.random.normal(next(ks), (3, 3, ci, co), jnp.float32)

    # NOTE: conv biases before IN/AdaIN are omitted on purpose: they are exactly
    # cancelled by the mean subtraction (performance-review item).
    return {
        "enc0_w": convw(cin, c1), "enc0_g": jnp.ones((c1,)), "enc0_beta": jnp.zeros((c1,)),
        "enc1_w": convw(c1, c2), "enc1_g": jnp.ones((c2,)), "enc1_beta": jnp.zeros((c2,)),
        "enc2_w": convw(c2, c4), "enc2_g": jnp.ones((c4,)), "enc2_beta": jnp.zeros((c4,)),
        "mlp0_w": 0.1 * jax.random.normal(next(ks), (3, style_hidden), jnp.float32),
        "mlp0_b": jnp.zeros((style_hidden,)),
        "mlp1_w": 0.1 * jax.random.normal(next(ks), (style_hidden, 4 * c4), jnp.float32),
        "mlp1_b": jnp.zeros((4 * c4,)),
        "res0_w": convw(c4, c4), "res1_w": convw(c4, c4),
        "dec1_w": convw(c4, c2), "dec1_g": jnp.ones((c2,)), "dec1_beta": jnp.zeros((c2,)),
        "dec2_w": convw(c2, c1), "dec2_g": jnp.ones((c1,)), "dec2_beta": jnp.zeros((c1,)),
        "out_w": convw(c1, cin), "out_b": jnp.zeros((cin,)),
    }


def _prep_w(w, cin_pad=None):
    """(3,3,cin,cout) -> (cout, 9*cin) bf16, column index = tap*cin + ci."""
    kk, _, cin, cout = w.shape
    w9 = w.reshape(kk * kk, cin, cout)
    if cin_pad is not None and cin_pad > cin:
        w9 = jnp.pad(w9, ((0, 0), (0, cin_pad - cin), (0, 0)))
        cin = cin_pad
    return jnp.transpose(w9, (2, 0, 1)).reshape(cout, 9 * cin).astype(jnp.bfloat16)


def _col(v):
    return jnp.asarray(v, jnp.float32).reshape(-1, 1)


def prepare(params, h, w):
    """One-time, host-side prep of all kernel-ready constants (perf item: no
    per-call transposes/casts/masks inside the jitted forward)."""
    h2, w2, h4, w4 = h // 2, w // 2, h // 4, w // 4
    lp16p = _round_up((h + 2) * (w + 2), 128)
    lp8p = _round_up((h2 + 2) * (w2 + 2), 128)
    lp4p = _round_up((h4 + 2) * (w4 + 2), 128)
    bf = lambda a: jnp.asarray(a, jnp.bfloat16)
    return {
        "w_enc0": _prep_w(params["enc0_w"], cin_pad=CIN_PAD),
        "w_enc1": _prep_w(params["enc1_w"]),
        "w_enc2": _prep_w(params["enc2_w"]),
        "w_res0": _prep_w(params["res0_w"]),
        "w_res1": _prep_w(params["res1_w"]),
        "w_dec1": _prep_w(params["dec1_w"]),
        "w_dec2": _prep_w(params["dec2_w"]),
        "w_out": _prep_w(params["out_w"]),
        "out_b": _col(params["out_b"]),
        "enc0_g": _col(params["enc0_g"]), "enc0_beta": _col(params["enc0_beta"]),
        "enc1_g": _col(params["enc1_g"]), "enc1_beta": _col(params["enc1_beta"]),
        "enc2_g": _col(params["enc2_g"]), "enc2_beta": _col(params["enc2_beta"]),
        "dec1_g": _col(params["dec1_g"]), "dec1_beta": _col(params["dec1_beta"]),
        "dec2_g": _col(params["dec2_g"]), "dec2_beta": _col(params["dec2_beta"]),
        "m16_s1": _make_mask(h, w, 1), "m16_s2": _make_mask(h, w, 2),
        "m8_s1": _make_mask(h2, w2, 1), "m8_s2": _make_mask(h2, w2, 2),
        "m4_s1": _make_mask(h4, w4, 1),
        "g_same16": bf(_make_g_same(h, w, lp16p)),
        "g_same4": bf(_make_g_same(h4, w4, lp4p)),
        "g_down16": bf(_make_g_down(h, w, lp8p)),
        "g_down8": bf(_make_g_down(h2, w2, lp4p)),
        "g_up4": bf(_make_g_up(h4, w4, lp8p)),
        "g_up8": bf(_make_g_up(h2, w2, lp16p)),
        "g_out": jnp.asarray(_make_g_dense(h, w), jnp.float32),
        "mlp0_w": jnp.asarray(params["mlp0_w"], jnp.float32),
        "mlp0_b": jnp.asarray(params["mlp0_b"], jnp.float32),
        "mlp1_w": jnp.asarray(params["mlp1_w"], jnp.float32),
        "mlp1_b": jnp.asarray(params["mlp1_b"], jnp.float32),
    }


# ---------------------------------------------------------------------------
# HiDT.forward equivalent
# ---------------------------------------------------------------------------
def _image_to_pf(x):
    """(N, 3, h, w) f32 -> (N, 8, Lp_pad) bf16 zero-padded, flattened, lane-dense."""
    n, c, h, w = x.shape
    lp = (h + 2) * (w + 2)
    xp = jnp.pad(x, ((0, 0), (0, CIN_PAD - c), (1, 1), (1, 1)))
    pf = xp.reshape(n, CIN_PAD, lp)
    pf = jnp.pad(pf, ((0, 0), (0, 0), (0, _round_up(lp, 128) - lp)))
    return pf.astype(jnp.bfloat16)


def hidt_forward(packed, content, style_to_transfer):
    n, c, h, w = content.shape

    # --- content encoder (one fused pallas_call) ---
    x_pf = _image_to_pf(content)
    h0, h1, cont = run_encoder(packed, x_pf, h, w)

    # --- style -> AdaIN params (one vreg of work: plain jnp, no kernel) ---
    style = jnp.broadcast_to(style_to_transfer.reshape(1, 3), (n, 3))  # .repeat(n,...)
    hs = jnp.maximum(style @ packed["mlp0_w"] + packed["mlp0_b"], 0.0)
    ad = hs @ packed["mlp1_w"] + packed["mlp1_b"]                      # (n, 4*C4)
    g1, b1, g2, b2 = jnp.split(ad, 4, axis=1)
    adain = jnp.concatenate([1.0 + g1, b1, 1.0 + g2, b2], axis=1)
    adain = adain[:, :, None].astype(jnp.float32)                      # (n, 4*C4, 1)

    # --- decoder (one fused pallas_call) ---
    img_flat = run_decoder(packed, cont, h1, h0, adain, h, w)          # (n, 3, h*w) f32
    images = img_flat.reshape(n, img_flat.shape[1], h, w)
    return images.reshape(1, n * c, h, w)                              # .view(1, n*c, h, w)


if __name__ == "__main__":
    key = jax.random.PRNGKey(0)
    kp, kc, ks = jax.random.split(key, 3)

    params = init_params(kp)
    packed = prepare(params, h=16, w=16)
    content = jax.random.normal(kc, (2, 3, 16, 16), jnp.float32)   # NCHW
    style_to_transfer = jax.random.normal(ks, (3,), jnp.float32)   # 3-dim style

    fwd = jax.jit(hidt_forward)
    out = jax.block_until_ready(fwd(packed, content, style_to_transfer))

    assert out.shape == (1, 2 * 3, 16, 16), out.shape
    assert out.dtype == jnp.float32
    assert bool(jnp.all(jnp.isfinite(out)))
    print("KERNEL_OK")
</pallas_src>

<mosaic_0001>
module attributes {stable_mosaic.version = 11 : i64} {
  func.func @kernel(%arg0: i32, %arg1: memref<1x8x384xbf16, #tpu.memory_space<vmem>>, %arg2: memref<8x72xbf16, #tpu.memory_space<vmem>>, %arg3: memref<16x72xbf16, #tpu.memory_space<vmem>>, %arg4: memref<32x144xbf16, #tpu.memory_space<vmem>>, %arg5: memref<8x1xf32, #tpu.memory_space<vmem>>, %arg6: memref<8x1xf32, #tpu.memory_space<vmem>>, %arg7: memref<16x1xf32, #tpu.memory_space<vmem>>, %arg8: memref<16x1xf32, #tpu.memory_space<vmem>>, %arg9: memref<32x1xf32, #tpu.memory_space<vmem>>, %arg10: memref<32x1xf32, #tpu.memory_space<vmem>>, %arg11: memref<1x286xf32, #tpu.memory_space<vmem>>, %arg12: memref<1x286xf32, #tpu.memory_space<vmem>>, %arg13: memref<1x78xf32, #tpu.memory_space<vmem>>, %arg14: memref<286x384xbf16, #tpu.memory_space<vmem>>, %arg15: memref<286x128xbf16, #tpu.memory_space<vmem>>, %arg16: memref<78x128xbf16, #tpu.memory_space<vmem>>, %arg17: memref<1x8x384xbf16, #tpu.memory_space<vmem>>, %arg18: memref<1x16x128xbf16, #tpu.memory_space<vmem>>, %arg19: memref<1x32x128xbf16, #tpu.memory_space<vmem>>, %arg20: memref<144x384xbf16, #tpu.memory_space<vmem>>) attributes {dimension_semantics = [#tpu.dimension_semantics<parallel>], iteration_bounds = array<i64: 2>, scalar_prefetch = 0 : i64, scratch_operands = 1 : i64, tpu.core_type = #tpu.core_type<tc>, window_params = [{transform_indices = @transform_0, window_bounds = array<i64: 1, 8, 384>}, {pipeline_mode = #tpu.pipeline_mode<synchronous>, transform_indices = @transform_1, window_bounds = array<i64: 8, 72>}, {pipeline_mode = #tpu.pipeline_mode<synchronous>, transform_indices = @transform_2, window_bounds = array<i64: 16, 72>}, {pipeline_mode = #tpu.pipeline_mode<synchronous>, transform_indices = @transform_3, window_bounds = array<i64: 32, 144>}, {pipeline_mode = #tpu.pipeline_mode<synchronous>, transform_indices = @transform_4, window_bounds = array<i64: 8, 1>}, {pipeline_mode = #tpu.pipeline_mode<synchronous>, transform_indices = @transform_5, window_bounds = array<i64: 8, 1>}, {pipeline_mode = #tpu.pipeline_mode<synchronous>, transform_indices = @transform_6, window_bounds = array<i64: 16, 1>}, {pipeline_mode = #tpu.pipeline_mode<synchronous>, transform_indices = @transform_7, window_bounds = array<i64: 16, 1>}, {pipeline_mode = #tpu.pipeline_mode<synchronous>, transform_indices = @transform_8, window_bounds = array<i64: 32, 1>}, {pipeline_mode = #tpu.pipeline_mode<synchronous>, transform_indices = @transform_9, window_bounds = array<i64: 32, 1>}, {pipeline_mode = #tpu.pipeline_mode<synchronous>, transform_indices = @transform_10, window_bounds = array<i64: 1, 286>}, {pipeline_mode = #tpu.pipeline_mode<synchronous>, transform_indices = @transform_11, window_bounds = array<i64: 1, 286>}, {pipeline_mode = #tpu.pipeline_mode<synchronous>, transform_indices = @transform_12, window_bounds = array<i64: 1, 78>}, {pipeline_mode = #tpu.pipeline_mode<synchronous>, transform_indices = @transform_13, window_bounds = array<i64: 286, 384>}, {pipeline_mode = #tpu.pipeline_mode<synchronous>, transform_indices = @transform_14, window_bounds = array<i64: 286, 128>}, {pipeline_mode = #tpu.pipeline_mode<synchronous>, transform_indices = @transform_15, window_bounds = array<i64: 78, 128>}, {transform_indices = @transform_16, window_bounds = array<i64: 1, 8, 384>}, {transform_indices = @transform_17, window_bounds = array<i64: 1, 16, 128>}, {transform_indices = @transform_18, window_bounds = array<i64: 1, 32, 128>}]} {
    %c0 = arith.constant 0 : index
    %c0_0 = arith.constant 0 : index
    %c0_1 = arith.constant 0 : index
    %0 = vector.load %arg1[%c0, %c0_0, %c0_1] : memref<1x8x384xbf16, #tpu.memory_space<vmem>>, vector<1x8x384xbf16>
    %1 = vector.shape_cast %0 : vector<1x8x384xbf16> to vector<8x384xbf16>
    %2 = vector.extract_strided_slice %1 {offsets = [0, 0], sizes = [8, 286], strides = [1, 1]} : vector<8x384xbf16> to vector<8x286xbf16>
    %c0_2 = arith.constant 0 : index
    %c0_3 = arith.constant 0 : index
    %3 = vector.load %arg20[%c0_2, %c0_3] : memref<144x384xbf16, #tpu.memory_space<vmem>>, vector<8x286xbf16>
    tpu.vector_store %arg20[%c0_2, %c0_3], %2 {strides = array<i32>} : memref<144x384xbf16, #tpu.memory_space<vmem>>, vector<8x286xbf16>,
    %4 = vector.extract_strided_slice %1 {offsets = [0, 1], sizes = [8, 286], strides = [1, 1]} : vector<8x384xbf16> to vector<8x286xbf16>
    %c8 = arith.constant 8 : index
    %c0_4 = arith.constant 0 : index
    %5 = vector.load %arg20[%c8, %c0_4] : memref<144x384xbf16, #tpu.memory_space<vmem>>, vector<8x286xbf16>
    tpu.vector_store %arg20[%c8, %c0_4], %4 {strides = array<i32>} : memref<144x384xbf16, #tpu.memory_space<vmem>>, vector<8x286xbf16>,
    %6 = vector.extract_strided_slice %1 {offsets = [0, 2], sizes = [8, 286], strides = [1, 1]} : vector<8x384xbf16> to vector<8x286xbf16>
    %c16 = arith.constant 16 : index
    %c0_5 = arith.constant 0 : index
    %7 = vector.load %arg20[%c16, %c0_5] : memref<144x384xbf16, #tpu.memory_space<vmem>>, vector<8x286xbf16>
    tpu.vector_store %arg20[%c16, %c0_5], %6 {strides = array<i32>} : memref<144x384xbf16, #tpu.memory_space<vmem>>, vector<8x286xbf16>,
    %8 = vector.extract_strided_slice %1 {offsets = [0, 18], sizes = [8, 286], strides = [1, 1]} : vector<8x384xbf16> to vector<8x286xbf16>
    %c24 = arith.constant 24 : index
    %c0_6 = arith.constant 0 : index
    %9 = vector.load %arg20[%c24, %c0_6] : memref<144x384xbf16, #tpu.memory_space<vmem>>, vector<8x286xbf16>
    tpu.vector_store %arg20[%c24, %c0_6], %8 {strides = array<i32>} : memref<144x384xbf16, #tpu.memory_space<vmem>>, vector<8x286xbf16>,
    %10 = vector.extract_strided_slice %1 {offsets = [0, 19], sizes = [8, 286], strides = [1, 1]} : vector<8x384xbf16> to vector<8x286xbf16>
    %c32 = arith.constant 32 : index
    %c0_7 = arith.constant 0 : index
    %11 = vector.load %arg20[%c32, %c0_7] : memref<144x384xbf16, #tpu.memory_space<vmem>>, vector<8x286xbf16>
    tpu.vector_store %arg20[%c32, %c0_7], %10 {strides = array<i32>} : memref<144x384xbf16, #tpu.memory_space<vmem>>, vector<8x286xbf16>,
    %12 = vector.extract_strided_slice %1 {offsets = [0, 20], sizes = [8, 286], strides = [1, 1]} : vector<8x384xbf16> to vector<8x286xbf16>
    %c40 = arith.constant 40 : index
    %c0_8 = arith.constant 0 : index
    %13 = vector.load %arg20[%c40, %c0_8] : memref<144x384xbf16, #tpu.memory_space<vmem>>, vector<8x286xbf16>
    tpu.vector_store %arg20[%c40, %c0_8], %12 {strides = array<i32>} : memref<144x384xbf16, #tpu.memory_space<vmem>>, vector<8x286xbf16>,
    %14 = vector.extract_strided_slice %1 {offsets = [0, 36], sizes = [8, 286], strides = [1, 1]} : vector<8x384xbf16> to vector<8x286xbf16>
    %c48 = arith.constant 48 : index
    %c0_9 = arith.constant 0 : index
    %15 = vector.load %arg20[%c48, %c0_9] : memref<144x384xbf16, #tpu.memory_space<vmem>>, vector<8x286xbf16>
    tpu.vector_store %arg20[%c48, %c0_9], %14 {strides = array<i32>} : memref<144x384xbf16, #tpu.memory_space<vmem>>, vector<8x286xbf16>,
    %16 = vector.extract_strided_slice %1 {offsets = [0, 37], sizes = [8, 286], strides = [1, 1]} : vector<8x384xbf16> to vector<8x286xbf16>
    %c56 = arith.constant 56 : index
    %c0_10 = arith.constant 0 : index
    %17 = vector.load %arg20[%c56, %c0_10] : memref<144x384xbf16, #tpu.memory_space<vmem>>, vector<8x286xbf16>
    tpu.vector_store %arg20[%c56, %c0_10], %16 {strides = array<i32>} : memref<144x384xbf16, #tpu.memory_space<vmem>>, vector<8x286xbf16>,
    %18 = vector.extract_strided_slice %1 {offsets = [0, 38], sizes = [8, 286], strides = [1, 1]} : vector<8x384xbf16> to vector<8x286xbf16>
    %c64 = arith.constant 64 : index
    %c0_11 = arith.constant 0 : index
    %19 = vector.load %arg20[%c64, %c0_11] : memref<144x384xbf16, #tpu.memory_space<vmem>>, vector<8x286xbf16>
    tpu.vector_store %arg20[%c64, %c0_11], %18 {strides = array<i32>} : memref<144x384xbf16, #tpu.memory_space<vmem>>, vector<8x286xbf16>,
    %c0_12 = arith.constant 0 : index
    %c0_13 = arith.constant 0 : index
    %20 = vector.load %arg20[%c0_12, %c0_13] : memref<144x384xbf16, #tpu.memory_space<vmem>>, vector<72x286xbf16>
    %c0_14 = arith.constant 0 : index
    %c0_15 = arith.constant 0 : index
    %21 = vector.load %arg2[%c0_14, %c0_15] : memref<8x72xbf16, #tpu.memory_space<vmem>>, vector<8x72xbf16>
    %cst = arith.constant dense<0.000000e+00> : vector<8x286xf32>
    %22 = tpu.matmul %21, %20, %cst {dimension_numbers = #tpu.dot_dimension_numbers<[1], [0], [0], [1], [0, 0, 1, 1], [], []>} : vector<8x72xbf16>, vector<72x286xbf16>, vector<8x286xf32> -> vector<8x286xf32>
    %c0_16 = arith.constant 0 : index
    %c0_17 = arith.constant 0 : index
    %23 = vector.load %arg5[%c0_16, %c0_17] : memref<8x1xf32, #tpu.memory_space<vmem>>, vector<8x1xf32>
    %c0_18 = arith.constant 0 : index
    %c0_19 = arith.constant 0 : index
    %24 = vector.load %arg6[%c0_18, %c0_19] : memref<8x1xf32, #tpu.memory_space<vmem>>, vector<8x1xf32>
    %c0_20 = arith.constant 0 : index
    %c0_21 = arith.constant 0 : index
    %25 = vector.load %arg11[%c0_20, %c0_21] : memref<1x286xf32, #tpu.memory_space<vmem>>, vector<1x286xf32>
    %26 = vector.broadcast %25 : vector<1x286xf32> to vector<8x286xf32>
    %27 = arith.mulf %22, %26 : vector<8x286xf32>
    %cst_22 = arith.constant dense<0.000000e+00> : vector<8xf32>
    %28 = vector.multi_reduction <add>, %27, %cst_22 [1] : vector<8x286xf32> to vector<8xf32>
    %29 = vector.shape_cast %28 : vector<8xf32> to vector<8x1xf32>
    %cst_23 = arith.constant 3.906250e-03 : f32
    %30 = vector.broadcast %cst_23 : f32 to vector<8x1xf32>
    %31 = arith.mulf %29, %30 : vector<8x1xf32>
    %32 = arith.mulf %27, %22 : vector<8x286xf32>
    %cst_24 = arith.constant dense<0.000000e+00> : vector<8xf32>
    %33 = vector.multi_reduction <add>, %32, %cst_24 [1] : vector<8x286xf32> to vector<8xf32>
    %34 = vector.shape_cast %33 : vector<8xf32> to vector<8x1xf32>
    %cst_25 = arith.constant 3.906250e-03 : f32
    %35 = vector.broadcast %cst_25 : f32 to vector<8x1xf32>
    %36 = arith.mulf %34, %35 : vector<8x1xf32>
    %37 = arith.mulf %31, %31 : vector<8x1xf32>
    %38 = arith.subf %36, %37 : vector<8x1xf32>
    %cst_26 = arith.constant 0.000000e+00 : f32
    %39 = vector.broadcast %cst_26 : f32 to vector<8x1xf32>
    %40 = arith.maximumf %38, %39 : vector<8x1xf32>
    %cst_27 = arith.constant 9.99999974E-6 : f32
    %41 = vector.broadcast %cst_27 : f32 to vector<8x1xf32>
    %42 = arith.addf %40, %41 : vector<8x1xf32>
    %43 = math.rsqrt %42 : vector<8x1xf32>
    %44 = arith.mulf %23, %43 : vector<8x1xf32>
    %45 = vector.broadcast %44 : vector<8x1xf32> to vector<8x286xf32>
    %46 = arith.mulf %22, %45 : vector<8x286xf32>
    %47 = arith.mulf %31, %44 : vector<8x1xf32>
    %48 = arith.subf %24, %47 : vector<8x1xf32>
    %49 = vector.broadcast %48 : vector<8x1xf32> to vector<8x286xf32>
    %50 = arith.addf %46, %49 : vector<8x286xf32>
    %cst_28 = arith.constant 0.000000e+00 : f32
    %51 = vector.broadcast %cst_28 : f32 to vector<8x286xf32>
    %52 = arith.maximumf %50, %51 : vector<8x286xf32>
    %53 = arith.truncf %52 : vector<8x286xf32> to vector<8x286xbf16>
    %c0_29 = arith.constant 0 : index
    %c0_30 = arith.constant 0 : index
    %54 = vector.load %arg14[%c0_29, %c0_30] : memref<286x384xbf16, #tpu.memory_space<vmem>>, vector<286x384xbf16>
    %cst_31 = arith.constant dense<0.000000e+00> : vector<8x384xf32>
    %55 = tpu.matmul %53, %54, %cst_31 {dimension_numbers = #tpu.dot_dimension_numbers<[1], [0], [0], [1], [0, 0, 1, 1], [], []>} : vector<8x286xbf16>, vector<286x384xbf16>, vector<8x384xf32> -> vector<8x384xf32>
    %56 = arith.truncf %55 : vector<8x384xf32> to vector<8x384xbf16>
    %c0_32 = arith.constant 0 : index
    %c0_33 = arith.constant 0 : index
    %c0_34 = arith.constant 0 : index
    %57 = vector.load %arg17[%c0_32, %c0_33, %c0_34] : memref<1x8x384xbf16, #tpu.memory_space<vmem>>, vector<1x8x384xbf16>
    %58 = vector.shape_cast %57 : vector<1x8x384xbf16> to vector<8x384xbf16>
    %59 = vector.shape_cast %56 : vector<8x384xbf16> to vector<1x8x384xbf16>
    tpu.vector_store %arg17[%c0_32, %c0_33, %c0_34], %59 {strides = array<i32>} : memref<1x8x384xbf16, #tpu.memory_space<vmem>>, vector<1x8x384xbf16>,
    %60 = vector.extract_strided_slice %56 {offsets = [0, 0], sizes = [8, 286], strides = [1, 1]} : vector<8x384xbf16> to vector<8x286xbf16>
    %c0_35 = arith.constant 0 : index
    %c0_36 = arith.constant 0 : index
    %61 = vector.load %arg20[%c0_35, %c0_36] : memref<144x384xbf16, #tpu.memory_space<vmem>>, vector<8x286xbf16>
    tpu.vector_store %arg20[%c0_35, %c0_36], %60 {strides = array<i32>} : memref<144x384xbf16, #tpu.memory_space<vmem>>, vector<8x286xbf16>,
    %62 = vector.extract_strided_slice %56 {offsets = [0, 1], sizes = [8, 286], strides = [1, 1]} : vector<8x384xbf16> to vector<8x286xbf16>
    %c8_37 = arith.constant 8 : index
    %c0_38 = arith.constant 0 : index
    %63 = vector.load %arg20[%c8_37, %c0_38] : memref<144x384xbf16, #tpu.memory_space<vmem>>, vector<8x286xbf16>
    tpu.vector_store %arg20[%c8_37, %c0_38], %62 {strides = array<i32>} : memref<144x384xbf16, #tpu.memory_space<vmem>>, vector<8x286xbf16>,
    %64 = vector.extract_strided_slice %56 {offsets = [0, 2], sizes = [8, 286], strides = [1, 1]} : vector<8x384xbf16> to vector<8x286xbf16>
    %c16_39 = arith.constant 16 : index
    %c0_40 = arith.constant 0 : index
    %65 = vector.load %arg20[%c16_39, %c0_40] : memref<144x384xbf16, #tpu.memory_space<vmem>>, vector<8x286xbf16>
    tpu.vector_store %arg20[%c16_39, %c0_40], %64 {strides = array<i32>} : memref<144x384xbf16, #tpu.memory_space<vmem>>, vector<8x286xbf16>,
    %66 = vector.extract_strided_slice %56 {offsets = [0, 18], sizes = [8, 286], strides = [1, 1]} : vector<8x384xbf16> to vector<8x286xbf16>
    %c24_41 = arith.constant 24 : index
    %c0_42 = arith.constant 0 : index
    %67 = vector.load %arg20[%c24_41, %c0_42] : memref<144x384xbf16, #tpu.memory_space<vmem>>, vector<8x286xbf16>
    tpu.vector_store %arg20[%c24_41, %c0_42], %66 {strides = array<i32>} : memref<144x384xbf16, #tpu.memory_space<vmem>>, vector<8x286xbf16>,
    %68 = vector.extract_strided_slice %56 {offsets = [0, 19], sizes = [8, 286], strides = [1, 1]} : vector<8x384xbf16> to vector<8x286xbf16>
    %c32_43 = arith.constant 32 : index
    %c0_44 = arith.constant 0 : index
    %69 = vector.load %arg20[%c32_43, %c0_44] : memref<144x384xbf16, #tpu.memory_space<vmem>>, vector<8x286xbf16>
    tpu.vector_store %arg20[%c32_43, %c0_44], %68 {strides = array<i32>} : memref<144x384xbf16, #tpu.memory_space<vmem>>, vector<8x286xbf16>,
    %70 = vector.extract_strided_slice %56 {offsets = [0, 20], sizes = [8, 286], strides = [1, 1]} : vector<8x384xbf16> to vector<8x286xbf16>
    %c40_45 = arith.constant 40 : index
    %c0_46 = arith.constant 0 : index
    %71 = vector.load %arg20[%c40_45, %c0_46] : memref<144x384xbf16, #tpu.memory_space<vmem>>, vector<8x286xbf16>
    tpu.vector_store %arg20[%c40_45, %c0_46], %70 {strides = array<i32>} : memref<144x384xbf16, #tpu.memory_space<vmem>>, vector<8x286xbf16>,
    %72 = vector.extract_strided_slice %56 {offsets = [0, 36], sizes = [8, 286], strides = [1, 1]} : vector<8x384xbf16> to vector<8x286xbf16>
    %c48_47 = arith.constant 48 : index
    %c0_48 = arith.constant 0 : index
    %73 = vector.load %arg20[%c48_47, %c0_48] : memref<144x384xbf16, #tpu.memory_space<vmem>>, vector<8x286xbf16>
    tpu.vector_store %arg20[%c48_47, %c0_48], %72 {strides = array<i32>} : memref<144x384xbf16, #tpu.memory_space<vmem>>, vector<8x286xbf16>,
    %74 = vector.extract_strided_slice %56 {offsets = [0, 37], sizes = [8, 286], strides = [1, 1]} : vector<8x384xbf16> to vector<8x286xbf16>
    %c56_49 = arith.constant 56 : index
    %c0_50 = arith.constant 0 : index
    %75 = vector.load %arg20[%c56_49, %c0_50] : memref<144x384xbf16, #tpu.memory_space<vmem>>, vector<8x286xbf16>
    tpu.vector_store %arg20[%c56_49, %c0_50], %74 {strides = array<i32>} : memref<144x384xbf16, #tpu.memory_space<vmem>>, vector<8x286xbf16>,
    %76 = vector.extract_strided_slice %56 {offsets = [0, 38], sizes = [8, 286], strides = [1, 1]} : vector<8x384xbf16> to vector<8x286xbf16>
    %c64_51 = arith.constant 64 : index
    %c0_52 = arith.constant 0 : index
    %77 = vector.load %arg20[%c64_51, %c0_52] : memref<144x384xbf16, #tpu.memory_space<vmem>>, vector<8x286xbf16>
    tpu.vector_store %arg20[%c64_51, %c0_52], %76 {strides = array<i32>} : memref<144x384xbf16, #tpu.memory_space<vmem>>, vector<8x286xbf16>,
    %c0_53 = arith.constant 0 : index
    %c0_54 = arith.constant 0 : index
    %78 = vector.load %arg20[%c0_53, %c0_54] : memref<144x384xbf16, #tpu.memory_space<vmem>>, vector<72x286xbf16>
    %c0_55 = arith.constant 0 : index
    %c0_56 = arith.constant 0 : index
    %79 = vector.load %arg3[%c0_55, %c0_56] : memref<16x72xbf16, #tpu.memory_space<vmem>>, vector<16x72xbf16>
    %cst_57 = arith.constant dense<0.000000e+00> : vector<16x286xf32>
    %80 = tpu.matmul %79, %78, %cst_57 {dimension_numbers = #tpu.dot_dimension_numbers<[1], [0], [0], [1], [0, 0, 1, 1], [], []>} : vector<16x72xbf16>, vector<72x286xbf16>, vector<16x286xf32> -> vector<16x286xf32>
    %c0_58 = arith.constant 0 : index
    %c0_59 = arith.constant 0 : index
    %81 = vector.load %arg7[%c0_58, %c0_59] : memref<16x1xf32, #tpu.memory_space<vmem>>, vector<16x1xf32>
    %c0_60 = arith.constant 0 : index
    %c0_61 = arith.constant 0 : index
    %82 = vector.load %arg8[%c0_60, %c0_61] : memref<16x1xf32, #tpu.memory_space<vmem>>, vector<16x1xf32>
    %c0_62 = arith.constant 0 : index
    %c0_63 = arith.constant 0 : index
    %83 = vector.load %arg12[%c0_62, %c0_63] : memref<1x286xf32, #tpu.memory_space<vmem>>, vector<1x286xf32>
    %84 = vector.broadcast %83 : vector<1x286xf32> to vector<16x286xf32>
    %85 = arith.mulf %80, %84 : vector<16x286xf32>
    %cst_64 = arith.constant dense<0.000000e+00> : vector<16xf32>
    %86 = vector.multi_reduction <add>, %85, %cst_64 [1] : vector<16x286xf32> to vector<16xf32>
    %87 = vector.shape_cast %86 : vector<16xf32> to vector<16x1xf32>
    %cst_65 = arith.constant 1.562500e-02 : f32
    %88 = vector.broadcast %cst_65 : f32 to vector<16x1xf32>
    %89 = arith.mulf %87, %88 : vector<16x1xf32>
    %90 = arith.mulf %85, %80 : vector<16x286xf32>
    %cst_66 = arith.constant dense<0.000000e+00> : vector<16xf32>
    %91 = vector.multi_reduction <add>, %90, %cst_66 [1] : vector<16x286xf32> to vector<16xf32>
    %92 = vector.shape_cast %91 : vector<16xf32> to vector<16x1xf32>
    %cst_67 = arith.constant 1.562500e-02 : f32
    %93 = vector.broadcast %cst_67 : f32 to vector<16x1xf32>
    %94 = arith.mulf %92, %93 : vector<16x1xf32>
    %95 = arith.mulf %89, %89 : vector<16x1xf32>
    %96 = arith.subf %94, %95 : vector<16x1xf32>
    %cst_68 = arith.constant 0.000000e+00 : f32
    %97 = vector.broadcast %cst_68 : f32 to vector<16x1xf32>
    %98 = arith.maximumf %96, %97 : vector<16x1xf32>
    %cst_69 = arith.constant 9.99999974E-6 : f32
    %99 = vector.broadcast %cst_69 : f32 to vector<16x1xf32>
    %100 = arith.addf %98, %99 : vector<16x1xf32>
    %101 = math.rsqrt %100 : vector<16x1xf32>
    %102 = arith.mulf %81, %101 : vector<16x1xf32>
    %103 = vector.broadcast %102 : vector<16x1xf32> to vector<16x286xf32>
    %104 = arith.mulf %80, %103 : vector<16x286xf32>
    %105 = arith.mulf %89, %102 : vector<16x1xf32>
    %106 = arith.subf %82, %105 : vector<16x1xf32>
    %107 = vector.broadcast %106 : vector<16x1xf32> to vector<16x286xf32>
    %108 = arith.addf %104, %107 : vector<16x286xf32>
    %cst_70 = arith.constant 0.000000e+00 : f32
    %109 = vector.broadcast %cst_70 : f32 to vector<16x286xf32>
    %110 = arith.maximumf %108, %109 : vector<16x286xf32>
    %111 = arith.truncf %110 : vector<16x286xf32> to vector<16x286xbf16>
    %c0_71 = arith.constant 0 : index
    %c0_72 = arith.constant 0 : index
    %112 = vector.load %arg15[%c0_71, %c0_72] : memref<286x128xbf16, #tpu.memory_space<vmem>>, vector<286x128xbf16>
    %cst_73 = arith.constant dense<0.000000e+00> : vector<16x128xf32>
    %113 = tpu.matmul %111, %112, %cst_73 {dimension_numbers = #tpu.dot_dimension_numbers<[1], [0], [0], [1], [0, 0, 1, 1], [], []>} : vector<16x286xbf16>, vector<286x128xbf16>, vector<16x128xf32> -> vector<16x128xf32>
    %114 = arith.truncf %113 : vector<16x128xf32> to vector<16x128xbf16>
    %c0_74 = arith.constant 0 : index
    %c0_75 = arith.constant 0 : index
    %c0_76 = arith.constant 0 : index
    %115 = vector.load %arg18[%c0_74, %c0_75, %c0_76] : memref<1x16x128xbf16, #tpu.memory_space<vmem>>, vector<1x16x128xbf16>
    %116 = vector.shape_cast %115 : vector<1x16x128xbf16> to vector<16x128xbf16>
    %117 = vector.shape_cast %114 : vector<16x128xbf16> to vector<1x16x128xbf16>
    tpu.vector_store %arg18[%c0_74, %c0_75, %c0_76], %117 {strides = array<i32>} : memref<1x16x128xbf16, #tpu.memory_space<vmem>>, vector<1x16x128xbf16>,
    %118 = vector.extract_strided_slice %114 {offsets = [0, 0], sizes = [16, 78], strides = [1, 1]} : vector<16x128xbf16> to vector<16x78xbf16>
    %c0_77 = arith.constant 0 : index
    %c0_78 = arith.constant 0 : index
    %119 = vector.load %arg20[%c0_77, %c0_78] : memref<144x384xbf16, #tpu.memory_space<vmem>>, vector<16x78xbf16>
    tpu.vector_store %arg20[%c0_77, %c0_78], %118 {strides = array<i32>} : memref<144x384xbf16, #tpu.memory_space<vmem>>, vector<16x78xbf16>,
    %120 = vector.extract_strided_slice %114 {offsets = [0, 1], sizes = [16, 78], strides = [1, 1]} : vector<16x128xbf16> to vector<16x78xbf16>
    %c16_79 = arith.constant 16 : index
    %c0_80 = arith.constant 0 : index
    %121 = vector.load %arg20[%c16_79, %c0_80] : memref<144x384xbf16, #tpu.memory_space<vmem>>, vector<16x78xbf16>
    tpu.vector_store %arg20[%c16_79, %c0_80], %120 {strides = array<i32>} : memref<144x384xbf16, #tpu.memory_space<vmem>>, vector<16x78xbf16>,
    %122 = vector.extract_strided_slice %114 {offsets = [0, 2], sizes = [16, 78], strides = [1, 1]} : vector<16x128xbf16> to vector<16x78xbf16>
    %c32_81 = arith.constant 32 : index
    %c0_82 = arith.constant 0 : index
    %123 = vector.load %arg20[%c32_81, %c0_82] : memref<144x384xbf16, #tpu.memory_space<vmem>>, vector<16x78xbf16>
    tpu.vector_store %arg20[%c32_81, %c0_82], %122 {strides = array<i32>} : memref<144x384xbf16, #tpu.memory_space<vmem>>, vector<16x78xbf16>,
    %124 = vector.extract_strided_slice %114 {offsets = [0, 10], sizes = [16, 78], strides = [1, 1]} : vector<16x128xbf16> to vector<16x78xbf16>
    %c48_83 = arith.constant 48 : index
    %c0_84 = arith.constant 0 : index
    %125 = vector.load %arg20[%c48_83, %c0_84] : memref<144x384xbf16, #tpu.memory_space<vmem>>, vector<16x78xbf16>
    tpu.vector_store %arg20[%c48_83, %c0_84], %124 {strides = array<i32>} : memref<144x384xbf16, #tpu.memory_space<vmem>>, vector<16x78xbf16>,
    %126 = vector.extract_strided_slice %114 {offsets = [0, 11], sizes = [16, 78], strides = [1, 1]} : vector<16x128xbf16> to vector<16x78xbf16>
    %c64_85 = arith.constant 64 : index
    %c0_86 = arith.constant 0 : index
    %127 = vector.load %arg20[%c64_85, %c0_86] : memref<144x384xbf16, #tpu.memory_space<vmem>>, vector<16x78xbf16>
    tpu.vector_store %arg20[%c64_85, %c0_86], %126 {strides = array<i32>} : memref<144x384xbf16, #tpu.memory_space<vmem>>, vector<16x78xbf16>,
    %128 = vector.extract_strided_slice %114 {offsets = [0, 12], sizes = [16, 78], strides = [1, 1]} : vector<16x128xbf16> to vector<16x78xbf16>
    %c80 = arith.constant 80 : index
    %c0_87 = arith.constant 0 : index
    %129 = vector.load %arg20[%c80, %c0_87] : memref<144x384xbf16, #tpu.memory_space<vmem>>, vector<16x78xbf16>
    tpu.vector_store %arg20[%c80, %c0_87], %128 {strides = array<i32>} : memref<144x384xbf16, #tpu.memory_space<vmem>>, vector<16x78xbf16>,
    %130 = vector.extract_strided_slice %114 {offsets = [0, 20], sizes = [16, 78], strides = [1, 1]} : vector<16x128xbf16> to vector<16x78xbf16>
    %c96 = arith.constant 96 : index
    %c0_88 = arith.constant 0 : index
    %131 = vector.load %arg20[%c96, %c0_88] : memref<144x384xbf16, #tpu.memory_space<vmem>>, vector<16x78xbf16>
    tpu.vector_store %arg20[%c96, %c0_88], %130 {strides = array<i32>} : memref<144x384xbf16, #tpu.memory_space<vmem>>, vector<16x78xbf16>,
    %132 = vector.extract_strided_slice %114 {offsets = [0, 21], sizes = [16, 78], strides = [1, 1]} : vector<16x128xbf16> to vector<16x78xbf16>
    %c112 = arith.constant 112 : index
    %c0_89 = arith.constant 0 : index
    %133 = vector.load %arg20[%c112, %c0_89] : memref<144x384xbf16, #tpu.memory_space<vmem>>, vector<16x78xbf16>
    tpu.vector_store %arg20[%c112, %c0_89], %132 {strides = array<i32>} : memref<144x384xbf16, #tpu.memory_space<vmem>>, vector<16x78xbf16>,
    %134 = vector.extract_strided_slice %114 {offsets = [0, 22], sizes = [16, 78], strides = [1, 1]} : vector<16x128xbf16> to vector<16x78xbf16>
    %c128 = arith.constant 128 : index
    %c0_90 = arith.constant 0 : index
    %135 = vector.load %arg20[%c128, %c0_90] : memref<144x384xbf16, #tpu.memory_space<vmem>>, vector<16x78xbf16>
    tpu.vector_store %arg20[%c128, %c0_90], %134 {strides = array<i32>} : memref<144x384xbf16, #tpu.memory_space<vmem>>, vector<16x78xbf16>,
    %c0_91 = arith.constant 0 : index
    %c0_92 = arith.constant 0 : index
    %136 = vector.load %arg20[%c0_91, %c0_92] : memref<144x384xbf16, #tpu.memory_space<vmem>>, vector<144x78xbf16>
    %c0_93 = arith.constant 0 : index
    %c0_94 = arith.constant 0 : index
    %137 = vector.load %arg4[%c0_93, %c0_94] : memref<32x144xbf16, #tpu.memory_space<vmem>>, vector<32x144xbf16>
    %cst_95 = arith.constant dense<0.000000e+00> : vector<32x78xf32>
    %138 = tpu.matmul %137, %136, %cst_95 {dimension_numbers = #tpu.dot_dimension_numbers<[1], [0], [0], [1], [0, 0, 1, 1], [], []>} : vector<32x144xbf16>, vector<144x78xbf16>, vector<32x78xf32> -> vector<32x78xf32>
    %c0_96 = arith.constant 0 : index
    %c0_97 = arith.constant 0 : index
    %139 = vector.load %arg9[%c0_96, %c0_97] : memref<32x1xf32, #tpu.memory_space<vmem>>, vector<32x1xf32>
    %c0_98 = arith.constant 0 : index
    %c0_99 = arith.constant 0 : index
    %140 = vector.load %arg10[%c0_98, %c0_99] : memref<32x1xf32, #tpu.memory_space<vmem>>, vector<32x1xf32>
    %c0_100 = arith.constant 0 : index
    %c0_101 = arith.constant 0 : index
    %141 = vector.load %arg13[%c0_100, %c0_101] : memref<1x78xf32, #tpu.memory_space<vmem>>, vector<1x78xf32>
    %142 = vector.broadcast %141 : vector<1x78xf32> to vector<32x78xf32>
    %143 = arith.mulf %138, %142 : vector<32x78xf32>
    %cst_102 = arith.constant dense<0.000000e+00> : vector<32xf32>
    %144 = vector.multi_reduction <add>, %143, %cst_102 [1] : vector<32x78xf32> to vector<32xf32>
    %145 = vector.shape_cast %144 : vector<32xf32> to vector<32x1xf32>
    %cst_103 = arith.constant 6.250000e-02 : f32
    %146 = vector.broadcast %cst_103 : f32 to vector<32x1xf32>
    %147 = arith.mulf %145, %146 : vector<32x1xf32>
    %148 = arith.mulf %143, %138 : vector<32x78xf32>
    %cst_104 = arith.constant dense<0.000000e+00> : vector<32xf32>
    %149 = vector.multi_reduction <add>, %148, %cst_104 [1] : vector<32x78xf32> to vector<32xf32>
    %150 = vector.shape_cast %149 : vector<32xf32> to vector<32x1xf32>
    %cst_105 = arith.constant 6.250000e-02 : f32
    %151 = vector.broadcast %cst_105 : f32 to vector<32x1xf32>
    %152 = arith.mulf %150, %151 : vector<32x1xf32>
    %153 = arith.mulf %147, %147 : vector<32x1xf32>
    %154 = arith.subf %152, %153 : vector<32x1xf32>
    %cst_106 = arith.constant 0.000000e+00 : f32
    %155 = vector.broadcast %cst_106 : f32 to vector<32x1xf32>
    %156 = arith.maximumf %154, %155 : vector<32x1xf32>
    %cst_107 = arith.constant 9.99999974E-6 : f32
    %157 = vector.broadcast %cst_107 : f32 to vector<32x1xf32>
    %158 = arith.addf %156, %157 : vector<32x1xf32>
    %159 = math.rsqrt %158 : vector<32x1xf32>
    %160 = arith.mulf %139, %159 : vector<32x1xf32>
    %161 = vector.broadcast %160 : vector<32x1xf32> to vector<32x78xf32>
    %162 = arith.mulf %138, %161 : vector<32x78xf32>
    %163 = arith.mulf %147, %160 : vector<32x1xf32>
    %164 = arith.subf %140, %163 : vector<32x1xf32>
    %165 = vector.broadcast %164 : vector<32x1xf32> to vector<32x78xf32>
    %166 = arith.addf %162, %165 : vector<32x78xf32>
    %cst_108 = arith.constant 0.000000e+00 : f32
    %167 = vector.broadcast %cst_108 : f32 to vector<32x78xf32>
    %168 = arith.maximumf %166, %167 : vector<32x78xf32>
    %169 = arith.truncf %168 : vector<32x78xf32> to vector<32x78xbf16>
    %c0_109 = arith.constant 0 : index
    %c0_110 = arith.constant 0 : index
    %170 = vector.load %arg16[%c0_109, %c0_110] : memref<78x128xbf16, #tpu.memory_space<vmem>>, vector<78x128xbf16>
    %cst_111 = arith.constant dense<0.000000e+00> : vector<32x128xf32>
    %171 = tpu.matmul %169, %170, %cst_111 {dimension_numbers = #tpu.dot_dimension_numbers<[1], [0], [0], [1], [0, 0, 1, 1], [], []>} : vector<32x78xbf16>, vector<78x128xbf16>, vector<32x128xf32> -> vector<32x128xf32>
    %172 = arith.truncf %171 : vector<32x128xf32> to vector<32x128xbf16>
    %c0_112 = arith.constant 0 : index
    %c0_113 = arith.constant 0 : index
    %c0_114 = arith.constant 0 : index
    %173 = vector.load %arg19[%c0_112, %c0_113, %c0_114] : memref<1x32x128xbf16, #tpu.memory_space<vmem>>, vector<1x32x128xbf16>
    %174 = vector.shape_cast %173 : vector<1x32x128xbf16> to vector<32x128xbf16>
    %175 = vector.shape_cast %172 : vector<32x128xbf16> to vector<1x32x128xbf16>
    tpu.vector_store %arg19[%c0_112, %c0_113, %c0_114], %175 {strides = array<i32>} : memref<1x32x128xbf16, #tpu.memory_space<vmem>>, vector<1x32x128xbf16>,
    return
  }
  func.func @transform_0(%arg0: i32) -> (i32, i32, i32) {
    %c0_i32 = arith.constant 0 : i32
    %c0_i32_0 = arith.constant 0 : i32
    %c0_i32_1 = arith.constant 0 : i32
    return %arg0, %c0_i32, %c0_i32_0 : i32, i32, i32
  }
  func.func @transform_1(%arg0: i32) -> (i32, i32) {
    %c0_i32 = arith.constant 0 : i32
    %c0_i32_0 = arith.constant 0 : i32
    %c0_i32_1 = arith.constant 0 : i32
    return %c0_i32, %c0_i32_0 : i32, i32
  }
  func.func @transform_2(%arg0: i32) -> (i32, i32) {
    %c0_i32 = arith.constant 0 : i32
    %c0_i32_0 = arith.constant 0 : i32
    %c0_i32_1 = arith.constant 0 : i32
    return %c0_i32, %c0_i32_0 : i32, i32
  }
  func.func @transform_3(%arg0: i32) -> (i32, i32) {
    %c0_i32 = arith.constant 0 : i32
    %c0_i32_0 = arith.constant 0 : i32
    %c0_i32_1 = arith.constant 0 : i32
    return %c0_i32, %c0_i32_0 : i32, i32
  }
  func.func @transform_4(%arg0: i32) -> (i32, i32) {
    %c0_i32 = arith.constant 0 : i32
    %c0_i32_0 = arith.constant 0 : i32
    %c0_i32_1 = arith.constant 0 : i32
    return %c0_i32, %c0_i32_0 : i32, i32
  }
  func.func @transform_5(%arg0: i32) -> (i32, i32) {
    %c0_i32 = arith.constant 0 : i32
    %c0_i32_0 = arith.constant 0 : i32
    %c0_i32_1 = arith.constant 0 : i32
    return %c0_i32, %c0_i32_0 : i32, i32
  }
  func.func @transform_6(%arg0: i32) -> (i32, i32) {
    %c0_i32 = arith.constant 0 : i32
    %c0_i32_0 = arith.constant 0 : i32
    %c0_i32_1 = arith.constant 0 : i32
    return %c0_i32, %c0_i32_0 : i32, i32
  }
  func.func @transform_7(%arg0: i32) -> (i32, i32) {
    %c0_i32 = arith.constant 0 : i32
    %c0_i32_0 = arith.constant 0 : i32
    %c0_i32_1 = arith.constant 0 : i32
    return %c0_i32, %c0_i32_0 : i32, i32
  }
  func.func @transform_8(%arg0: i32) -> (i32, i32) {
    %c0_i32 = arith.constant 0 : i32
    %c0_i32_0 = arith.constant 0 : i32
    %c0_i32_1 = arith.constant 0 : i32
    return %c0_i32, %c0_i32_0 : i32, i32
  }
  func.func @transform_9(%arg0: i32) -> (i32, i32) {
    %c0_i32 = arith.constant 0 : i32
    %c0_i32_0 = arith.constant 0 : i32
    %c0_i32_1 = arith.constant 0 : i32
    return %c0_i32, %c0_i32_0 : i32, i32
  }
  func.func @transform_10(%arg0: i32) -> (i32, i32) {
    %c0_i32 = arith.constant 0 : i32
    %c0_i32_0 = arith.constant 0 : i32
    %c0_i32_1 = arith.constant 0 : i32
    return %c0_i32, %c0_i32_0 : i32, i32
  }
  func.func @transform_11(%arg0: i32) -> (i32, i32) {
    %c0_i32 = arith.constant 0 : i32
    %c0_i32_0 = arith.constant 0 : i32
    %c0_i32_1 = arith.constant 0 : i32
    return %c0_i32, %c0_i32_0 : i32, i32
  }
  func.func @transform_12(%arg0: i32) -> (i32, i32) {
    %c0_i32 = arith.constant 0 : i32
    %c0_i32_0 = arith.constant 0 : i32
    %c0_i32_1 = arith.constant 0 : i32
    return %c0_i32, %c0_i32_0 : i32, i32
  }
  func.func @transform_13(%arg0: i32) -> (i32, i32) {
    %c0_i32 = arith.constant 0 : i32
    %c0_i32_0 = arith.constant 0 : i32
    %c0_i32_1 = arith.constant 0 : i32
    return %c0_i32, %c0_i32_0 : i32, i32
  }
  func.func @transform_14(%arg0: i32) -> (i32, i32) {
    %c0_i32 = arith.constant 0 : i32
    %c0_i32_0 = arith.constant 0 : i32
    %c0_i32_1 = arith.constant 0 : i32
    return %c0_i32, %c0_i32_0 : i32, i32
  }
  func.func @transform_15(%arg0: i32) -> (i32, i32) {
    %c0_i32 = arith.constant 0 : i32
    %c0_i32_0 = arith.constant 0 : i32
    %c0_i32_1 = arith.constant 0 : i32
    return %c0_i32, %c0_i32_0 : i32, i32
  }
  func.func @transform_16(%arg0: i32) -> (i32, i32, i32) {
    %c0_i32 = arith.constant 0 : i32
    %c0_i32_0 = arith.constant 0 : i32
    %c0_i32_1 = arith.constant 0 : i32
    return %arg0, %c0_i32, %c0_i32_0 : i32, i32, i32
  }
  func.func @transform_17(%arg0: i32) -> (i32, i32, i32) {
    %c0_i32 = arith.constant 0 : i32
    %c0_i32_0 = arith.constant 0 : i32
    %c0_i32_1 = arith.constant 0 : i32
    return %arg0, %c0_i32, %c0_i32_0 : i32, i32, i32
  }
  func.func @transform_18(%arg0: i32) -> (i32, i32, i32) {
    %c0_i32 = arith.constant 0 : i32
    %c0_i32_0 = arith.constant 0 : i32
    %c0_i32_1 = arith.constant 0 : i32
    return %arg0, %c0_i32, %c0_i32_0 : i32, i32, i32
  }
}

module attributes {stable_mosaic.version = 11 : i64} {
  func.func @kernel(%arg0: i32, %arg1: memref<1x32x128xbf16, #tpu.memory_space<vmem>>, %arg2: memref<1x16x128xbf16, #tpu.memory_space<vmem>>, %arg3: memref<1x8x384xbf16, #tpu.memory_space<vmem>>, %arg4: memref<1x128x1xf32, #tpu.memory_space<vmem>>, %arg5: memref<32x288xbf16, #tpu.memory_space<vmem>>, %arg6: memref<32x288xbf16, #tpu.memory_space<vmem>>, %arg7: memref<16x288xbf16, #tpu.memory_space<vmem>>, %arg8: memref<8x144xbf16, #tpu.memory_space<vmem>>, %arg9: memref<3x72xbf16, #tpu.memory_space<vmem>>, %arg10: memref<16x1xf32, #tpu.memory_space<vmem>>, %arg11: memref<16x1xf32, #tpu.memory_space<vmem>>, %arg12: memref<8x1xf32, #tpu.memory_space<vmem>>, %arg13: memref<8x1xf32, #tpu.memory_space<vmem>>, %arg14: memref<3x1xf32, #tpu.memory_space<vmem>>, %arg15: memref<1x22xf32, #tpu.memory_space<vmem>>, %arg16: memref<1x78xf32, #tpu.memory_space<vmem>>, %arg17: memref<1x286xf32, #tpu.memory_space<vmem>>, %arg18: memref<22x128xbf16, #tpu.memory_space<vmem>>, %arg19: memref<22x128xbf16, #tpu.memory_space<vmem>>, %arg20: memref<78x384xbf16, #tpu.memory_space<vmem>>, %arg21: memref<286x384xbf16, #tpu.memory_space<vmem>>, %arg22: memref<286x256xf32, #tpu.memory_space<vmem>>, %arg23: memref<1x3x256xf32, #tpu.memory_space<vmem>>, %arg24: memref<288x384xbf16, #tpu.memory_space<vmem>>) attributes {dimension_semantics = [#tpu.dimension_semantics<parallel>], iteration_bounds = array<i64: 2>, scalar_prefetch = 0 : i64, scratch_operands = 1 : i64, tpu.core_type = #tpu.core_type<tc>, window_params = [{transform_indices = @transform_0, window_bounds = array<i64: 1, 32, 128>}, {transform_indices = @transform_1, window_bounds = array<i64: 1, 16, 128>}, {transform_indices = @transform_2, window_bounds = array<i64: 1, 8, 384>}, {transform_indices = @transform_3, window_bounds = array<i64: 1, 128, 1>}, {pipeline_mode = #tpu.pipeline_mode<synchronous>, transform_indices = @transform_4, window_bounds = array<i64: 32, 288>}, {pipeline_mode = #tpu.pipeline_mode<synchronous>, transform_indices = @transform_5, window_bounds = array<i64: 32, 288>}, {pipeline_mode = #tpu.pipeline_mode<synchronous>, transform_indices = @transform_6, window_bounds = array<i64: 16, 288>}, {pipeline_mode = #tpu.pipeline_mode<synchronous>, transform_indices = @transform_7, window_bounds = array<i64: 8, 144>}, {pipeline_mode = #tpu.pipeline_mode<synchronous>, transform_indices = @transform_8, window_bounds = array<i64: 3, 72>}, {pipeline_mode = #tpu.pipeline_mode<synchronous>, transform_indices = @transform_9, window_bounds = array<i64: 16, 1>}, {pipeline_mode = #tpu.pipeline_mode<synchronous>, transform_indices = @transform_10, window_bounds = array<i64: 16, 1>}, {pipeline_mode = #tpu.pipeline_mode<synchronous>, transform_indices = @transform_11, window_bounds = array<i64: 8, 1>}, {pipeline_mode = #tpu.pipeline_mode<synchronous>, transform_indices = @transform_12, window_bounds = array<i64: 8, 1>}, {pipeline_mode = #tpu.pipeline_mode<synchronous>, transform_indices = @transform_13, window_bounds = array<i64: 3, 1>}, {pipeline_mode = #tpu.pipeline_mode<synchronous>, transform_indices = @transform_14, window_bounds = array<i64: 1, 22>}, {pipeline_mode = #tpu.pipeline_mode<synchronous>, transform_indices = @transform_15, window_bounds = array<i64: 1, 78>}, {pipeline_mode = #tpu.pipeline_mode<synchronous>, transform_indices = @transform_16, window_bounds = array<i64: 1, 286>}, {pipeline_mode = #tpu.pipeline_mode<synchronous>, transform_indices = @transform_17, window_bounds = array<i64: 22, 128>}, {pipeline_mode = #tpu.pipeline_mode<synchronous>, transform_indices = @transform_18, window_bounds = array<i64: 22, 128>}, {pipeline_mode = #tpu.pipeline_mode<synchronous>, transform_indices = @transform_19, window_bounds = array<i64: 78, 384>}, {pipeline_mode = #tpu.pipeline_mode<synchronous>, transform_indices = @transform_20, window_bounds = array<i64: 286, 384>}, {pipeline_mode = #tpu.pipeline_mode<synchronous>, transform_indices = @transform_21, window_bounds = array<i64: 286, 256>}, {transform_indices = @transform_22, window_bounds = array<i64: 1, 3, 256>}]} {
    %c0 = arith.constant 0 : index
    %c0_0 = arith.constant 0 : index
    %c0_1 = arith.constant 0 : index
    %0 = vector.load %arg1[%c0, %c0_0, %c0_1] : memref<1x32x128xbf16, #tpu.memory_space<vmem>>, vector<1x32x128xbf16>
    %1 = vector.shape_cast %0 : vector<1x32x128xbf16> to vector<32x128xbf16>
    %c0_2 = arith.constant 0 : index
    %c0_3 = arith.constant 0 : index
    %c0_4 = arith.constant 0 : index
    %2 = vector.load %arg2[%c0_2, %c0_3, %c0_4] : memref<1x16x128xbf16, #tpu.memory_space<vmem>>, vector<1x16x128xbf16>
    %3 = vector.shape_cast %2 : vector<1x16x128xbf16> to vector<16x128xbf16>
    %c0_5 = arith.constant 0 : index
    %c0_6 = arith.constant 0 : index
    %c0_7 = arith.constant 0 : index
    %4 = vector.load %arg3[%c0_5, %c0_6, %c0_7] : memref<1x8x384xbf16, #tpu.memory_space<vmem>>, vector<1x8x384xbf16>
    %5 = vector.shape_cast %4 : vector<1x8x384xbf16> to vector<8x384xbf16>
    %c0_8 = arith.constant 0 : index
    %c0_9 = arith.constant 0 : index
    %c0_10 = arith.constant 0 : index
    %6 = vector.load %arg4[%c0_8, %c0_9, %c0_10] : memref<1x128x1xf32, #tpu.memory_space<vmem>>, vector<1x128x1xf32>
    %7 = vector.shape_cast %6 : vector<1x128x1xf32> to vector<128x1xf32>
    %8 = vector.extract_strided_slice %7 {offsets = [0, 0], sizes = [32, 1], strides = [1, 1]} : vector<128x1xf32> to vector<32x1xf32>
    %9 = vector.extract_strided_slice %7 {offsets = [32, 0], sizes = [32, 1], strides = [1, 1]} : vector<128x1xf32> to vector<32x1xf32>
    %10 = vector.extract_strided_slice %7 {offsets = [64, 0], sizes = [32, 1], strides = [1, 1]} : vector<128x1xf32> to vector<32x1xf32>
    %11 = vector.extract_strided_slice %7 {offsets = [96, 0], sizes = [32, 1], strides = [1, 1]} : vector<128x1xf32> to vector<32x1xf32>
    %12 = vector.extract_strided_slice %1 {offsets = [0, 0], sizes = [32, 22], strides = [1, 1]} : vector<32x128xbf16> to vector<32x22xbf16>
    %c0_11 = arith.constant 0 : index
    %c0_12 = arith.constant 0 : index
    %13 = vector.load %arg24[%c0_11, %c0_12] : memref<288x384xbf16, #tpu.memory_space<vmem>>, vector<32x22xbf16>
    tpu.vector_store %arg24[%c0_11, %c0_12], %12 {strides = array<i32>} : memref<288x384xbf16, #tpu.memory_space<vmem>>, vector<32x22xbf16>,
    %14 = vector.extract_strided_slice %1 {offsets = [0, 1], sizes = [32, 22], strides = [1, 1]} : vector<32x128xbf16> to vector<32x22xbf16>
    %c32 = arith.constant 32 : index
    %c0_13 = arith.constant 0 : index
    %15 = vector.load %arg24[%c32, %c0_13] : memref<288x384xbf16, #tpu.memory_space<vmem>>, vector<32x22xbf16>
    tpu.vector_store %arg24[%c32, %c0_13], %14 {strides = array<i32>} : memref<288x384xbf16, #tpu.memory_space<vmem>>, vector<32x22xbf16>,
    %16 = vector.extract_strided_slice %1 {offsets = [0, 2], sizes = [32, 22], strides = [1, 1]} : vector<32x128xbf16> to vector<32x22xbf16>
    %c64 = arith.constant 64 : index
    %c0_14 = arith.constant 0 : index
    %17 = vector.load %arg24[%c64, %c0_14] : memref<288x384xbf16, #tpu.memory_space<vmem>>, vector<32x22xbf16>
    tpu.vector_store %arg24[%c64, %c0_14], %16 {strides = array<i32>} : memref<288x384xbf16, #tpu.memory_space<vmem>>, vector<32x22xbf16>,
    %18 = vector.extract_strided_slice %1 {offsets = [0, 6], sizes = [32, 22], strides = [1, 1]} : vector<32x128xbf16> to vector<32x22xbf16>
    %c96 = arith.constant 96 : index
    %c0_15 = arith.constant 0 : index
    %19 = vector.load %arg24[%c96, %c0_15] : memref<288x384xbf16, #tpu.memory_space<vmem>>, vector<32x22xbf16>
    tpu.vector_store %arg24[%c96, %c0_15], %18 {strides = array<i32>} : memref<288x384xbf16, #tpu.memory_space<vmem>>, vector<32x22xbf16>,
    %20 = vector.extract_strided_slice %1 {offsets = [0, 7], sizes = [32, 22], strides = [1, 1]} : vector<32x128xbf16> to vector<32x22xbf16>
    %c128 = arith.constant 128 : index
    %c0_16 = arith.constant 0 : index
    %21 = vector.load %arg24[%c128, %c0_16] : memref<288x384xbf16, #tpu.memory_space<vmem>>, vector<32x22xbf16>
    tpu.vector_store %arg24[%c128, %c0_16], %20 {strides = array<i32>} : memref<288x384xbf16, #tpu.memory_space<vmem>>, vector<32x22xbf16>,
    %22 = vector.extract_strided_slice %1 {offsets = [0, 8], sizes = [32, 22], strides = [1, 1]} : vector<32x128xbf16> to vector<32x22xbf16>
    %c160 = arith.constant 160 : index
    %c0_17 = arith.constant 0 : index
    %23 = vector.load %arg24[%c160, %c0_17] : memref<288x384xbf16, #tpu.memory_space<vmem>>, vector<32x22xbf16>
    tpu.vector_store %arg24[%c160, %c0_17], %22 {strides = array<i32>} : memref<288x384xbf16, #tpu.memory_space<vmem>>, vector<32x22xbf16>,
    %24 = vector.extract_strided_slice %1 {offsets = [0, 12], sizes = [32, 22], strides = [1, 1]} : vector<32x128xbf16> to vector<32x22xbf16>
    %c192 = arith.constant 192 : index
    %c0_18 = arith.constant 0 : index
    %25 = vector.load %arg24[%c192, %c0_18] : memref<288x384xbf16, #tpu.memory_space<vmem>>, vector<32x22xbf16>
    tpu.vector_store %arg24[%c192, %c0_18], %24 {strides = array<i32>} : memref<288x384xbf16, #tpu.memory_space<vmem>>, vector<32x22xbf16>,
    %26 = vector.extract_strided_slice %1 {offsets = [0, 13], sizes = [32, 22], strides = [1, 1]} : vector<32x128xbf16> to vector<32x22xbf16>
    %c224 = arith.constant 224 : index
    %c0_19 = arith.constant 0 : index
    %27 = vector.load %arg24[%c224, %c0_19] : memref<288x384xbf16, #tpu.memory_space<vmem>>, vector<32x22xbf16>
    tpu.vector_store %arg24[%c224, %c0_19], %26 {strides = array<i32>} : memref<288x384xbf16, #tpu.memory_space<vmem>>, vector<32x22xbf16>,
    %28 = vector.extract_strided_slice %1 {offsets = [0, 14], sizes = [32, 22], strides = [1, 1]} : vector<32x128xbf16> to vector<32x22xbf16>
    %c256 = arith.constant 256 : index
    %c0_20 = arith.constant 0 : index
    %29 = vector.load %arg24[%c256, %c0_20] : memref<288x384xbf16, #tpu.memory_space<vmem>>, vector<32x22xbf16>
    tpu.vector_store %arg24[%c256, %c0_20], %28 {strides = array<i32>} : memref<288x384xbf16, #tpu.memory_space<vmem>>, vector<32x22xbf16>,
    %c0_21 = arith.constant 0 : index
    %c0_22 = arith.constant 0 : index
    %30 = vector.load %arg24[%c0_21, %c0_22] : memref<288x384xbf16, #tpu.memory_space<vmem>>, vector<288x22xbf16>
    %c0_23 = arith.constant 0 : index
    %c0_24 = arith.constant 0 : index
    %31 = vector.load %arg5[%c0_23, %c0_24] : memref<32x288xbf16, #tpu.memory_space<vmem>>, vector<32x288xbf16>
    %cst = arith.constant dense<0.000000e+00> : vector<32x22xf32>
    %32 = tpu.matmul %31, %30, %cst {dimension_numbers = #tpu.dot_dimension_numbers<[1], [0], [0], [1], [0, 0, 1, 1], [], []>} : vector<32x288xbf16>, vector<288x22xbf16>, vector<32x22xf32> -> vector<32x22xf32>
    %c0_25 = arith.constant 0 : index
    %c0_26 = arith.constant 0 : index
    %33 = vector.load %arg15[%c0_25, %c0_26] : memref<1x22xf32, #tpu.memory_space<vmem>>, vector<1x22xf32>
    %34 = vector.broadcast %33 : vector<1x22xf32> to vector<32x22xf32>
    %35 = arith.mulf %32, %34 : vector<32x22xf32>
    %cst_27 = arith.constant dense<0.000000e+00> : vector<32xf32>
    %36 = vector.multi_reduction <add>, %35, %cst_27 [1] : vector<32x22xf32> to vector<32xf32>
    %37 = vector.shape_cast %36 : vector<32xf32> to vector<32x1xf32>
    %cst_28 = arith.constant 6.250000e-02 : f32
    %38 = vector.broadcast %cst_28 : f32 to vector<32x1xf32>
    %39 = arith.mulf %37, %38 : vector<32x1xf32>
    %40 = arith.mulf %35, %32 : vector<32x22xf32>
    %cst_29 = arith.constant dense<0.000000e+00> : vector<32xf32>
    %41 = vector.multi_reduction <add>, %40, %cst_29 [1] : vector<32x22xf32> to vector<32xf32>
    %42 = vector.shape_cast %41 : vector<32xf32> to vector<32x1xf32>
    %cst_30 = arith.constant 6.250000e-02 : f32
    %43 = vector.broadcast %cst_30 : f32 to vector<32x1xf32>
    %44 = arith.mulf %42, %43 : vector<32x1xf32>
    %45 = arith.mulf %39, %39 : vector<32x1xf32>
    %46 = arith.subf %44, %45 : vector<32x1xf32>
    %cst_31 = arith.constant 0.000000e+00 : f32
    %47 = vector.broadcast %cst_31 : f32 to vector<32x1xf32>
    %48 = arith.maximumf %46, %47 : vector<32x1xf32>
    %cst_32 = arith.constant 9.99999974E-6 : f32
    %49 = vector.broadcast %cst_32 : f32 to vector<32x1xf32>
    %50 = arith.addf %48, %49 : vector<32x1xf32>
    %51 = math.rsqrt %50 : vector<32x1xf32>
    %52 = arith.mulf %8, %51 : vector<32x1xf32>
    %53 = vector.broadcast %52 : vector<32x1xf32> to vector<32x22xf32>
    %54 = arith.mulf %32, %53 : vector<32x22xf32>
    %55 = arith.mulf %39, %52 : vector<32x1xf32>
    %56 = arith.subf %9, %55 : vector<32x1xf32>
    %57 = vector.broadcast %56 : vector<32x1xf32> to vector<32x22xf32>
    %58 = arith.addf %54, %57 : vector<32x22xf32>
    %cst_33 = arith.constant 0.000000e+00 : f32
    %59 = vector.broadcast %cst_33 : f32 to vector<32x22xf32>
    %60 = arith.maximumf %58, %59 : vector<32x22xf32>
    %61 = arith.truncf %60 : vector<32x22xf32> to vector<32x22xbf16>
    %c0_34 = arith.constant 0 : index
    %c0_35 = arith.constant 0 : index
    %62 = vector.load %arg18[%c0_34, %c0_35] : memref<22x128xbf16, #tpu.memory_space<vmem>>, vector<22x128xbf16>
    %cst_36 = arith.constant dense<0.000000e+00> : vector<32x128xf32>
    %63 = tpu.matmul %61, %62, %cst_36 {dimension_numbers = #tpu.dot_dimension_numbers<[1], [0], [0], [1], [0, 0, 1, 1], [], []>} : vector<32x22xbf16>, vector<22x128xbf16>, vector<32x128xf32> -> vector<32x128xf32>
    %64 = arith.truncf %63 : vector<32x128xf32> to vector<32x128xbf16>
    %65 = vector.extract_strided_slice %64 {offsets = [0, 0], sizes = [32, 22], strides = [1, 1]} : vector<32x128xbf16> to vector<32x22xbf16>
    %c0_37 = arith.constant 0 : index
    %c0_38 = arith.constant 0 : index
    %66 = vector.load %arg24[%c0_37, %c0_38] : memref<288x384xbf16, #tpu.memory_space<vmem>>, vector<32x22xbf16>
    tpu.vector_store %arg24[%c0_37, %c0_38], %65 {strides = array<i32>} : memref<288x384xbf16, #tpu.memory_space<vmem>>, vector<32x22xbf16>,
    %67 = vector.extract_strided_slice %64 {offsets = [0, 1], sizes = [32, 22], strides = [1, 1]} : vector<32x128xbf16> to vector<32x22xbf16>
    %c32_39 = arith.constant 32 : index
    %c0_40 = arith.constant 0 : index
    %68 = vector.load %arg24[%c32_39, %c0_40] : memref<288x384xbf16, #tpu.memory_space<vmem>>, vector<32x22xbf16>
    tpu.vector_store %arg24[%c32_39, %c0_40], %67 {strides = array<i32>} : memref<288x384xbf16, #tpu.memory_space<vmem>>, vector<32x22xbf16>,
    %69 = vector.extract_strided_slice %64 {offsets = [0, 2], sizes = [32, 22], strides = [1, 1]} : vector<32x128xbf16> to vector<32x22xbf16>
    %c64_41 = arith.constant 64 : index
    %c0_42 = arith.constant 0 : index
    %70 = vector.load %arg24[%c64_41, %c0_42] : memref<288x384xbf16, #tpu.memory_space<vmem>>, vector<32x22xbf16>
    tpu.vector_store %arg24[%c64_41, %c0_42], %69 {strides = array<i32>} : memref<288x384xbf16, #tpu.memory_space<vmem>>, vector<32x22xbf16>,
    %71 = vector.extract_strided_slice %64 {offsets = [0, 6], sizes = [32, 22], strides = [1, 1]} : vector<32x128xbf16> to vector<32x22xbf16>
    %c96_43 = arith.constant 96 : index
    %c0_44 = arith.constant 0 : index
    %72 = vector.load %arg24[%c96_43, %c0_44] : memref<288x384xbf16, #tpu.memory_space<vmem>>, vector<32x22xbf16>
    tpu.vector_store %arg24[%c96_43, %c0_44], %71 {strides = array<i32>} : memref<288x384xbf16, #tpu.memory_space<vmem>>, vector<32x22xbf16>,
    %73 = vector.extract_strided_slice %64 {offsets = [0, 7], sizes = [32, 22], strides = [1, 1]} : vector<32x128xbf16> to vector<32x22xbf16>
    %c128_45 = arith.constant 128 : index
    %c0_46 = arith.constant 0 : index
    %74 = vector.load %arg24[%c128_45, %c0_46] : memref<288x384xbf16, #tpu.memory_space<vmem>>, vector<32x22xbf16>
    tpu.vector_store %arg24[%c128_45, %c0_46], %73 {strides = array<i32>} : memref<288x384xbf16, #tpu.memory_space<vmem>>, vector<32x22xbf16>,
    %75 = vector.extract_strided_slice %64 {offsets = [0, 8], sizes = [32, 22], strides = [1, 1]} : vector<32x128xbf16> to vector<32x22xbf16>
    %c160_47 = arith.constant 160 : index
    %c0_48 = arith.constant 0 : index
    %76 = vector.load %arg24[%c160_47, %c0_48] : memref<288x384xbf16, #tpu.memory_space<vmem>>, vector<32x22xbf16>
    tpu.vector_store %arg24[%c160_47, %c0_48], %75 {strides = array<i32>} : memref<288x384xbf16, #tpu.memory_space<vmem>>, vector<32x22xbf16>,
    %77 = vector.extract_strided_slice %64 {offsets = [0, 12], sizes = [32, 22], strides = [1, 1]} : vector<32x128xbf16> to vector<32x22xbf16>
    %c192_49 = arith.constant 192 : index
    %c0_50 = arith.constant 0 : index
    %78 = vector.load %arg24[%c192_49, %c0_50] : memref<288x384xbf16, #tpu.memory_space<vmem>>, vector<32x22xbf16>
    tpu.vector_store %arg24[%c192_49, %c0_50], %77 {strides = array<i32>} : memref<288x384xbf16, #tpu.memory_space<vmem>>, vector<32x22xbf16>,
    %79 = vector.extract_strided_slice %64 {offsets = [0, 13], sizes = [32, 22], strides = [1, 1]} : vector<32x128xbf16> to vector<32x22xbf16>
    %c224_51 = arith.constant 224 : index
    %c0_52 = arith.constant 0 : index
    %80 = vector.load %arg24[%c224_51, %c0_52] : memref<288x384xbf16, #tpu.memory_space<vmem>>, vector<32x22xbf16>
    tpu.vector_store %arg24[%c224_51, %c0_52], %79 {strides = array<i32>} : memref<288x384xbf16, #tpu.memory_space<vmem>>, vector<32x22xbf16>,
    %81 = vector.extract_strided_slice %64 {offsets = [0, 14], sizes = [32, 22], strides = [1, 1]} : vector<32x128xbf16> to vector<32x22xbf16>
    %c256_53 = arith.constant 256 : index
    %c0_54 = arith.constant 0 : index
    %82 = vector.load %arg24[%c256_53, %c0_54] : memref<288x384xbf16, #tpu.memory_space<vmem>>, vector<32x22xbf16>
    tpu.vector_store %arg24[%c256_53, %c0_54], %81 {strides = array<i32>} : memref<288x384xbf16, #tpu.memory_space<vmem>>, vector<32x22xbf16>,
    %c0_55 = arith.constant 0 : index
    %c0_56 = arith.constant 0 : index
    %83 = vector.load %arg24[%c0_55, %c0_56] : memref<288x384xbf16, #tpu.memory_space<vmem>>, vector<288x22xbf16>
    %c0_57 = arith.constant 0 : index
    %c0_58 = arith.constant 0 : index
    %84 = vector.load %arg6[%c0_57, %c0_58] : memref<32x288xbf16, #tpu.memory_space<vmem>>, vector<32x288xbf16>
    %cst_59 = arith.constant dense<0.000000e+00> : vector<32x22xf32>
    %85 = tpu.matmul %84, %83, %cst_59 {dimension_numbers = #tpu.dot_dimension_numbers<[1], [0], [0], [1], [0, 0, 1, 1], [], []>} : vector<32x288xbf16>, vector<288x22xbf16>, vector<32x22xf32> -> vector<32x22xf32>
    %c0_60 = arith.constant 0 : index
    %c0_61 = arith.constant 0 : index
    %86 = vector.load %arg15[%c0_60, %c0_61] : memref<1x22xf32, #tpu.memory_space<vmem>>, vector<1x22xf32>
    %87 = vector.broadcast %86 : vector<1x22xf32> to vector<32x22xf32>
    %88 = arith.mulf %85, %87 : vector<32x22xf32>
    %cst_62 = arith.constant dense<0.000000e+00> : vector<32xf32>
    %89 = vector.multi_reduction <add>, %88, %cst_62 [1] : vector<32x22xf32> to vector<32xf32>
    %90 = vector.shape_cast %89 : vector<32xf32> to vector<32x1xf32>
    %cst_63 = arith.constant 6.250000e-02 : f32
    %91 = vector.broadcast %cst_63 : f32 to vector<32x1xf32>
    %92 = arith.mulf %90, %91 : vector<32x1xf32>
    %93 = arith.mulf %88, %85 : vector<32x22xf32>
    %cst_64 = arith.constant dense<0.000000e+00> : vector<32xf32>
    %94 = vector.multi_reduction <add>, %93, %cst_64 [1] : vector<32x22xf32> to vector<32xf32>
    %95 = vector.shape_cast %94 : vector<32xf32> to vector<32x1xf32>
    %cst_65 = arith.constant 6.250000e-02 : f32
    %96 = vector.broadcast %cst_65 : f32 to vector<32x1xf32>
    %97 = arith.mulf %95, %96 : vector<32x1xf32>
    %98 = arith.mulf %92, %92 : vector<32x1xf32>
    %99 = arith.subf %97, %98 : vector<32x1xf32>
    %cst_66 = arith.constant 0.000000e+00 : f32
    %100 = vector.broadcast %cst_66 : f32 to vector<32x1xf32>
    %101 = arith.maximumf %99, %100 : vector<32x1xf32>
    %cst_67 = arith.constant 9.99999974E-6 : f32
    %102 = vector.broadcast %cst_67 : f32 to vector<32x1xf32>
    %103 = arith.addf %101, %102 : vector<32x1xf32>
    %104 = math.rsqrt %103 : vector<32x1xf32>
    %105 = arith.mulf %10, %104 : vector<32x1xf32>
    %106 = vector.broadcast %105 : vector<32x1xf32> to vector<32x22xf32>
    %107 = arith.mulf %85, %106 : vector<32x22xf32>
    %108 = arith.mulf %92, %105 : vector<32x1xf32>
    %109 = arith.subf %11, %108 : vector<32x1xf32>
    %110 = vector.broadcast %109 : vector<32x1xf32> to vector<32x22xf32>
    %111 = arith.addf %107, %110 : vector<32x22xf32>
    %112 = vector.extract_strided_slice %1 {offsets = [0, 7], sizes = [32, 22], strides = [1, 1]} : vector<32x128xbf16> to vector<32x22xbf16>
    %113 = arith.extf %112 : vector<32x22xbf16> to vector<32x22xf32>
    %114 = arith.addf %111, %113 : vector<32x22xf32>
    %115 = arith.truncf %114 : vector<32x22xf32> to vector<32x22xbf16>
    %c0_68 = arith.constant 0 : index
    %c0_69 = arith.constant 0 : index
    %116 = vector.load %arg19[%c0_68, %c0_69] : memref<22x128xbf16, #tpu.memory_space<vmem>>, vector<22x128xbf16>
    %cst_70 = arith.constant dense<0.000000e+00> : vector<32x128xf32>
    %117 = tpu.matmul %115, %116, %cst_70 {dimension_numbers = #tpu.dot_dimension_numbers<[1], [0], [0], [1], [0, 0, 1, 1], [], []>} : vector<32x22xbf16>, vector<22x128xbf16>, vector<32x128xf32> -> vector<32x128xf32>
    %118 = arith.truncf %117 : vector<32x128xf32> to vector<32x128xbf16>
    %119 = vector.extract_strided_slice %118 {offsets = [0, 0], sizes = [32, 78], strides = [1, 1]} : vector<32x128xbf16> to vector<32x78xbf16>
    %c0_71 = arith.constant 0 : index
    %c0_72 = arith.constant 0 : index
    %120 = vector.load %arg24[%c0_71, %c0_72] : memref<288x384xbf16, #tpu.memory_space<vmem>>, vector<32x78xbf16>
    tpu.vector_store %arg24[%c0_71, %c0_72], %119 {strides = array<i32>} : memref<288x384xbf16, #tpu.memory_space<vmem>>, vector<32x78xbf16>,
    %121 = vector.extract_strided_slice %118 {offsets = [0, 1], sizes = [32, 78], strides = [1, 1]} : vector<32x128xbf16> to vector<32x78xbf16>
    %c32_73 = arith.constant 32 : index
    %c0_74 = arith.constant 0 : index
    %122 = vector.load %arg24[%c32_73, %c0_74] : memref<288x384xbf16, #tpu.memory_space<vmem>>, vector<32x78xbf16>
    tpu.vector_store %arg24[%c32_73, %c0_74], %121 {strides = array<i32>} : memref<288x384xbf16, #tpu.memory_space<vmem>>, vector<32x78xbf16>,
    %123 = vector.extract_strided_slice %118 {offsets = [0, 2], sizes = [32, 78], strides = [1, 1]} : vector<32x128xbf16> to vector<32x78xbf16>
    %c64_75 = arith.constant 64 : index
    %c0_76 = arith.constant 0 : index
    %124 = vector.load %arg24[%c64_75, %c0_76] : memref<288x384xbf16, #tpu.memory_space<vmem>>, vector<32x78xbf16>
    tpu.vector_store %arg24[%c64_75, %c0_76], %123 {strides = array<i32>} : memref<288x384xbf16, #tpu.memory_space<vmem>>, vector<32x78xbf16>,
    %125 = vector.extract_strided_slice %118 {offsets = [0, 10], sizes = [32, 78], strides = [1, 1]} : vector<32x128xbf16> to vector<32x78xbf16>
    %c96_77 = arith.constant 96 : index
    %c0_78 = arith.constant 0 : index
    %126 = vector.load %arg24[%c96_77, %c0_78] : memref<288x384xbf16, #tpu.memory_space<vmem>>, vector<32x78xbf16>
    tpu.vector_store %arg24[%c96_77, %c0_78], %125 {strides = array<i32>} : memref<288x384xbf16, #tpu.memory_space<vmem>>, vector<32x78xbf16>,
    %127 = vector.extract_strided_slice %118 {offsets = [0, 11], sizes = [32, 78], strides = [1, 1]} : vector<32x128xbf16> to vector<32x78xbf16>
    %c128_79 = arith.constant 128 : index
    %c0_80 = arith.constant 0 : index
    %128 = vector.load %arg24[%c128_79, %c0_80] : memref<288x384xbf16, #tpu.memory_space<vmem>>, vector<32x78xbf16>
    tpu.vector_store %arg24[%c128_79, %c0_80], %127 {strides = array<i32>} : memref<288x384xbf16, #tpu.memory_space<vmem>>, vector<32x78xbf16>,
    %129 = vector.extract_strided_slice %118 {offsets = [0, 12], sizes = [32, 78], strides = [1, 1]} : vector<32x128xbf16> to vector<32x78xbf16>
    %c160_81 = arith.constant 160 : index
    %c0_82 = arith.constant 0 : index
    %130 = vector.load %arg24[%c160_81, %c0_82] : memref<288x384xbf16, #tpu.memory_space<vmem>>, vector<32x78xbf16>
    tpu.vector_store %arg24[%c160_81, %c0_82], %129 {strides = array<i32>} : memref<288x384xbf16, #tpu.memory_space<vmem>>, vector<32x78xbf16>,
    %131 = vector.extract_strided_slice %118 {offsets = [0, 20], sizes = [32, 78], strides = [1, 1]} : vector<32x128xbf16> to vector<32x78xbf16>
    %c192_83 = arith.constant 192 : index
    %c0_84 = arith.constant 0 : index
    %132 = vector.load %arg24[%c192_83, %c0_84] : memref<288x384xbf16, #tpu.memory_space<vmem>>, vector<32x78xbf16>
    tpu.vector_store %arg24[%c192_83, %c0_84], %131 {strides = array<i32>} : memref<288x384xbf16, #tpu.memory_space<vmem>>, vector<32x78xbf16>,
    %133 = vector.extract_strided_slice %118 {offsets = [0, 21], sizes = [32, 78], strides = [1, 1]} : vector<32x128xbf16> to vector<32x78xbf16>
    %c224_85 = arith.constant 224 : index
    %c0_86 = arith.constant 0 : index
    %134 = vector.load %arg24[%c224_85, %c0_86] : memref<288x384xbf16, #tpu.memory_space<vmem>>, vector<32x78xbf16>
    tpu.vector_store %arg24[%c224_85, %c0_86], %133 {strides = array<i32>} : memref<288x384xbf16, #tpu.memory_space<vmem>>, vector<32x78xbf16>,
    %135 = vector.extract_strided_slice %118 {offsets = [0, 22], sizes = [32, 78], strides = [1, 1]} : vector<32x128xbf16> to vector<32x78xbf16>
    %c256_87 = arith.constant 256 : index
    %c0_88 = arith.constant 0 : index
    %136 = vector.load %arg24[%c256_87, %c0_88] : memref<288x384xbf16, #tpu.memory_space<vmem>>, vector<32x78xbf16>
    tpu.vector_store %arg24[%c256_87, %c0_88], %135 {strides = array<i32>} : memref<288x384xbf16, #tpu.memory_space<vmem>>, vector<32x78xbf16>,
    %c0_89 = arith.constant 0 : index
    %c0_90 = arith.constant 0 : index
    %137 = vector.load %arg24[%c0_89, %c0_90] : memref<288x384xbf16, #tpu.memory_space<vmem>>, vector<288x78xbf16>
    %c0_91 = arith.constant 0 : index
    %c0_92 = arith.constant 0 : index
    %138 = vector.load %arg7[%c0_91, %c0_92] : memref<16x288xbf16, #tpu.memory_space<vmem>>, vector<16x288xbf16>
    %cst_93 = arith.constant dense<0.000000e+00> : vector<16x78xf32>
    %139 = tpu.matmul %138, %137, %cst_93 {dimension_numbers = #tpu.dot_dimension_numbers<[1], [0], [0], [1], [0, 0, 1, 1], [], []>} : vector<16x288xbf16>, vector<288x78xbf16>, vector<16x78xf32> -> vector<16x78xf32>
    %c0_94 = arith.constant 0 : index
    %c0_95 = arith.constant 0 : index
    %140 = vector.load %arg10[%c0_94, %c0_95] : memref<16x1xf32, #tpu.memory_space<vmem>>, vector<16x1xf32>
    %c0_96 = arith.constant 0 : index
    %c0_97 = arith.constant 0 : index
    %141 = vector.load %arg11[%c0_96, %c0_97] : memref<16x1xf32, #tpu.memory_space<vmem>>, vector<16x1xf32>
    %c0_98 = arith.constant 0 : index
    %c0_99 = arith.constant 0 : index
    %142 = vector.load %arg16[%c0_98, %c0_99] : memref<1x78xf32, #tpu.memory_space<vmem>>, vector<1x78xf32>
    %143 = vector.broadcast %142 : vector<1x78xf32> to vector<16x78xf32>
    %144 = arith.mulf %139, %143 : vector<16x78xf32>
    %cst_100 = arith.constant dense<0.000000e+00> : vector<16xf32>
    %145 = vector.multi_reduction <add>, %144, %cst_100 [1] : vector<16x78xf32> to vector<16xf32>
    %146 = vector.shape_cast %145 : vector<16xf32> to vector<16x1xf32>
    %cst_101 = arith.constant 1.562500e-02 : f32
    %147 = vector.broadcast %cst_101 : f32 to vector<16x1xf32>
    %148 = arith.mulf %146, %147 : vector<16x1xf32>
    %149 = arith.mulf %144, %139 : vector<16x78xf32>
    %cst_102 = arith.constant dense<0.000000e+00> : vector<16xf32>
    %150 = vector.multi_reduction <add>, %149, %cst_102 [1] : vector<16x78xf32> to vector<16xf32>
    %151 = vector.shape_cast %150 : vector<16xf32> to vector<16x1xf32>
    %cst_103 = arith.constant 1.562500e-02 : f32
    %152 = vector.broadcast %cst_103 : f32 to vector<16x1xf32>
    %153 = arith.mulf %151, %152 : vector<16x1xf32>
    %154 = arith.mulf %148, %148 : vector<16x1xf32>
    %155 = arith.subf %153, %154 : vector<16x1xf32>
    %cst_104 = arith.constant 0.000000e+00 : f32
    %156 = vector.broadcast %cst_104 : f32 to vector<16x1xf32>
    %157 = arith.maximumf %155, %156 : vector<16x1xf32>
    %cst_105 = arith.constant 9.99999974E-6 : f32
    %158 = vector.broadcast %cst_105 : f32 to vector<16x1xf32>
    %159 = arith.addf %157, %158 : vector<16x1xf32>
    %160 = math.rsqrt %159 : vector<16x1xf32>
    %161 = arith.mulf %140, %160 : vector<16x1xf32>
    %162 = vector.broadcast %161 : vector<16x1xf32> to vector<16x78xf32>
    %163 = arith.mulf %139, %162 : vector<16x78xf32>
    %164 = arith.mulf %148, %161 : vector<16x1xf32>
    %165 = arith.subf %141, %164 : vector<16x1xf32>
    %166 = vector.broadcast %165 : vector<16x1xf32> to vector<16x78xf32>
    %167 = arith.addf %163, %166 : vector<16x78xf32>
    %cst_106 = arith.constant 0.000000e+00 : f32
    %168 = vector.broadcast %cst_106 : f32 to vector<16x78xf32>
    %169 = arith.maximumf %167, %168 : vector<16x78xf32>
    %170 = vector.extract_strided_slice %3 {offsets = [0, 11], sizes = [16, 78], strides = [1, 1]} : vector<16x128xbf16> to vector<16x78xbf16>
    %171 = arith.extf %170 : vector<16x78xbf16> to vector<16x78xf32>
    %172 = arith.addf %169, %171 : vector<16x78xf32>
    %173 = arith.truncf %172 : vector<16x78xf32> to vector<16x78xbf16>
    %c0_107 = arith.constant 0 : index
    %c0_108 = arith.constant 0 : index
    %174 = vector.load %arg20[%c0_107, %c0_108] : memref<78x384xbf16, #tpu.memory_space<vmem>>, vector<78x384xbf16>
    %cst_109 = arith.constant dense<0.000000e+00> : vector<16x384xf32>
    %175 = tpu.matmul %173, %174, %cst_109 {dimension_numbers = #tpu.dot_dimension_numbers<[1], [0], [0], [1], [0, 0, 1, 1], [], []>} : vector<16x78xbf16>, vector<78x384xbf16>, vector<16x384xf32> -> vector<16x384xf32>
    %176 = arith.truncf %175 : vector<16x384xf32> to vector<16x384xbf16>
    %177 = vector.extract_strided_slice %176 {offsets = [0, 0], sizes = [16, 286], strides = [1, 1]} : vector<16x384xbf16> to vector<16x286xbf16>
    %c0_110 = arith.constant 0 : index
    %c0_111 = arith.constant 0 : index
    %178 = vector.load %arg24[%c0_110, %c0_111] : memref<288x384xbf16, #tpu.memory_space<vmem>>, vector<16x286xbf16>
    tpu.vector_store %arg24[%c0_110, %c0_111], %177 {strides = array<i32>} : memref<288x384xbf16, #tpu.memory_space<vmem>>, vector<16x286xbf16>,
    %179 = vector.extract_strided_slice %176 {offsets = [0, 1], sizes = [16, 286], strides = [1, 1]} : vector<16x384xbf16> to vector<16x286xbf16>
    %c16 = arith.constant 16 : index
    %c0_112 = arith.constant 0 : index
    %180 = vector.load %arg24[%c16, %c0_112] : memref<288x384xbf16, #tpu.memory_space<vmem>>, vector<16x286xbf16>
    tpu.vector_store %arg24[%c16, %c0_112], %179 {strides = array<i32>} : memref<288x384xbf16, #tpu.memory_space<vmem>>, vector<16x286xbf16>,
    %181 = vector.extract_strided_slice %176 {offsets = [0, 2], sizes = [16, 286], strides = [1, 1]} : vector<16x384xbf16> to vector<16x286xbf16>
    %c32_113 = arith.constant 32 : index
    %c0_114 = arith.constant 0 : index
    %182 = vector.load %arg24[%c32_113, %c0_114] : memref<288x384xbf16, #tpu.memory_space<vmem>>, vector<16x286xbf16>
    tpu.vector_store %arg24[%c32_113, %c0_114], %181 {strides = array<i32>} : memref<288x384xbf16, #tpu.memory_space<vmem>>, vector<16x286xbf16>,
    %183 = vector.extract_strided_slice %176 {offsets = [0, 18], sizes = [16, 286], strides = [1, 1]} : vector<16x384xbf16> to vector<16x286xbf16>
    %c48 = arith.constant 48 : index
    %c0_115 = arith.constant 0 : index
    %184 = vector.load %arg24[%c48, %c0_115] : memref<288x384xbf16, #tpu.memory_space<vmem>>, vector<16x286xbf16>
    tpu.vector_store %arg24[%c48, %c0_115], %183 {strides = array<i32>} : memref<288x384xbf16, #tpu.memory_space<vmem>>, vector<16x286xbf16>,
    %185 = vector.extract_strided_slice %176 {offsets = [0, 19], sizes = [16, 286], strides = [1, 1]} : vector<16x384xbf16> to vector<16x286xbf16>
    %c64_116 = arith.constant 64 : index
    %c0_117 = arith.constant 0 : index
    %186 = vector.load %arg24[%c64_116, %c0_117] : memref<288x384xbf16, #tpu.memory_space<vmem>>, vector<16x286xbf16>
    tpu.vector_store %arg24[%c64_116, %c0_117], %185 {strides = array<i32>} : memref<288x384xbf16, #tpu.memory_space<vmem>>, vector<16x286xbf16>,
    %187 = vector.extract_strided_slice %176 {offsets = [0, 20], sizes = [16, 286], strides = [1, 1]} : vector<16x384xbf16> to vector<16x286xbf16>
    %c80 = arith.constant 80 : index
    %c0_118 = arith.constant 0 : index
    %188 = vector.load %arg24[%c80, %c0_118] : memref<288x384xbf16, #tpu.memory_space<vmem>>, vector<16x286xbf16>
    tpu.vector_store %arg24[%c80, %c0_118], %187 {strides = array<i32>} : memref<288x384xbf16, #tpu.memory_space<vmem>>, vector<16x286xbf16>,
    %189 = vector.extract_strided_slice %176 {offsets = [0, 36], sizes = [16, 286], strides = [1, 1]} : vector<16x384xbf16> to vector<16x286xbf16>
    %c96_119 = arith.constant 96 : index
    %c0_120 = arith.constant 0 : index
    %190 = vector.load %arg24[%c96_119, %c0_120] : memref<288x384xbf16, #tpu.memory_space<vmem>>, vector<16x286xbf16>
    tpu.vector_store %arg24[%c96_119, %c0_120], %189 {strides = array<i32>} : memref<288x384xbf16, #tpu.memory_space<vmem>>, vector<16x286xbf16>,
    %191 = vector.extract_strided_slice %176 {offsets = [0, 37], sizes = [16, 286], strides = [1, 1]} : vector<16x384xbf16> to vector<16x286xbf16>
    %c112 = arith.constant 112 : index
    %c0_121 = arith.constant 0 : index
    %192 = vector.load %arg24[%c112, %c0_121] : memref<288x384xbf16, #tpu.memory_space<vmem>>, vector<16x286xbf16>
    tpu.vector_store %arg24[%c112, %c0_121], %191 {strides = array<i32>} : memref<288x384xbf16, #tpu.memory_space<vmem>>, vector<16x286xbf16>,
    %193 = vector.extract_strided_slice %176 {offsets = [0, 38], sizes = [16, 286], strides = [1, 1]} : vector<16x384xbf16> to vector<16x286xbf16>
    %c128_122 = arith.constant 128 : index
    %c0_123 = arith.constant 0 : index
    %194 = vector.load %arg24[%c128_122, %c0_123] : memref<288x384xbf16, #tpu.memory_space<vmem>>, vector<16x286xbf16>
    tpu.vector_store %arg24[%c128_122, %c0_123], %193 {strides = array<i32>} : memref<288x384xbf16, #tpu.memory_space<vmem>>, vector<16x286xbf16>,
    %c0_124 = arith.constant 0 : index
    %c0_125 = arith.constant 0 : index
    %195 = vector.load %arg24[%c0_124, %c0_125] : memref<288x384xbf16, #tpu.memory_space<vmem>>, vector<144x286xbf16>
    %c0_126 = arith.constant 0 : index
    %c0_127 = arith.constant 0 : index
    %196 = vector.load %arg8[%c0_126, %c0_127] : memref<8x144xbf16, #tpu.memory_space<vmem>>, vector<8x144xbf16>
    %cst_128 = arith.constant dense<0.000000e+00> : vector<8x286xf32>
    %197 = tpu.matmul %196, %195, %cst_128 {dimension_numbers = #tpu.dot_dimension_numbers<[1], [0], [0], [1], [0, 0, 1, 1], [], []>} : vector<8x144xbf16>, vector<144x286xbf16>, vector<8x286xf32> -> vector<8x286xf32>
    %c0_129 = arith.constant 0 : index
    %c0_130 = arith.constant 0 : index
    %198 = vector.load %arg12[%c0_129, %c0_130] : memref<8x1xf32, #tpu.memory_space<vmem>>, vector<8x1xf32>
    %c0_131 = arith.constant 0 : index
    %c0_132 = arith.constant 0 : index
    %199 = vector.load %arg13[%c0_131, %c0_132] : memref<8x1xf32, #tpu.memory_space<vmem>>, vector<8x1xf32>
    %c0_133 = arith.constant 0 : index
    %c0_134 = arith.constant 0 : index
    %200 = vector.load %arg17[%c0_133, %c0_134] : memref<1x286xf32, #tpu.memory_space<vmem>>, vector<1x286xf32>
    %201 = vector.broadcast %200 : vector<1x286xf32> to vector<8x286xf32>
    %202 = arith.mulf %197, %201 : vector<8x286xf32>
    %cst_135 = arith.constant dense<0.000000e+00> : vector<8xf32>
    %203 = vector.multi_reduction <add>, %202, %cst_135 [1] : vector<8x286xf32> to vector<8xf32>
    %204 = vector.shape_cast %203 : vector<8xf32> to vector<8x1xf32>
    %cst_136 = arith.constant 3.906250e-03 : f32
    %205 = vector.broadcast %cst_136 : f32 to vector<8x1xf32>
    %206 = arith.mulf %204, %205 : vector<8x1xf32>
    %207 = arith.mulf %202, %197 : vector<8x286xf32>
    %cst_137 = arith.constant dense<0.000000e+00> : vector<8xf32>
    %208 = vector.multi_reduction <add>, %207, %cst_137 [1] : vector<8x286xf32> to vector<8xf32>
    %209 = vector.shape_cast %208 : vector<8xf32> to vector<8x1xf32>
    %cst_138 = arith.constant 3.906250e-03 : f32
    %210 = vector.broadcast %cst_138 : f32 to vector<8x1xf32>
    %211 = arith.mulf %209, %210 : vector<8x1xf32>
    %212 = arith.mulf %206, %206 : vector<8x1xf32>
    %213 = arith.subf %211, %212 : vector<8x1xf32>
    %cst_139 = arith.constant 0.000000e+00 : f32
    %214 = vector.broadcast %cst_139 : f32 to vector<8x1xf32>
    %215 = arith.maximumf %213, %214 : vector<8x1xf32>
    %cst_140 = arith.constant 9.99999974E-6 : f32
    %216 = vector.broadcast %cst_140 : f32 to vector<8x1xf32>
    %217 = arith.addf %215, %216 : vector<8x1xf32>
    %218 = math.rsqrt %217 : vector<8x1xf32>
    %219 = arith.mulf %198, %218 : vector<8x1xf32>
    %220 = vector.broadcast %219 : vector<8x1xf32> to vector<8x286xf32>
    %221 = arith.mulf %197, %220 : vector<8x286xf32>
    %222 = arith.mulf %206, %219 : vector<8x1xf32>
    %223 = arith.subf %199, %222 : vector<8x1xf32>
    %224 = vector.broadcast %223 : vector<8x1xf32> to vector<8x286xf32>
    %225 = arith.addf %221, %224 : vector<8x286xf32>
    %cst_141 = arith.constant 0.000000e+00 : f32
    %226 = vector.broadcast %cst_141 : f32 to vector<8x286xf32>
    %227 = arith.maximumf %225, %226 : vector<8x286xf32>
    %228 = vector.extract_strided_slice %5 {offsets = [0, 19], sizes = [8, 286], strides = [1, 1]} : vector<8x384xbf16> to vector<8x286xbf16>
    %229 = arith.extf %228 : vector<8x286xbf16> to vector<8x286xf32>
    %230 = arith.addf %227, %229 : vector<8x286xf32>
    %231 = arith.truncf %230 : vector<8x286xf32> to vector<8x286xbf16>
    %c0_142 = arith.constant 0 : index
    %c0_143 = arith.constant 0 : index
    %232 = vector.load %arg21[%c0_142, %c0_143] : memref<286x384xbf16, #tpu.memory_space<vmem>>, vector<286x384xbf16>
    %cst_144 = arith.constant dense<0.000000e+00> : vector<8x384xf32>
    %233 = tpu.matmul %231, %232, %cst_144 {dimension_numbers = #tpu.dot_dimension_numbers<[1], [0], [0], [1], [0, 0, 1, 1], [], []>} : vector<8x286xbf16>, vector<286x384xbf16>, vector<8x384xf32> -> vector<8x384xf32>
    %234 = arith.truncf %233 : vector<8x384xf32> to vector<8x384xbf16>
    %235 = vector.extract_strided_slice %234 {offsets = [0, 0], sizes = [8, 286], strides = [1, 1]} : vector<8x384xbf16> to vector<8x286xbf16>
    %c0_145 = arith.constant 0 : index
    %c0_146 = arith.constant 0 : index
    %236 = vector.load %arg24[%c0_145, %c0_146] : memref<288x384xbf16, #tpu.memory_space<vmem>>, vector<8x286xbf16>
    tpu.vector_store %arg24[%c0_145, %c0_146], %235 {strides = array<i32>} : memref<288x384xbf16, #tpu.memory_space<vmem>>, vector<8x286xbf16>,
    %237 = vector.extract_strided_slice %234 {offsets = [0, 1], sizes = [8, 286], strides = [1, 1]} : vector<8x384xbf16> to vector<8x286xbf16>
    %c8 = arith.constant 8 : index
    %c0_147 = arith.constant 0 : index
    %238 = vector.load %arg24[%c8, %c0_147] : memref<288x384xbf16, #tpu.memory_space<vmem>>, vector<8x286xbf16>
    tpu.vector_store %arg24[%c8, %c0_147], %237 {strides = array<i32>} : memref<288x384xbf16, #tpu.memory_space<vmem>>, vector<8x286xbf16>,
    %239 = vector.extract_strided_slice %234 {offsets = [0, 2], sizes = [8, 286], strides = [1, 1]} : vector<8x384xbf16> to vector<8x286xbf16>
    %c16_148 = arith.constant 16 : index
    %c0_149 = arith.constant 0 : index
    %240 = vector.load %arg24[%c16_148, %c0_149] : memref<288x384xbf16, #tpu.memory_space<vmem>>, vector<8x286xbf16>
    tpu.vector_store %arg24[%c16_148, %c0_149], %239 {strides = array<i32>} : memref<288x384xbf16, #tpu.memory_space<vmem>>, vector<8x286xbf16>,
    %241 = vector.extract_strided_slice %234 {offsets = [0, 18], sizes = [8, 286], strides = [1, 1]} : vector<8x384xbf16> to vector<8x286xbf16>
    %c24 = arith.constant 24 : index
    %c0_150 = arith.constant 0 : index
    %242 = vector.load %arg24[%c24, %c0_150] : memref<288x384xbf16, #tpu.memory_space<vmem>>, vector<8x286xbf16>
    tpu.vector_store %arg24[%c24, %c0_150], %241 {strides = array<i32>} : memref<288x384xbf16, #tpu.memory_space<vmem>>, vector<8x286xbf16>,
    %243 = vector.extract_strided_slice %234 {offsets = [0, 19], sizes = [8, 286], strides = [1, 1]} : vector<8x384xbf16> to vector<8x286xbf16>
    %c32_151 = arith.constant 32 : index
    %c0_152 = arith.constant 0 : index
    %244 = vector.load %arg24[%c32_151, %c0_152] : memref<288x384xbf16, #tpu.memory_space<vmem>>, vector<8x286xbf16>
    tpu.vector_store %arg24[%c32_151, %c0_152], %243 {strides = array<i32>} : memref<288x384xbf16, #tpu.memory_space<vmem>>, vector<8x286xbf16>,
    %245 = vector.extract_strided_slice %234 {offsets = [0, 20], sizes = [8, 286], strides = [1, 1]} : vector<8x384xbf16> to vector<8x286xbf16>
    %c40 = arith.constant 40 : index
    %c0_153 = arith.constant 0 : index
    %246 = vector.load %arg24[%c40, %c0_153] : memref<288x384xbf16, #tpu.memory_space<vmem>>, vector<8x286xbf16>
    tpu.vector_store %arg24[%c40, %c0_153], %245 {strides = array<i32>} : memref<288x384xbf16, #tpu.memory_space<vmem>>, vector<8x286xbf16>,
    %247 = vector.extract_strided_slice %234 {offsets = [0, 36], sizes = [8, 286], strides = [1, 1]} : vector<8x384xbf16> to vector<8x286xbf16>
    %c48_154 = arith.constant 48 : index
    %c0_155 = arith.constant 0 : index
    %248 = vector.load %arg24[%c48_154, %c0_155] : memref<288x384xbf16, #tpu.memory_space<vmem>>, vector<8x286xbf16>
    tpu.vector_store %arg24[%c48_154, %c0_155], %247 {strides = array<i32>} : memref<288x384xbf16, #tpu.memory_space<vmem>>, vector<8x286xbf16>,
    %249 = vector.extract_strided_slice %234 {offsets = [0, 37], sizes = [8, 286], strides = [1, 1]} : vector<8x384xbf16> to vector<8x286xbf16>
    %c56 = arith.constant 56 : index
    %c0_156 = arith.constant 0 : index
    %250 = vector.load %arg24[%c56, %c0_156] : memref<288x384xbf16, #tpu.memory_space<vmem>>, vector<8x286xbf16>
    tpu.vector_store %arg24[%c56, %c0_156], %249 {strides = array<i32>} : memref<288x384xbf16, #tpu.memory_space<vmem>>, vector<8x286xbf16>,
    %251 = vector.extract_strided_slice %234 {offsets = [0, 38], sizes = [8, 286], strides = [1, 1]} : vector<8x384xbf16> to vector<8x286xbf16>
    %c64_157 = arith.constant 64 : index
    %c0_158 = arith.constant 0 : index
    %252 = vector.load %arg24[%c64_157, %c0_158] : memref<288x384xbf16, #tpu.memory_space<vmem>>, vector<8x286xbf16>
    tpu.vector_store %arg24[%c64_157, %c0_158], %251 {strides = array<i32>} : memref<288x384xbf16, #tpu.memory_space<vmem>>, vector<8x286xbf16>,
    %c0_159 = arith.constant 0 : index
    %c0_160 = arith.constant 0 : index
    %253 = vector.load %arg24[%c0_159, %c0_160] : memref<288x384xbf16, #tpu.memory_space<vmem>>, vector<72x286xbf16>
    %c0_161 = arith.constant 0 : index
    %c0_162 = arith.constant 0 : index
    %254 = vector.load %arg9[%c0_161, %c0_162] : memref<3x72xbf16, #tpu.memory_space<vmem>>, vector<3x72xbf16>
    %cst_163 = arith.constant dense<0.000000e+00> : vector<3x286xf32>
    %255 = tpu.matmul %254, %253, %cst_163 {dimension_numbers = #tpu.dot_dimension_numbers<[1], [0], [0], [1], [0, 0, 1, 1], [], []>} : vector<3x72xbf16>, vector<72x286xbf16>, vector<3x286xf32> -> vector<3x286xf32>
    %c0_164 = arith.constant 0 : index
    %c0_165 = arith.constant 0 : index
    %256 = vector.load %arg14[%c0_164, %c0_165] : memref<3x1xf32, #tpu.memory_space<vmem>>, vector<3x1xf32>
    %257 = vector.broadcast %256 : vector<3x1xf32> to vector<3x286xf32>
    %258 = arith.addf %255, %257 : vector<3x286xf32>
    %259 = math.tanh %258 : vector<3x286xf32>
    %c0_166 = arith.constant 0 : index
    %c0_167 = arith.constant 0 : index
    %260 = vector.load %arg22[%c0_166, %c0_167] : memref<286x256xf32, #tpu.memory_space<vmem>>, vector<286x256xf32>
    %cst_168 = arith.constant dense<0.000000e+00> : vector<3x256xf32>
    %261 = tpu.matmul %259, %260, %cst_168 {dimension_numbers = #tpu.dot_dimension_numbers<[1], [0], [0], [1], [0, 0, 1, 1], [], []>} : vector<3x286xf32>, vector<286x256xf32>, vector<3x256xf32> -> vector<3x256xf32>
    %c0_169 = arith.constant 0 : index
    %c0_170 = arith.constant 0 : index
    %c0_171 = arith.constant 0 : index
    %262 = vector.load %arg23[%c0_169, %c0_170, %c0_171] : memref<1x3x256xf32, #tpu.memory_space<vmem>>, vector<1x3x256xf32>
    %263 = vector.shape_cast %262 : vector<1x3x256xf32> to vector<3x256xf32>
    %264 = vector.shape_cast %261 : vector<3x256xf32> to vector<1x3x256xf32>
    tpu.vector_store %arg23[%c0_169, %c0_170, %c0_171], %264 {strides = array<i32>} : memref<1x3x256xf32, #tpu.memory_space<vmem>>, vector<1x3x256xf32>,
    return
  }
  func.func @transform_0(%arg0: i32) -> (i32, i32, i32) {
    %c0_i32 = arith.constant 0 : i32
    %c0_i32_0 = arith.constant 0 : i32
    %c0_i32_1 = arith.constant 0 : i32
    return %arg0, %c0_i32, %c0_i32_0 : i32, i32, i32
  }
  func.func @transform_1(%arg0: i32) -> (i32, i32, i32) {
    %c0_i32 = arith.constant 0 : i32
    %c0_i32_0 = arith.constant 0 : i32
    %c0_i32_1 = arith.constant 0 : i32
    return %arg0, %c0_i32, %c0_i32_0 : i32, i32, i32
  }
  func.func @transform_2(%arg0: i32) -> (i32, i32, i32) {
    %c0_i32 = arith.constant 0 : i32
    %c0_i32_0 = arith.constant 0 : i32
    %c0_i32_1 = arith.constant 0 : i32
    return %arg0, %c0_i32, %c0_i32_0 : i32, i32, i32
  }
  func.func @transform_3(%arg0: i32) -> (i32, i32, i32) {
    %c0_i32 = arith.constant 0 : i32
    %c0_i32_0 = arith.constant 0 : i32
    %c0_i32_1 = arith.constant 0 : i32
    return %arg0, %c0_i32, %c0_i32_0 : i32, i32, i32
  }
  func.func @transform_4(%arg0: i32) -> (i32, i32) {
    %c0_i32 = arith.constant 0 : i32
    %c0_i32_0 = arith.constant 0 : i32
    %c0_i32_1 = arith.constant 0 : i32
    return %c0_i32, %c0_i32_0 : i32, i32
  }
  func.func @transform_5(%arg0: i32) -> (i32, i32) {
    %c0_i32 = arith.constant 0 : i32
    %c0_i32_0 = arith.constant 0 : i32
    %c0_i32_1 = arith.constant 0 : i32
    return %c0_i32, %c0_i32_0 : i32, i32
  }
  func.func @transform_6(%arg0: i32) -> (i32, i32) {
    %c0_i32 = arith.constant 0 : i32
    %c0_i32_0 = arith.constant 0 : i32
    %c0_i32_1 = arith.constant 0 : i32
    return %c0_i32, %c0_i32_0 : i32, i32
  }
  func.func @transform_7(%arg0: i32) -> (i32, i32) {
    %c0_i32 = arith.constant 0 : i32
    %c0_i32_0 = arith.constant 0 : i32
    %c0_i32_1 = arith.constant 0 : i32
    return %c0_i32, %c0_i32_0 : i32, i32
  }
  func.func @transform_8(%arg0: i32) -> (i32, i32) {
    %c0_i32 = arith.constant 0 : i32
    %c0_i32_0 = arith.constant 0 : i32
    %c0_i32_1 = arith.constant 0 : i32
    return %c0_i32, %c0_i32_0 : i32, i32
  }
  func.func @transform_9(%arg0: i32) -> (i32, i32) {
    %c0_i32 = arith.constant 0 : i32
    %c0_i32_0 = arith.constant 0 : i32
    %c0_i32_1 = arith.constant 0 : i32
    return %c0_i32, %c0_i32_0 : i32, i32
  }
  func.func @transform_10(%arg0: i32) -> (i32, i32) {
    %c0_i32 = arith.constant 0 : i32
    %c0_i32_0 = arith.constant 0 : i32
    %c0_i32_1 = arith.constant 0 : i32
    return %c0_i32, %c0_i32_0 : i32, i32
  }
  func.func @transform_11(%arg0: i32) -> (i32, i32) {
    %c0_i32 = arith.constant 0 : i32
    %c0_i32_0 = arith.constant 0 : i32
    %c0_i32_1 = arith.constant 0 : i32
    return %c0_i32, %c0_i32_0 : i32, i32
  }
  func.func @transform_12(%arg0: i32) -> (i32, i32) {
    %c0_i32 = arith.constant 0 : i32
    %c0_i32_0 = arith.constant 0 : i32
    %c0_i32_1 = arith.constant 0 : i32
    return %c0_i32, %c0_i32_0 : i32, i32
  }
  func.func @transform_13(%arg0: i32) -> (i32, i32) {
    %c0_i32 = arith.constant 0 : i32
    %c0_i32_0 = arith.constant 0 : i32
    %c0_i32_1 = arith.constant 0 : i32
    return %c0_i32, %c0_i32_0 : i32, i32
  }
  func.func @transform_14(%arg0: i32) -> (i32, i32) {
    %c0_i32 = arith.constant 0 : i32
    %c0_i32_0 = arith.constant 0 : i32
    %c0_i32_1 = arith.constant 0 : i32
    return %c0_i32, %c0_i32_0 : i32, i32
  }
  func.func @transform_15(%arg0: i32) -> (i32, i32) {
    %c0_i32 = arith.constant 0 : i32
    %c0_i32_0 = arith.constant 0 : i32
    %c0_i32_1 = arith.constant 0 : i32
    return %c0_i32, %c0_i32_0 : i32, i32
  }
  func.func @transform_16(%arg0: i32) -> (i32, i32) {
    %c0_i32 = arith.constant 0 : i32
    %c0_i32_0 = arith.constant 0 : i32
    %c0_i32_1 = arith.constant 0 : i32
    return %c0_i32, %c0_i32_0 : i32, i32
  }
  func.func @transform_17(%arg0: i32) -> (i32, i32) {
    %c0_i32 = arith.constant 0 : i32
    %c0_i32_0 = arith.constant 0 : i32
    %c0_i32_1 = arith.constant 0 : i32
    return %c0_i32, %c0_i32_0 : i32, i32
  }
  func.func @transform_18(%arg0: i32) -> (i32, i32) {
    %c0_i32 = arith.constant 0 : i32
    %c0_i32_0 = arith.constant 0 : i32
    %c0_i32_1 = arith.constant 0 : i32
    return %c0_i32, %c0_i32_0 : i32, i32
  }
  func.func @transform_19(%arg0: i32) -> (i32, i32) {
    %c0_i32 = arith.constant 0 : i32
    %c0_i32_0 = arith.constant 0 : i32
    %c0_i32_1 = arith.constant 0 : i32
    return %c0_i32, %c0_i32_0 : i32, i32
  }
  func.func @transform_20(%arg0: i32) -> (i32, i32) {
    %c0_i32 = arith.constant 0 : i32
    %c0_i32_0 = arith.constant 0 : i32
    %c0_i32_1 = arith.constant 0 : i32
    return %c0_i32, %c0_i32_0 : i32, i32
  }
  func.func @transform_21(%arg0: i32) -> (i32, i32) {
    %c0_i32 = arith.constant 0 : i32
    %c0_i32_0 = arith.constant 0 : i32
    %c0_i32_1 = arith.constant 0 : i32
    return %c0_i32, %c0_i32_0 : i32, i32
  }
  func.func @transform_22(%arg0: i32) -> (i32, i32, i32) {
    %c0_i32 = arith.constant 0 : i32
    %c0_i32_0 = arith.constant 0 : i32
    %c0_i32_1 = arith.constant 0 : i32
    return %arg0, %c0_i32, %c0_i32_0 : i32, i32, i32
  }
}

</mosaic_0001>

<bundles_post_ra>
// kernel: hidt_forward.2
= control target key start
LH: loop header
LB: loop body
LE: loop exit
PB: predicated region body
PF: predicated region fallthrough
CT: control target
= control target key end

     0   :  { %s3101_s27 = smov 0   ;;  %s3698_s0 = inlined_call_operand.vmem [shape: bf16[2,8,384], index: 0, kind: input, shape index: {}]   ;;  %s3699_s1 = inlined_call_operand.vmem [shape: bf16[8,72], index: 1, kind: input, shape index: {}]   ;;  %s3700_s2 = inlined_call_operand.vmem [shape: bf16[16,72], index: 2, kind: input, shape index: {}]   ;;  %s3701_s3 = inlined_call_operand.vmem [shape: bf16[32,144], index: 3, kind: input, shape index: {}]   ;;  %s3702_s4 = inlined_call_operand.vmem [shape: f32[8,1], index: 4, kind: input, shape index: {}]   ;;  %s3703_s5 = inlined_call_operand.vmem [shape: f32[8,1], index: 5, kind: input, shape index: {}]   ;;  %s3704_s6 = inlined_call_operand.vmem [shape: f32[16,1], index: 6, kind: input, shape index: {}]   ;;  %s3705_s7 = inlined_call_operand.vmem [shape: f32[16,1], index: 7, kind: input, shape index: {}]   ;;  %s3706_s8 = inlined_call_operand.vmem [shape: f32[32,1], index: 8, kind: input, shape index: {}]   ;;  %s3707_s9 = inlined_call_operand.vmem [shape: f32[32,1], index: 9, kind: input, shape index: {}]   ;;  %s3708_s10 = inlined_call_operand.vmem [shape: f32[1,286], index: 10, kind: input, shape index: {}]   ;;  %s3709_s11 = inlined_call_operand.vmem [shape: f32[1,286], index: 11, kind: input, shape index: {}]   ;;  %s3710_s12 = inlined_call_operand.vmem [shape: f32[1,78], index: 12, kind: input, shape index: {}]   ;;  %s3711_s13 = inlined_call_operand.vmem [shape: bf16[286,384], index: 13, kind: input, shape index: {}]   ;;  %s3712_s14 = inlined_call_operand.vmem [shape: bf16[286,128], index: 14, kind: input, shape index: {}]   ;;  %s3713_s15 = inlined_call_operand.vmem [shape: bf16[78,128], index: 15, kind: input, shape index: {}]   ;;  %s3714_s16 = inlined_call_operand.vmem [shape: bf16[2,8,384], index: 16, kind: output, shape index: {0}]   ;;  %s3715_s17 = inlined_call_operand.vmem [shape: bf16[2,16,128], index: 17, kind: output, shape index: {1}]   ;;  %s3716_s18 = inlined_call_operand.vmem [shape: bf16[2,32,128], index: 18, kind: output, shape index: {2}]  }
   0x1   :  { %3729 = sst [smem:[#allocation3_spill]] %s3698_s0 }
   0x2   :  { %3730 = sst [smem:[#allocation4_spill]] %s3699_s1 }
   0x3   :  { %3731 = sst [smem:[#allocation5_spill]] %s3700_s2 }
   0x4 LB: > { %s2557_s28 = sadd.s32 4294967295, %s2988_s27   ;;  %p2561_p0 = scmp.ge.s32.totalorder %s2988_s27, 1  ;;  %s2988_s27 = sphi %s3101_s27, %s29_s27  }
   0x5   : > { %p517_p1 = scmp.lt.s32.totalorder %s2988_s27, 3 }
   0x7   : > { %p518_p2 = pnand %p2561_p0, %p517_p1 }
   0x8   : > { %p581_p3 = scmp.lt.s32.totalorder (!%p518_p2), %s2557_s28, 1  ;;  %s3732_s19 = sld [smem:[#allocation3_spill]] (!%p518_p2)  ;;  %vm617_vm0 = vcmask (!%p518_p2), 240640   ;;  %v2990_v2 = vmov (!%p518_p2), 0.0   ;;  %vm2999_vm1 = vmmov (!%p518_p2), 0   ;;  %v3000_v5 = vmov (!%p518_p2), 0  }
   0x9   : > { %521 = sbr.rel (%p518_p2) target bundleno = 2800 (0xaf0), region = 84  ;;  %2773 = vmatprep.subr.bf16.mxu1 (!%p518_p2), %v2990_v2  ;;  %s3725_s20 = smov (!%p518_p2), 127   ;;  %2783 = vmatprep.mubr.msk.bf16.mxu1 (!%p518_p2), %vm2999_vm1, %v2990_v2  ;;  %vm625_vm2 = vcmask (!%p518_p2), 1039360   ;;  %vm633_vm3 = vcmask (!%p518_p2), 244740   ;;  %vm641_vm4 = vcmask (!%p518_p2), 1031168   ;;  %vm656_vm5 = vcmask (!%p518_p2), 900096  }
   0xa   : > { %s2992_s21 = smov (!%p518_p2), 126   ;;  %s3723_s22 = smov (!%p518_p2), 110   ;;  %802 = vmatprep.mubr.bf16.mxu0 (!%p518_p2), %v3000_v5  ;;  %2861 = vset.pattern.permute.xlu0 (!%p518_p2), %v3000_v5  ;;  %vm671_vm6 = vcmask (!%p518_p2), 891904   ;;  %vm686_vm7 = vcmask (!%p518_p2), 883712   ;;  %vm701_vm8 = vcmask (!%p518_p2), 752640   ;;  %vm716_vm9 = vcmask (!%p518_p2), 744448  }
   0xb   : > { %s2994_s2 = smov (!%p518_p2), 109   ;;  %s3721_s23 = smov (!%p518_p2), 108   ;;  %2862 = vset.pattern.permute.xlu1 (!%p518_p2), %v3000_v5  ;;  %vm731_vm10 = vcmask (!%p518_p2), 736256   ;;  %vm760_vm11 = vcmask (!%p518_p2), 1043456   ;;  %vm756_vm12 = vcmask (!%p518_p2), 588800   ;;  %vm874_vm13 = vcmask (!%p518_p2), 244736  }
   0xc   : > { %s3727_s24 = smov (!%p518_p2), 92   ;;  %s3719_s25 = smov (!%p518_p2), 91   ;;  %vm1279_vm14 = vcmask (!%p518_p2), 1046528   ;;  %vm2057_vm15 = vcmask (!%p518_p2), 637952  }
   0xd   : > { %s3717_s26 = smov (!%p518_p2), 90   ;;  %s3740_s30 = sld [smem:[#allocation5_spill]] (!%p518_p2) }
   0xe   : > { %s3001_s0 = smov (!%p518_p2), 117  }
  0x10   : > { %s3742_s28 = smov (!%p581_p3, %s2557_s28), 1 }
  0x11   : > { %s2836_s29 = smul.u32 12, %s3742_s28 }
  0x13   : > { %s585_s1 = scalar_lea.vmem %s3732_s19, %s2836_s29  ;;  %s3733_s19 = sld [smem:[#allocation4_spill]] }
  0x14   : > { %v602_v0 = vld [vmem:[%s585_s1] sm:$0xff]  ;;  %v2865_v1 = vld [vmem:[%s585_s1 + $0x8] ss:$0 sps:$4 sm:$0xff]   ;;  %s3735_s1 = smov 127  }
  0x15   : > { %v2569_v3 = vcombine.high %v602_v0, %v602_v0  ;;  %v2568_v4 = vcombine.low %v602_v0, %v602_v0  ;;  %618 = vst.msk [vmem:[#allocation2 + $0x10] sm:$0xf] %vm617_vm0, %v2865_v1  ;;  %v855_v0 = vlaneseq }
  0x17   : > { %621 = vrot.lane.b32.xlu0 %v2569_v3, %s3725_s20  ;;  %616 = vst [vmem:[#allocation2 + $0x8] sm:$0xf] %v2569_v3  ;;  %619 = vrot.lane.b32.xlu1 %v2568_v4, %s3725_s20  ;;  %615 = vst [vmem:[#allocation2] sm:$0xf] %v2568_v4 }
  0x19   : > { %v755_v63 = vld [vmem:[%s3733_s19] sm:$0xf]  ;;  %s3002_s19 = smov 118  }
  0x1b   : > { %623 = vrot.lane.b32.xlu0 %v2865_v1, %s3725_s20  ;;  %637 = vrot.lane.b32.xlu1 %v2569_v3, %s2992_s21  ;;  %s3738_s20 = smov 91  }
  0x1f   : > { %639 = vrot.lane.b32.xlu0 %v2865_v1, %s2992_s21  ;;  %652 = vrot.lane.b32.xlu1 %v2569_v3, %s3723_s22 }
  0x23   : > { %654 = vrot.lane.b32.xlu0 %v2865_v1, %s3723_s22  ;;  %635 = vrot.lane.b32.xlu1 %v2568_v4, %s2992_s21 }
  0x27   : > { %650 = vrot.lane.b32.xlu0 %v2568_v4, %s3723_s22  ;;  %667 = vrot.lane.b32.xlu1 %v2569_v3, %s2994_s2  ;;  %s3736_s22 = smov 110  }
  0x2b   : > { %669 = vrot.lane.b32.xlu0 %v2865_v1, %s2994_s2  ;;  %682 = vrot.lane.b32.xlu1 %v2569_v3, %s3721_s23 }
  0x2f   : > { %684 = vrot.lane.b32.xlu0 %v2865_v1, %s3721_s23  ;;  %665 = vrot.lane.b32.xlu1 %v2568_v4, %s2994_s2 }
  0x33   : > { %680 = vrot.lane.b32.xlu0 %v2568_v4, %s3721_s23  ;;  %697 = vrot.lane.b32.xlu1 %v2569_v3, %s3727_s24  ;;  %s3737_s23 = smov 108  }
  0x37   : > { %699 = vrot.lane.b32.xlu0 %v2865_v1, %s3727_s24  ;;  %712 = vrot.lane.b32.xlu1 %v2569_v3, %s3719_s25 }
  0x3b   : > { %714 = vrot.lane.b32.xlu0 %v2865_v1, %s3719_s25  ;;  %695 = vrot.lane.b32.xlu1 %v2568_v4, %s3727_s24  ;;  %s3739_s24 = smov 90  }
  0x3f   : > { %710 = vrot.lane.b32.xlu0 %v2568_v4, %s3719_s25  ;;  %725 = vrot.lane.b32.xlu1 %v2568_v4, %s3717_s26  ;;  %v853_v4 = vld [vmem:[%s3708_s10] sm:$0x7]  ;;  %s590_s25 = scalar_lea.vmem %s3714_s16, %s2836_s29  ;;  %s3734_s29 = smov 92  }
  0x43   : > { %727 = vrot.lane.b32.xlu0 %v2569_v3, %s3717_s26  ;;  %729 = vrot.lane.b32.xlu1 %v2865_v1, %s3717_s26  ;;  %v3184_v1 = vshrl.u32 %v855_v0, 7  ;;  %v2901_v0 = vld [vmem:[%s3711_s13 + $0xf0] ss:$12 sps:$4 sm:$0xff]  }
  0x45   : > { %v865_v3 = vsub.s32 2, %v3184_v1 }
  0x89   : > { %v622_v6 = vpop.permute.xlu0 %621  ;;  %v620_v7 = vpop.permute.xlu1 %619 }
  0x8a   : > { %v626_v8 = vsel %vm625_vm2, %v620_v7, %v622_v6  ;;  %v861_v7 = vsub.s32 1, %v3184_v1 }
  0x8b   : > { %631 = vst [vmem:[#allocation2] sm:$0xf0] %v626_v8  ;;  %v866_v8 = vrot.slane %v853_v4, %v865_v3 }
  0x8d   : > { %v624_v9 = vpop.permute.xlu0 %623  ;;  %v638_v10 = vpop.permute.xlu1 %637 }
  0x8e   : > { %v627_v11 = vsel %vm625_vm2, %v622_v6, %v624_v9  ;;  %634 = vst.msk [vmem:[#allocation2 + $0x10] sm:$0xf0] %vm633_vm3, %v624_v9  ;;  %v857_v6 = vsub.s32 0, %v3184_v1 }
  0x8f   : > { %632 = vst [vmem:[#allocation2 + $0x8] sm:$0xf0] %v627_v11 }
  0x90   : > { %v858_v9 = vrot.slane %v853_v4, %v857_v6 }
  0x91   : > { %v640_v12 = vpop.permute.xlu0 %639  ;;  %v653_v13 = vpop.permute.xlu1 %652 }
  0x92   : > { %v643_v14 = vsel %vm641_vm4, %v638_v10, %v640_v12  ;;  %649 = vst.msk [vmem:[#allocation2 + $0x28] sm:$0xf] %vm617_vm0, %v640_v12  ;;  %v740_v21 = vld [vmem:[#allocation2] sm:$0xff] }
  0x93   : > { %648 = vst [vmem:[#allocation2 + $0x20] sm:$0xf] %v643_v14 }
  0x95   : > { %v655_v15 = vpop.permute.xlu0 %654  ;;  %v636_v16 = vpop.permute.xlu1 %635  ;;  %v742_v17 = vld [vmem:[#allocation2 + $0x10] sm:$0xff] }
  0x96   : > { %v658_v18 = vsel %vm656_vm5, %v653_v13, %v655_v15  ;;  %664 = vst.msk [vmem:[#allocation2 + $0x28] sm:$0xf0] %vm633_vm3, %v655_v15  ;;  %v642_v19 = vsel %vm641_vm4, %v636_v16, %v638_v10  ;;  %2774 = vmatpush3.bf16.msra.mxu1 %v742_v17  ;;  %v741_v20 = vld [vmem:[#allocation2 + $0x8] sm:$0xff]  ;;  %v862_v10 = vrot.slane %v853_v4, %v861_v7 }
  0x97   : > { %663 = vst [vmem:[#allocation2 + $0x20] sm:$0xf0] %v658_v18  ;;  %647 = vst [vmem:[#allocation2 + $0x18] sm:$0xf] %v642_v19  ;;  %770 = vmatprep.subr.bf16.mxu0 %v741_v20  ;;  %2775 = vmatprep.subr.bf16.mxu1 %v2990_v2  ;;  %v2908_v4 = vld [vmem:[%s3711_s13 + $0x10c] ss:$12 sps:$4 sm:$0xff]  }
  0x98   : > { %771 = vmatpush1.bf16.msra.mxu0 %v740_v21 }
  0x99   : > { %v651_v22 = vpop.permute.xlu0 %650  ;;  %v668_v23 = vpop.permute.xlu1 %667 }
  0x9a   : > { %v657_v24 = vsel %vm656_vm5, %v651_v22, %v653_v13 }
  0x9b   : > { %662 = vst [vmem:[#allocation2 + $0x18] sm:$0xf0] %v657_v24 }
  0x9d   : > { %v670_v25 = vpop.permute.xlu0 %669  ;;  %v683_v26 = vpop.permute.xlu1 %682  ;;  %v745_v27 = vld [vmem:[#allocation2 + $0x28] sm:$0xff] }
  0x9e   : > { %v673_v28 = vsel %vm671_vm6, %v668_v23, %v670_v25  ;;  %679 = vst.msk [vmem:[#allocation2 + $0x40] sm:$0xf] %vm617_vm0, %v670_v25  ;;  %2776 = vmatpush3.bf16.msra.mxu1 %v745_v27  ;;  %v744_v29 = vld [vmem:[#allocation2 + $0x20] sm:$0xff] }
  0x9f   : > { %678 = vst [vmem:[#allocation2 + $0x38] sm:$0xf] %v673_v28  ;;  %772 = vmatprep.subr.bf16.mxu0 %v744_v29  ;;  %2777 = vmatprep.subr.bf16.mxu1 %v2990_v2 }
  0xa1   : > { %v685_v30 = vpop.permute.xlu0 %684  ;;  %v666_v31 = vpop.permute.xlu1 %665 }
  0xa2   : > { %v688_v32 = vsel %vm686_vm7, %v683_v26, %v685_v30  ;;  %694 = vst.msk [vmem:[#allocation2 + $0x40] sm:$0xf0] %vm633_vm3, %v685_v30  ;;  %v672_v33 = vsel %vm671_vm6, %v666_v31, %v668_v23  ;;  %v743_v34 = vld [vmem:[#allocation2 + $0x18] sm:$0xff]  ;;  %v2866_v31 = vld [vmem:[%s3711_s13] ss:$12 sps:$4 sm:$0xff]  }
  0xa3   : > { %693 = vst [vmem:[#allocation2 + $0x38] sm:$0xf0] %v688_v32  ;;  %677 = vst [vmem:[#allocation2 + $0x30] sm:$0xf] %v672_v33  ;;  %773 = vmatpush1.bf16.msra.mxu0 %v743_v34  ;;  %v2868_v32 = vld [vmem:[%s3711_s13 + $0x4] ss:$12 sps:$4 sm:$0xff]  }
  0xa4   : > { %v2871_v33 = vld [vmem:[%s3711_s13 + $0x1c] ss:$12 sps:$4 sm:$0xff]   ;;  %v2869_v34 = vld [vmem:[%s3711_s13 + $0x18] ss:$12 sps:$4 sm:$0xff]  }
  0xa5   : > { %v681_v35 = vpop.permute.xlu0 %680  ;;  %v698_v36 = vpop.permute.xlu1 %697 }
  0xa6   : > { %v687_v37 = vsel %vm686_vm7, %v681_v35, %v683_v26  ;;  %v2874_v35 = vld [vmem:[%s3711_s13 + $0x34] ss:$12 sps:$4 sm:$0xff]  }
  0xa7   : > { %692 = vst [vmem:[#allocation2 + $0x30] sm:$0xf0] %v687_v37  ;;  %v2894_v37 = vld [vmem:[%s3711_s13 + $0x8] ss:$12 sps:$4 sm:$0xff]  }
  0xa9   : > { %v700_v38 = vpop.permute.xlu0 %699  ;;  %v713_v39 = vpop.permute.xlu1 %712  ;;  %v748_v40 = vld [vmem:[#allocation2 + $0x40] sm:$0xff] }
  0xaa   : > { %v703_v41 = vsel %vm701_vm8, %v698_v36, %v700_v38  ;;  %709 = vst.msk [vmem:[#allocation2 + $0x58] sm:$0xf] %vm617_vm0, %v700_v38  ;;  %2778 = vmatpush3.bf16.msra.mxu1 %v748_v40  ;;  %v747_v42 = vld [vmem:[#allocation2 + $0x38] sm:$0xff]  ;;  %v2895_v38 = vld [vmem:[%s3711_s13 + $0xe0] ss:$12 sps:$4 sm:$0xff]  }
  0xab   : > { %708 = vst [vmem:[#allocation2 + $0x50] sm:$0xf] %v703_v41  ;;  %774 = vmatprep.subr.bf16.mxu0 %v747_v42  ;;  %2779 = vmatprep.subr.bf16.mxu1 %v2990_v2  ;;  %v2877_v40 = vld [vmem:[%s3711_s13 + $0x4c] ss:$12 sps:$4 sm:$0xff]  }
  0xac   : > { %v2899_v41 = vld [vmem:[%s3711_s13 + $0x20] ss:$12 sps:$4 sm:$0xff]   ;;  %v2900_v42 = vld [vmem:[%s3711_s13 + $0xf8] ss:$12 sps:$4 sm:$0xff]  }
  0xad   : > { %v715_v43 = vpop.permute.xlu0 %714  ;;  %v696_v44 = vpop.permute.xlu1 %695 }
  0xae   : > { %v718_v45 = vsel %vm716_vm9, %v713_v39, %v715_v43  ;;  %724 = vst.msk [vmem:[#allocation2 + $0x58] sm:$0xf0] %vm633_vm3, %v715_v43  ;;  %v702_v46 = vsel %vm701_vm8, %v696_v44, %v698_v36  ;;  %v746_v47 = vld [vmem:[#allocation2 + $0x30] sm:$0xff] }
  0xaf   : > { %723 = vst [vmem:[#allocation2 + $0x50] sm:$0xf0] %v718_v45  ;;  %707 = vst [vmem:[#allocation2 + $0x48] sm:$0xf] %v702_v46  ;;  %775 = vmatpush1.bf16.msra.mxu0 %v746_v47  ;;  %v2890_v36 = vld [vmem:[%s3711_s13 + $0xc8] ss:$12 sps:$4 sm:$0xff]  }
  0xb0   : > { %v2875_v43 = vld [vmem:[%s3711_s13 + $0x48] ss:$12 sps:$4 sm:$0xff]   ;;  %v2880_v44 = vld [vmem:[%s3711_s13 + $0x64] ss:$12 sps:$4 sm:$0xff]   ;;  %v2878_v47 = vld [vmem:[%s3711_s13 + $0x60] ss:$12 sps:$4 sm:$0xff]  }
  0xb1   : > { %v711_v48 = vpop.permute.xlu0 %710  ;;  %v726_v49 = vpop.permute.xlu1 %725  ;;  %v2904_v45 = vld [vmem:[%s3711_s13 + $0x38] ss:$12 sps:$4 sm:$0xff]   ;;  %v2905_v46 = vld [vmem:[%s3711_s13 + $0x110] ss:$12 sps:$4 sm:$0xff]  }
  0xb2   : > { %v717_v50 = vsel %vm716_vm9, %v711_v48, %v713_v39  ;;  %v2872_v39 = vld [vmem:[%s3711_s13 + $0x30] ss:$12 sps:$4 sm:$0xff]  }
  0xb3   : > { %722 = vst [vmem:[#allocation2 + $0x48] sm:$0xf0] %v717_v50  ;;  %v2883_v48 = vld [vmem:[%s3711_s13 + $0x7c] ss:$12 sps:$4 sm:$0xff]  }
  0xb4   : > { %v2910_v50 = vld [vmem:[%s3711_s13 + $0x128] ss:$12 sps:$4 sm:$0xff]  }
  0xb5   : > { %v728_v51 = vpop.permute.xlu0 %727  ;;  %v730_v52 = vpop.permute.xlu1 %729  ;;  %v751_v53 = vld [vmem:[#allocation2 + $0x58] sm:$0xff] }
  0xb6   : > { %v732_v54 = vsel %vm731_vm10, %v726_v49, %v728_v51  ;;  %v733_v55 = vsel %vm731_vm10, %v728_v51, %v730_v52  ;;  %739 = vst.msk [vmem:[#allocation2 + $0x70] sm:$0xf] %vm617_vm0, %v730_v52  ;;  %2780 = vmatpush3.bf16.msra.mxu1 %v751_v53  ;;  %v750_v56 = vld [vmem:[#allocation2 + $0x50] sm:$0xff]  ;;  %v2881_v51 = vld [vmem:[%s3711_s13 + $0x78] ss:$12 sps:$4 sm:$0xff]  }
  0xb7   : > { %737 = vst [vmem:[#allocation2 + $0x60] sm:$0xf] %v732_v54  ;;  %738 = vst [vmem:[#allocation2 + $0x68] sm:$0xf] %v733_v55  ;;  %776 = vmatprep.subr.bf16.mxu0 %v750_v56  ;;  %2781 = vmatprep.subr.bf16.mxu1 %v2990_v2  ;;  %v2909_v49 = vld [vmem:[%s3711_s13 + $0x50] ss:$12 sps:$4 sm:$0xff]  }
  0xb8   : > { %v2886_v52 = vld [vmem:[%s3711_s13 + $0x94] ss:$12 sps:$4 sm:$0xff]   ;;  %v2884_v55 = vld [vmem:[%s3711_s13 + $0x90] ss:$12 sps:$4 sm:$0xff]   ;;  %v2889_v56 = vld [vmem:[%s3711_s13 + $0xac] ss:$12 sps:$4 sm:$0xff]  }
  0xb9   : > { %v2914_v53 = vld [vmem:[%s3711_s13 + $0x68] ss:$12 sps:$4 sm:$0xff]   ;;  %v2915_v54 = vld [vmem:[%s3711_s13 + $0x140] ss:$12 sps:$4 sm:$0xff]  }
  0xba   : > { %v749_v57 = vld [vmem:[#allocation2 + $0x48] sm:$0xff] }
  0xbb   : > { %777 = vmatpush1.bf16.msra.mxu0 %v749_v57  ;;  %v2919_v57 = vld [vmem:[%s3711_s13 + $0x80] ss:$12 sps:$4 sm:$0xff]  }
  0xbd   : > { %v754_v58 = vld [vmem:[#allocation2 + $0x70] sm:$0xf] }
  0xbe   : > { %v753_v59 = vld [vmem:[#allocation2 + $0x68] sm:$0xf]  ;;  %v768_v60 = vsel %vm760_vm11, %v754_v58, 0  ;;  %v752_v61 = vld [vmem:[#allocation2 + $0x60] sm:$0xf] }
  0xbf   : > { %2571 = vmatprep.subr.msk.bf16.mxu0 %vm760_vm11, %v753_v59  ;;  %2782 = vmatpush3.bf16.msra.mxu1 %v768_v60  ;;  %v762_v62 = vsel %vm760_vm11, %v752_v61, 0  ;;  %v2887_v58 = vld [vmem:[%s3711_s13 + $0xa8] ss:$12 sps:$4 sm:$0xff]   ;;  %v2893_v59 = vld [vmem:[%s3711_s13 + $0xc4] ss:$12 sps:$4 sm:$0xff]  }
  0xc0   : > { %779 = vmatpush1.bf16.msra.mxu0 %v762_v62  ;;  %2710 = vmatprep.subr.bf16.mxu1 %v2890_v36  ;;  %v2891_v60 = vld [vmem:[%s3711_s13 + $0xc0] ss:$12 sps:$4 sm:$0xff]   ;;  %v2898_v61 = vld [vmem:[%s3711_s13 + $0xdc] ss:$12 sps:$4 sm:$0xff]   ;;  %v2896_v62 = vld [vmem:[%s3711_s13 + $0xd8] ss:$12 sps:$4 sm:$0xff]  }
  0xc1   : > { %1289 = vmatprep.subr.bf16.mxu0 %v2868_v32  ;;  %v2924_v32 = vld [vmem:[%s3711_s13 + $0x98] ss:$12 sps:$4 sm:$0xff]   ;;  %v2926_v36 = vld [vmem:[%s3711_s13 + $0x168] ss:$12 sps:$4 sm:$0xff]  }
  0xc2   : > { %2784 = vmatmul.mubr.msk.bf16.vlgmr.msra.gmra.mrb[0].mxu1 %vm756_vm12, %v755_v63 }
  0xc3   : > { %2572 = vmatmul.mubr.msk.bf16.vlgmr.msra.gmra.mrb[0].mxu0 %vm756_vm12, %v755_v63  ;;  %2711 = vmatpush3.bf16.msra.mxu1 %v2894_v37  ;;  %v2903_v63 = vld [vmem:[%s3711_s13 + $0xf4] ss:$12 sps:$4 sm:$0xff]   ;;  %v2929_v37 = vld [vmem:[%s3711_s13 + $0xb0] ss:$12 sps:$4 sm:$0xff]  }
  0xc4   : > { %1290 = vmatpush1.bf16.msra.mxu0 %v2866_v31  ;;  %2712 = vmatprep.subr.bf16.mxu1 %v2895_v38  ;;  %v2923_v31 = vld [vmem:[%s3711_s13 + $0x154] ss:$12 sps:$4 sm:$0xff]   ;;  %v2933_v38 = vld [vmem:[%s3711_s13 + $0x184] ss:$12 sps:$4 sm:$0xff]  }
  0xc5   : > { %1291 = vmatprep.subr.bf16.mxu0 %v2871_v33 }
  0xc7   : > { %2713 = vmatpush3.bf16.msra.mxu1 %v2899_v41 }
  0xc8   : > { %1292 = vmatpush1.bf16.msra.mxu0 %v2869_v34  ;;  %2714 = vmatprep.subr.bf16.mxu1 %v2900_v42  ;;  %v2925_v34 = vld [vmem:[%s3711_s13 + $0x170] ss:$12 sps:$4 sm:$0xff]  }
  0xc9   : > { %1293 = vmatprep.subr.bf16.mxu0 %v2874_v35  ;;  %v2928_v35 = vld [vmem:[%s3711_s13 + $0x16c] ss:$12 sps:$4 sm:$0xff]  }
  0xcb   : > { %2715 = vmatpush3.bf16.msra.mxu1 %v2904_v45 }
  0xcc   : > { %1294 = vmatpush1.bf16.msra.mxu0 %v2872_v39  ;;  %2716 = vmatprep.subr.bf16.mxu1 %v2905_v46 }
  0xcd   : > { %1295 = vmatprep.subr.bf16.mxu0 %v2877_v40 }
  0xcf   : > { %2717 = vmatpush3.bf16.msra.mxu1 %v2909_v49 }
  0xd0   : > { %1296 = vmatpush1.bf16.msra.mxu0 %v2875_v43  ;;  %2718 = vmatprep.subr.bf16.mxu1 %v2910_v50  ;;  %v2930_v50 = vld [vmem:[%s3711_s13 + $0x188] ss:$12 sps:$4 sm:$0xff]  }
  0xd1   : > { %1297 = vmatprep.subr.bf16.mxu0 %v2880_v44 }
  0xd3   : > { %2719 = vmatpush3.bf16.msra.mxu1 %v2914_v53 }
  0xd4   : > { %1298 = vmatpush1.bf16.msra.mxu0 %v2878_v47  ;;  %2720 = vmatprep.subr.bf16.mxu1 %v2915_v54 }
  0xd5   : > { %1299 = vmatprep.subr.bf16.mxu0 %v2883_v48 }
  0xd7   : > { %2721 = vmatpush3.bf16.msra.mxu1 %v2919_v57 }
  0xd8   : > { %1300 = vmatpush1.bf16.msra.mxu0 %v2881_v51  ;;  %v2931_v51 = vld [vmem:[%s3711_s13 + $0x180] ss:$12 sps:$4 sm:$0xff]  }
  0xd9   : > { %1301 = vmatprep.subr.bf16.mxu0 %v2886_v52  ;;  %v2937_v52 = vld [vmem:[%s3711_s13 + $0x198] ss:$12 sps:$4 sm:$0x7f]  }
  0xdc   : > { %1302 = vmatpush1.bf16.msra.mxu0 %v2884_v55  ;;  %v1281_v55 = vsel %vm1279_vm14, %v2937_v52, 0 }
  0xdd   : > { %1303 = vmatprep.subr.bf16.mxu0 %v2889_v56 }
  0xe0   : > { %1304 = vmatpush1.bf16.msra.mxu0 %v2887_v58 }
  0xe1   : > { %1305 = vmatprep.subr.bf16.mxu0 %v2893_v59 }
  0xe4   : > { %1306 = vmatpush1.bf16.msra.mxu0 %v2891_v60 }
  0xe5   : > { %1307 = vmatprep.subr.bf16.mxu0 %v2898_v61 }
  0xe8   : > { %1308 = vmatpush1.bf16.msra.mxu0 %v2896_v62 }
  0xe9   : > { %1309 = vmatprep.subr.bf16.mxu0 %v2903_v63 }
  0xec   : > { %1310 = vmatpush1.bf16.msra.mxu0 %v2901_v0 }
  0xed   : > { %1311 = vmatprep.subr.bf16.mxu0 %v2908_v4 }
 0x195   : > { %v3198_v11 = vpop.f32.mrb[0].mxu1 }
 0x196   : > { %v872_v12 = vmul.f32 %v866_v8, %v3198_v11  ;;  %v3201_v13 = vpop.f32.mrb[0].mxu0  ;;  %v2785_v14 = vpop.f32.mrb[1].mxu1  ;;  %v2906_v8 = vld [vmem:[%s3711_s13 + $0x108] ss:$12 sps:$4 sm:$0xff]  }
 0x197   : > { %v870_v15 = vmul.f32 %v858_v9, %v3201_v13  ;;  %v3204_v16 = vpop.f32.mrb[1].mxu0  ;;  %v848_v17 = vpop.f32.mrb[2].mxu1  ;;  %v2913_v9 = vld [vmem:[%s3711_s13 + $0x124] ss:$12 sps:$4 sm:$0xff]   ;;  %1312 = vmatpush1.bf16.msra.mxu0 %v2906_v8 }
 0x198   : > { %v871_v18 = vmul.f32 %v862_v10, %v3204_v16  ;;  %v808_v19 = vpop.f32.mrb[2].mxu0  ;;  %v2786_v20 = vpop.f32.mrb[3].mxu1  ;;  %v882_v21 = vmul.f32 %v872_v12, %v3198_v11  ;;  %v875_v24 = vsel %vm874_vm13, %v872_v12, 0.0  ;;  %v2911_v10 = vld [vmem:[%s3711_s13 + $0x120] ss:$12 sps:$4 sm:$0xff]   ;;  %1313 = vmatprep.subr.bf16.mxu0 %v2913_v9 }
 0x199   : > { %v880_v22 = vmul.f32 %v870_v15, %v3201_v13  ;;  %v809_v23 = vpop.f32.mrb[3].mxu0  ;;  %v2918_v12 = vld [vmem:[%s3711_s13 + $0x13c] ss:$12 sps:$4 sm:$0xff]   ;;  %v2916_v14 = vld [vmem:[%s3711_s13 + $0x138] ss:$12 sps:$4 sm:$0xff]  }
 0x19a   : > { %v881_v25 = vmul.f32 %v871_v18, %v3204_v16  ;;  %v873_v26 = vadd.f32 %v871_v18, %v870_v15  ;;  %v884_v29 = vsel %vm874_vm13, %v882_v21, 0.0 }
 0x19b   : > { %1314 = vmatpush1.bf16.msra.mxu0 %v2911_v10 }
 0x19c   : > { %v876_v27 = vadd.f32 %v875_v24, %v873_v26  ;;  %v883_v28 = vadd.f32 %v881_v25, %v880_v22  ;;  %1315 = vmatprep.subr.bf16.mxu0 %v2918_v12  ;;  %v851_v24 = vld [vmem:[%s3702_s4] sm:$0xff] }
 0x19e   : > { %877 = vadd.xlane.f32.xlu0 %v876_v27  ;;  %v885_v30 = vadd.f32 %v884_v29, %v883_v28  ;;  %v852_v27 = vld [vmem:[%s3703_s5] sm:$0xff] }
 0x19f   : > { %1316 = vmatpush1.bf16.msra.mxu0 %v2916_v14  ;;  %v2920_v29 = vld [vmem:[%s3711_s13 + $0x158] ss:$12 sps:$4 sm:$0xff]  }
 0x1a0   : > { %886 = vadd.xlane.f32.xlu1 %v885_v30  ;;  %v2921_v30 = vld [vmem:[%s3711_s13 + $0x150] ss:$12 sps:$4 sm:$0xff]   ;;  %2722 = vmatprep.subr.bf16.mxu1 %v2920_v29 }
 0x1a1   : > { %1317 = vmatprep.subr.bf16.mxu0 %v2923_v31  ;;  %2723 = vmatpush3.bf16.msra.mxu1 %v2924_v32 }
 0x1a2   : > { %2724 = vmatprep.subr.bf16.mxu1 %v2925_v34 }
 0x1a3   : > { %1318 = vmatpush1.bf16.msra.mxu0 %v2921_v30 }
 0x1a4   : > { %1319 = vmatprep.subr.bf16.mxu0 %v2928_v35 }
 0x1a5   : > { %2725 = vmatpush3.bf16.msra.mxu1 %v2929_v37 }
 0x1a6   : > { %2787 = vmatprep.subr.bf16.mxu1 %v2990_v2 }
 0x1a7   : > { %1320 = vmatpush1.bf16.msra.mxu0 %v2926_v36 }
 0x1a8   : > { %1330 = vmatprep.subr.bf16.mxu0 %v2933_v38 }
 0x22b   : > { %v878_v15 = vpop.xlane.xlu0 %877 }
 0x22c   : > { %v879_v17 = vmul.f32 0.00390625, %v878_v15 }
 0x22d   : > { %v887_v18 = vpop.xlane.xlu1 %886 }
 0x22e   : > { %v889_v19 = vmul.f32 %v879_v17, %v879_v17  ;;  %v888_v20 = vmul.f32 0.00390625, %v887_v18 }
 0x230   : > { %v890_v21 = vsub.f32 %v888_v20, %v889_v19 }
 0x232   : > { %v891_v22 = vmax.f32 %v890_v21, 0.0 }
 0x234   : > { %v892_v23 = vadd.f32 1e-05, %v891_v22 }
 0x236   : > { %2968 = vrsqrt.f32 %v892_v23 }
 0x240   : > { %v2969_v25 = vpop.eup %2968 }
 0x241   : > { %v894_v26 = vmul.f32 %v2969_v25, %v851_v24 }
 0x243   : > { %897 = vperm.xlu0 %2861, %v894_v26   ;;  %v903_v28 = vmul.f32 %v894_v26, %v879_v17 }
 0x245   : > { %v904_v33 = vsub.f32 %v852_v27, %v903_v28 }
 0x247   : > { %907 = vperm.xlu1 %2862, %v904_v33  }
 0x2c2   : > { %v898_v39 = vpop.permute.xlu0 %897 }
 0x2c3   : > { %v900_v40 = vmul.f32 %v898_v39, %v3201_v13  ;;  %v901_v41 = vmul.f32 %v898_v39, %v3204_v16  ;;  %v902_v47 = vmul.f32 %v898_v39, %v3198_v11  ;;  %v2934_v16 = vld [vmem:[%s3711_s13 + $0x1a0] ss:$12 sps:$4 sm:$0x7f]   ;;  %v2935_v11 = vld [vmem:[%s3711_s13 + $0x19c] ss:$12 sps:$4 sm:$0x7f]  }
 0x2c4   : > { %v1287_v54 = vsel %vm1279_vm14, %v2934_v16, 0 }
 0x2c6   : > { %v908_v42 = vpop.permute.xlu1 %907 }
 0x2c7   : > { %v910_v43 = vadd.f32 %v908_v42, %v900_v40  ;;  %v911_v44 = vadd.f32 %v908_v42, %v901_v41  ;;  %v912_v13 = vadd.f32 %v908_v42, %v902_v47 }
 0x2c9   : > { %v913_v45 = vmax.f32 %v910_v43, 0.0  ;;  %v914_v46 = vmax.f32 %v911_v44, 0.0  ;;  %v915_v53 = vmax.f32 %v912_v13, 0.0 }
 0x2cb   : > { %v916_v48 = vpack.c.bf16 %v913_v45, %v913_v45  ;;  %v917_v49 = vpack.c.bf16 %v914_v46, %v914_v46  ;;  %v918_v56 = vpack.c.bf16 %v915_v53, %v915_v53 }
 0x2cd   : > { %1321 = vmatprep.mubr.bf16.mxu0 %v917_v49  ;;  %1403 = vmatprep.mubr.bf16.mxu1 %v917_v49 }
 0x2ce   : > { %1322 = vmatmul.mubr.bf16.vlgmr.msra.gmra.mrb[4].mxu0 %v916_v48  ;;  %1404 = vmatmul.mubr.bf16.vlgmr.msra.gmra.mrb[4].mxu1 %v916_v48 }
 0x2cf   : > { %2788 = vmatpush3.bf16.msra.mxu1 %v2930_v50  ;;  %1331 = vmatpush1.bf16.msra.mxu0 %v2931_v51 }
 0x2d0   : > { %2789 = vmatprep.subr.bf16.mxu1 %v2990_v2  ;;  %2791 = vmatprep.mubr.msk.bf16.mxu1 %vm2999_vm1, %v2990_v2 }
 0x2d1   : > { %2628 = vmatprep.subr.msk.bf16.mxu0 %vm1279_vm14, %v2935_v11  ;;  %1362 = vmatprep.mubr.bf16.mxu0 %v3000_v5 }
 0x2d3   : > { %2790 = vmatpush3.bf16.msra.mxu1 %v1287_v54  ;;  %1333 = vmatpush1.bf16.msra.mxu0 %v1281_v55 }
 0x2d6   : > { %2792 = vmatmul.mubr.msk.bf16.vlgmr.msra.gmra.mrb[8].mxu1 %vm874_vm13, %v918_v56 }
 0x2d7   : > { %1650 = vmatprep.mubr.bf16.mxu1 %v3000_v5 }
 0x2da   : > { %2629 = vmatmul.mubr.msk.bf16.vlgmr.msra.gmra.mrb[4].mxu0 %vm874_vm13, %v918_v56 }
 0x3a1   : > { %v2726_v57 = vpop.f32.mrb[4].mxu1 }
 0x3a2   : > { %v2727_v58 = vpop.f32.mrb[5].mxu1 }
 0x3a3   : > { %v2728_v59 = vadd.f32 %v2727_v58, %v2726_v57  ;;  %v2729_v60 = vpop.f32.mrb[6].mxu1 }
 0x3a4   : > { %v2730_v61 = vpop.f32.mrb[7].mxu1 }
 0x3a9   : > { %v1445_v62 = vpop.f32.mrb[8].mxu1 }
 0x3aa   : > { %v1446_v63 = vadd.f32 %v2728_v59, %v1445_v62  ;;  %v2793_v0 = vpop.f32.mrb[9].mxu1 }
 0x3ab   : > { %v1448_v4 = vpop.f32.mrb[10].mxu1 }
 0x3ac   : > { %v1453_v8 = vpack.c.bf16 %v1446_v63, %v1446_v63  ;;  %v2794_v9 = vpop.f32.mrb[11].mxu1 }
 0x3ad   : > { %v1364_v10 = vpop.f32.mrb[4].mxu0 }
 0x3ae   : > { %1468 = vst.msk [vmem:[#allocation2 + $0x10] sm:$0xf] %vm617_vm0, %v1453_v8  ;;  %v1451_v12 = vpack.c.bf16 %v1364_v10, %v1364_v10  ;;  %1518 = vrot.lane.b32.xlu0 %v1453_v8, %s2994_s2  ;;  %1490 = vrot.lane.b32.xlu1 %v1453_v8, %s2992_s21  ;;  %v1366_v14 = vpop.f32.mrb[5].mxu0  ;;  %1465 = vst [vmem:[%s590_s25 + $0x8] sm:$0xf] %v1453_v8  ;;  %v1471_v20 = vrot.slane %v1453_v8, 4 }
 0x3af   : > { %v1452_v15 = vpack.c.bf16 %v1366_v14, %v1366_v14  ;;  %v2680_v17 = vpack.c.bf16 %v1366_v14, %v1364_v10  ;;  %v1368_v18 = vpop.f32.mrb[6].mxu0 }
 0x3b0   : > { %1466 = vst [vmem:[#allocation2] sm:$0xf] %v1451_v12  ;;  %v1369_v19 = vpop.f32.mrb[7].mxu0  ;;  %v1469_v21 = vrot.slane %v1451_v12, 4 }
 0x3b1   : > { %1464 = vst [vmem:[%s590_s25] sm:$0xff] %v2680_v17  ;;  %1467 = vst [vmem:[#allocation2 + $0x8] sm:$0xf] %v1452_v15  ;;  %v1470_v22 = vrot.slane %v1452_v15, 4  ;;  %s3003_s25 = smov 116  }
 0x3b2   : > { %1546 = vrot.lane.b32.xlu0 %v1453_v8, %s3734_s29  ;;  %1476 = vrot.lane.b32.xlu1 %v1471_v20, %s3735_s1 }
 0x3b6   : > { %1504 = vrot.lane.b32.xlu0 %v1471_v20, %s3736_s22  ;;  %1486 = vrot.lane.b32.xlu1 %v1451_v12, %s2992_s21 }
 0x3ba   : > { %1532 = vrot.lane.b32.xlu0 %v1471_v20, %s3737_s23  ;;  %1514 = vrot.lane.b32.xlu1 %v1451_v12, %s2994_s2 }
 0x3be   : > { %1560 = vrot.lane.b32.xlu0 %v1471_v20, %s3738_s20  ;;  %1542 = vrot.lane.b32.xlu1 %v1451_v12, %s3734_s29 }
 0x3c2   : > { %1570 = vrot.lane.b32.xlu1 %v1451_v12, %s3739_s24  ;;  %1500 = vrot.lane.b32.xlu0 %v1469_v21, %s3736_s22 }
 0x3c6   : > { %1528 = vrot.lane.b32.xlu0 %v1469_v21, %s3737_s23  ;;  %1488 = vrot.lane.b32.xlu1 %v1452_v15, %s2992_s21 }
 0x3ca   : > { %1556 = vrot.lane.b32.xlu0 %v1469_v21, %s3738_s20  ;;  %1516 = vrot.lane.b32.xlu1 %v1452_v15, %s2994_s2 }
 0x3ce   : > { %1572 = vrot.lane.b32.xlu0 %v1452_v15, %s3739_s24  ;;  %1544 = vrot.lane.b32.xlu1 %v1452_v15, %s3734_s29  ;;  %v2938_v15 = vld [vmem:[%s3740_s30] sm:$0xff]   ;;  %s3004_s29 = smov 106  }
 0x3d2   : > { %1472 = vrot.lane.b32.xlu1 %v1469_v21, %s3735_s1 }
 0x3d6   : > { %1474 = vrot.lane.b32.xlu1 %v1470_v22, %s3735_s1 }
 0x3da   : > { %1502 = vrot.lane.b32.xlu1 %v1470_v22, %s3736_s22  ;;  %s3005_s22 = smov 107  }
 0x3de   : > { %1530 = vrot.lane.b32.xlu1 %v1470_v22, %s3737_s23 }
 0x3e2   : > { %1558 = vrot.lane.b32.xlu1 %v1470_v22, %s3738_s20 }
 0x3e6   : > { %1574 = vrot.lane.b32.xlu1 %v1453_v8, %s3739_s24  ;;  %s2678_s24 = sshll.u32 %s3742_s28, 3 }
 0x3e7   : > { %s595_s30 = scalar_lea.vmem %s3715_s17, %s2678_s24 }
 0x420   : > { %v1519_v23 = vpop.permute.xlu0 %1518  ;;  %v1491_v24 = vpop.permute.xlu1 %1490 }
 0x421   : > { %1527 = vst.msk [vmem:[#allocation2 + $0x40] sm:$0xf] %vm617_vm0, %v1519_v23  ;;  %1499 = vst.msk [vmem:[#allocation2 + $0x28] sm:$0xf] %vm617_vm0, %v1491_v24 }
 0x424   : > { %v1547_v25 = vpop.permute.xlu0 %1546  ;;  %v1477_v26 = vpop.permute.xlu1 %1476 }
 0x425   : > { %1555 = vst.msk [vmem:[#allocation2 + $0x58] sm:$0xf] %vm617_vm0, %v1547_v25 }
 0x426   : > { %1485 = vst.msk [vmem:[#allocation2 + $0x10] sm:$0xf0] %vm633_vm3, %v1477_v26 }
 0x428   : > { %v1505_v27 = vpop.permute.xlu0 %1504  ;;  %v1487_v28 = vpop.permute.xlu1 %1486 }
 0x429   : > { %1513 = vst.msk [vmem:[#allocation2 + $0x28] sm:$0xf0] %vm633_vm3, %v1505_v27 }
 0x42c   : > { %v1533_v29 = vpop.permute.xlu0 %1532  ;;  %v1515_v30 = vpop.permute.xlu1 %1514 }
 0x42d   : > { %1541 = vst.msk [vmem:[#allocation2 + $0x40] sm:$0xf0] %vm633_vm3, %v1533_v29  ;;  %v1586_v17 = vld [vmem:[#allocation2 + $0x10] sm:$0xff] }
 0x430   : > { %v1561_v31 = vpop.permute.xlu0 %1560  ;;  %v1543_v32 = vpop.permute.xlu1 %1542  ;;  %v1589_v18 = vld [vmem:[#allocation2 + $0x28] sm:$0xff] }
 0x431   : > { %1569 = vst.msk [vmem:[#allocation2 + $0x58] sm:$0xf0] %vm633_vm3, %v1561_v31 }
 0x434   : > { %v1571_v33 = vpop.permute.xlu1 %1570  ;;  %v1501_v34 = vpop.permute.xlu0 %1500  ;;  %v1592_v19 = vld [vmem:[#allocation2 + $0x40] sm:$0xff] }
 0x438   : > { %v1529_v35 = vpop.permute.xlu0 %1528  ;;  %v1489_v36 = vpop.permute.xlu1 %1488  ;;  %v1595_v20 = vld [vmem:[#allocation2 + $0x58] sm:$0xff] }
 0x439   : > { %v1492_v37 = vsel %vm641_vm4, %v1487_v28, %v1489_v36  ;;  %v1493_v38 = vsel %vm641_vm4, %v1489_v36, %v1491_v24 }
 0x43a   : > { %1497 = vst [vmem:[#allocation2 + $0x18] sm:$0xf] %v1492_v37  ;;  %1498 = vst [vmem:[#allocation2 + $0x20] sm:$0xf] %v1493_v38 }
 0x43c   : > { %v1557_v39 = vpop.permute.xlu0 %1556  ;;  %v1517_v40 = vpop.permute.xlu1 %1516 }
 0x43d   : > { %v1520_v41 = vsel %vm671_vm6, %v1515_v30, %v1517_v40  ;;  %v1521_v42 = vsel %vm671_vm6, %v1517_v40, %v1519_v23  ;;  %v1706_v23 = vld [vmem:[%s3709_s11] sm:$0x7] }
 0x43e   : > { %1525 = vst [vmem:[#allocation2 + $0x30] sm:$0xf] %v1520_v41  ;;  %1526 = vst [vmem:[#allocation2 + $0x38] sm:$0xf] %v1521_v42  ;;  %v1711_v24 = vrot.slane %v1706_v23, %v857_v6  ;;  %v1719_v40 = vrot.slane %v1706_v23, %v865_v3 }
 0x440   : > { %v1573_v43 = vpop.permute.xlu0 %1572  ;;  %v1545_v44 = vpop.permute.xlu1 %1544 }
 0x441   : > { %v1576_v45 = vsel %vm731_vm10, %v1571_v33, %v1573_v43  ;;  %v1548_v46 = vsel %vm701_vm8, %v1543_v32, %v1545_v44  ;;  %v1549_v47 = vsel %vm701_vm8, %v1545_v44, %v1547_v25  ;;  %v1715_v25 = vrot.slane %v1706_v23, %v861_v7 }
 0x442   : > { %1581 = vst [vmem:[#allocation2 + $0x60] sm:$0xf] %v1576_v45  ;;  %1553 = vst [vmem:[#allocation2 + $0x48] sm:$0xf] %v1548_v46 }
 0x443   : > { %1554 = vst [vmem:[#allocation2 + $0x50] sm:$0xf] %v1549_v47 }
 0x444   : > { %v1473_v48 = vpop.permute.xlu1 %1472 }
 0x448   : > { %v1475_v49 = vpop.permute.xlu1 %1474 }
 0x449   : > { %v1478_v50 = vsel %vm625_vm2, %v1473_v48, %v1475_v49  ;;  %v1479_v51 = vsel %vm625_vm2, %v1475_v49, %v1477_v26  ;;  %v1596_v10 = vld [vmem:[#allocation2 + $0x60] sm:$0xf] }
 0x44a   : > { %1483 = vst [vmem:[#allocation2] sm:$0xf0] %v1478_v50  ;;  %1484 = vst [vmem:[#allocation2 + $0x8] sm:$0xf0] %v1479_v51  ;;  %v1610_v14 = vsel %vm760_vm11, %v1596_v10, 0 }
 0x44c   : > { %v1503_v13 = vpop.permute.xlu1 %1502 }
 0x44d   : > { %v1506_v16 = vsel %vm656_vm5, %v1501_v34, %v1503_v13  ;;  %v1507_v52 = vsel %vm656_vm5, %v1503_v13, %v1505_v27 }
 0x44e   : > { %1511 = vst [vmem:[#allocation2 + $0x18] sm:$0xf0] %v1506_v16  ;;  %1512 = vst [vmem:[#allocation2 + $0x20] sm:$0xf0] %v1507_v52 }
 0x450   : > { %v1531_v11 = vpop.permute.xlu1 %1530 }
 0x451   : > { %v1534_v53 = vsel %vm686_vm7, %v1529_v35, %v1531_v11  ;;  %v1535_v54 = vsel %vm686_vm7, %v1531_v11, %v1533_v29  ;;  %v1585_v55 = vld [vmem:[#allocation2 + $0x8] sm:$0xff]  ;;  %v1584_v56 = vld [vmem:[#allocation2] sm:$0xff] }
 0x452   : > { %1539 = vst [vmem:[#allocation2 + $0x30] sm:$0xf0] %v1534_v53  ;;  %1540 = vst [vmem:[#allocation2 + $0x38] sm:$0xf0] %v1535_v54  ;;  %1618 = vmatprep.subr.bf16.mxu1 %v1585_v55  ;;  %v2939_v11 = vld [vmem:[%s3712_s14 + $0x40] sm:$0xff]   ;;  %v2941_v54 = vld [vmem:[%s3712_s14 + $0x48] sm:$0xff]  }
 0x453   : > { %1619 = vmatpush1.bf16.msra.mxu1 %v1584_v56  ;;  %v2940_v53 = vld [vmem:[%s3712_s14] sm:$0xff]   ;;  %2741 = vmatprep.subr.bf16.mxu0 %v2939_v11  ;;  %v2942_v55 = vld [vmem:[%s3712_s14 + $0x8] sm:$0xff]   ;;  %v2943_v56 = vld [vmem:[%s3712_s14 + $0x50] sm:$0xff]  }
 0x454   : > { %v1559_v57 = vpop.permute.xlu1 %1558  ;;  %2742 = vmatpush3.bf16.msra.mxu0 %v2940_v53 }
 0x455   : > { %v1562_v58 = vsel %vm716_vm9, %v1557_v39, %v1559_v57  ;;  %v1563_v59 = vsel %vm716_vm9, %v1559_v57, %v1561_v31  ;;  %v1588_v60 = vld [vmem:[#allocation2 + $0x20] sm:$0xff]  ;;  %v1587_v61 = vld [vmem:[#allocation2 + $0x18] sm:$0xff]  ;;  %2743 = vmatprep.subr.bf16.mxu0 %v2941_v54  ;;  %v2944_v57 = vld [vmem:[%s3712_s14 + $0x10] sm:$0xff]  }
 0x456   : > { %1567 = vst [vmem:[#allocation2 + $0x48] sm:$0xf0] %v1562_v58  ;;  %1568 = vst [vmem:[#allocation2 + $0x50] sm:$0xf0] %v1563_v59  ;;  %1620 = vmatprep.subr.bf16.mxu1 %v1588_v60  ;;  %v2945_v58 = vld [vmem:[%s3712_s14 + $0x58] sm:$0xff]   ;;  %v2947_v60 = vld [vmem:[%s3712_s14 + $0x60] sm:$0xff]  }
 0x457   : > { %1621 = vmatpush1.bf16.msra.mxu1 %v1587_v61  ;;  %v2946_v59 = vld [vmem:[%s3712_s14 + $0x18] sm:$0xff]  }
 0x458   : > { %v1575_v62 = vpop.permute.xlu1 %1574  ;;  %2744 = vmatpush3.bf16.msra.mxu0 %v2942_v55 }
 0x459   : > { %v1577_v63 = vsel %vm731_vm10, %v1573_v43, %v1575_v62  ;;  %1583 = vst.msk [vmem:[#allocation2 + $0x70] sm:$0xf] %vm617_vm0, %v1575_v62  ;;  %v1591_v0 = vld [vmem:[#allocation2 + $0x38] sm:$0xff]  ;;  %v1590_v4 = vld [vmem:[#allocation2 + $0x30] sm:$0xff]  ;;  %2745 = vmatprep.subr.bf16.mxu0 %v2943_v56  ;;  %vm2122_vm0 = vcmask 130048  }
 0x45a   : > { %1582 = vst [vmem:[#allocation2 + $0x68] sm:$0xf] %v1577_v63  ;;  %1622 = vmatprep.subr.bf16.mxu1 %v1591_v0 }
 0x45b   : > { %1623 = vmatpush1.bf16.msra.mxu1 %v1590_v4 }
 0x45c   : > { %2746 = vmatpush3.bf16.msra.mxu0 %v2944_v57 }
 0x45d   : > { %v1594_v8 = vld [vmem:[#allocation2 + $0x50] sm:$0xff]  ;;  %v1593_v9 = vld [vmem:[#allocation2 + $0x48] sm:$0xff]  ;;  %2747 = vmatprep.subr.bf16.mxu0 %v2945_v58 }
 0x45e   : > { %1624 = vmatprep.subr.bf16.mxu1 %v1594_v8 }
 0x45f   : > { %1625 = vmatpush1.bf16.msra.mxu1 %v1593_v9 }
 0x460   : > { %v1598_v21 = vld [vmem:[#allocation2 + $0x70] sm:$0xf]  ;;  %2748 = vmatpush3.bf16.msra.mxu0 %v2946_v59 }
 0x461   : > { %v1597_v12 = vld [vmem:[#allocation2 + $0x68] sm:$0xf]  ;;  %v1616_v22 = vsel %vm760_vm11, %v1598_v21, 0  ;;  %2749 = vmatprep.subr.bf16.mxu0 %v2947_v60 }
 0x462   : > { %2634 = vmatprep.subr.msk.bf16.mxu1 %vm760_vm11, %v1597_v12 }
 0x463   : > { %1627 = vmatpush1.bf16.msra.mxu1 %v1610_v14 }
 0x464   : > { %2795 = vmatprep.subr.bf16.mxu1 %v2990_v2 }
 0x466   : > { %2635 = vmatmul.mubr.msk.bf16.vlgmr.msra.gmra.mrb[12].mxu1 %vm756_vm12, %v2938_v15 }
 0x467   : > { %2796 = vmatpush3.bf16.msra.mxu1 %v1586_v17  ;;  %2805 = vmatprep.mubr.msk.bf16.mxu1 %vm2999_vm1, %v2990_v2 }
 0x468   : > { %2797 = vmatprep.subr.bf16.mxu1 %v2990_v2 }
 0x46b   : > { %2798 = vmatpush3.bf16.msra.mxu1 %v1589_v18 }
 0x46c   : > { %2799 = vmatprep.subr.bf16.mxu1 %v2990_v2 }
 0x46f   : > { %2800 = vmatpush3.bf16.msra.mxu1 %v1592_v19 }
 0x470   : > { %2801 = vmatprep.subr.bf16.mxu1 %v2990_v2 }
 0x473   : > { %2802 = vmatpush3.bf16.msra.mxu1 %v1595_v20 }
 0x474   : > { %2803 = vmatprep.subr.bf16.mxu1 %v2990_v2 }
 0x477   : > { %2804 = vmatpush3.bf16.msra.mxu1 %v1616_v22  ;;  %v1702_v22 = vld [vmem:[%s3704_s6] sm:$0xff] }
 0x478   : > { %2809 = vmatprep.subr.bf16.mxu1 %v2990_v2 }
 0x47a   : > { %2806 = vmatmul.mubr.msk.bf16.vlgmr.msra.gmra.mrb[16].mxu1 %vm756_vm12, %v2938_v15 }
 0x47b   : > { %2813 = vmatprep.mubr.msk.bf16.mxu1 %vm2999_vm1, %v2990_v2 }
 0x539   : > { %v3473_v26 = vpop.f32.mrb[12].mxu1 }
 0x53a   : > { %v1723_v27 = vmul.f32 %v1711_v24, %v3473_v26  ;;  %v3476_v28 = vpop.f32.mrb[13].mxu1 }
 0x53b   : > { %v1724_v29 = vmul.f32 %v1715_v25, %v3476_v28  ;;  %v3479_v30 = vpop.f32.mrb[14].mxu1 }
 0x53c   : > { %v1741_v31 = vmul.f32 %v1723_v27, %v3473_v26  ;;  %v1726_v32 = vmul.f32 %v1711_v24, %v3479_v30  ;;  %v3483_v33 = vpop.f32.mrb[15].mxu1 }
 0x53d   : > { %v1742_v6 = vmul.f32 %v1724_v29, %v3476_v28  ;;  %v1727_v7 = vmul.f32 %v1715_v25, %v3483_v33  ;;  %v1729_v34 = vadd.f32 %v1724_v29, %v1723_v27  ;;  %v2948_v25 = vld [vmem:[%s3712_s14 + $0x20] sm:$0xff]   ;;  %v1703_v29 = vld [vmem:[%s3704_s6 + $0x8] sm:$0xff] }
 0x53e   : > { %v1744_v35 = vmul.f32 %v1726_v32, %v3479_v30  ;;  %v1704_v27 = vld [vmem:[%s3705_s7] sm:$0xff]  ;;  %2750 = vmatpush3.bf16.msra.mxu0 %v2948_v25 }
 0x53f   : > { %v1745_v36 = vmul.f32 %v1727_v7, %v3483_v33  ;;  %v1734_v37 = vadd.f32 %v1727_v7, %v1726_v32  ;;  %v1747_v38 = vadd.f32 %v1742_v6, %v1741_v31  ;;  %v2949_v32 = vld [vmem:[%s3712_s14 + $0x68] sm:$0xff]  }
 0x540   : > { %2751 = vmatprep.subr.bf16.mxu0 %v2949_v32 }
 0x541   : > { %v1752_v39 = vadd.f32 %v1745_v36, %v1744_v35  ;;  %v1705_v35 = vld [vmem:[%s3705_s7 + $0x8] sm:$0xff] }
 0x542   : > { %v2950_v36 = vld [vmem:[%s3712_s14 + $0x28] sm:$0xff]  }
 0x543   : > { %2752 = vmatpush3.bf16.msra.mxu0 %v2950_v36 }
 0x54d   : > { %v3491_v41 = vpop.f32.mrb[16].mxu1 }
 0x54e   : > { %v1725_v42 = vmul.f32 %v1719_v40, %v3491_v41  ;;  %v2807_v43 = vpop.f32.mrb[17].mxu1 }
 0x54f   : > { %v3494_v44 = vpop.f32.mrb[18].mxu1  ;;  %v2955_v43 = vld [vmem:[%s3712_s14 + $0x88] sm:$0x7f]  }
 0x550   : > { %v1743_v45 = vmul.f32 %v1725_v42, %v3491_v41  ;;  %v1728_v46 = vmul.f32 %v1719_v40, %v3494_v44  ;;  %v2808_v47 = vpop.f32.mrb[19].mxu1  ;;  %v1730_v48 = vsel %vm874_vm13, %v1725_v42, 0.0  ;;  %v2952_v40 = vld [vmem:[%s3712_s14 + $0x80] sm:$0xff]   ;;  %v2953_v42 = vld [vmem:[%s3712_s14 + $0x30] sm:$0xff]  }
 0x551   : > { %v1731_v49 = vadd.f32 %v1730_v48, %v1729_v34  ;;  %2810 = vmatpush3.bf16.msra.mxu1 %v2952_v40  ;;  %v2956_v47 = vld [vmem:[%s3712_s14 + $0x38] sm:$0xff]  }
 0x552   : > { %v1746_v50 = vmul.f32 %v1728_v46, %v3494_v44  ;;  %v1735_v1 = vsel %vm874_vm13, %v1728_v46, 0.0  ;;  %v1748_v3 = vsel %vm874_vm13, %v1743_v45, 0.0  ;;  %2811 = vmatprep.subr.bf16.mxu1 %v2990_v2  ;;  %v2954_v45 = vld [vmem:[%s3712_s14 + $0x78] sm:$0xff]   ;;  %v1963_v46 = vsel %vm1279_vm14, %v2955_v43, 0 }
 0x553   : > { %1732 = vadd.xlane.f32.xlu0 %v1731_v49  ;;  %v1736_v51 = vadd.f32 %v1735_v1, %v1734_v37  ;;  %v1749_v13 = vadd.f32 %v1748_v3, %v1747_v38  ;;  %v2960_v40 = vld [vmem:[%s3701_s3 + $0x14] ss:$8 sps:$4 sm:$0xff]  }
 0x554   : > { %v1753_v16 = vsel %vm874_vm13, %v1746_v50, 0.0 }
 0x555   : > { %1737 = vadd.xlane.f32.xlu1 %v1736_v51  ;;  %v1754_v52 = vadd.f32 %v1753_v16, %v1752_v39  ;;  %v2951_v39 = vld [vmem:[%s3712_s14 + $0x70] sm:$0xff]   ;;  %2812 = vmatpush3.bf16.msra.mxu1 %v1963_v46 }
 0x556   : > { %2753 = vmatprep.subr.bf16.mxu0 %v2951_v39  ;;  %2129 = vmatprep.subr.bf16.mxu1 %v3000_v5  ;;  %v2959_v39 = vld [vmem:[%s3701_s3] ss:$8 sps:$4 sm:$0xff]  }
 0x557   : > { %1750 = vadd.xlane.f32.xlu0 %v1749_v13  ;;  %2754 = vmatpush3.bf16.msra.mxu0 %v2953_v42  ;;  %v2962_v42 = vld [vmem:[%s3701_s3 + $0x10] ss:$8 sps:$4 sm:$0xff]  }
 0x558   : > { %2755 = vmatprep.subr.bf16.mxu0 %v2954_v45 }
 0x55b   : > { %1755 = vadd.xlane.f32.xlu0 %v1754_v52  ;;  %2756 = vmatpush3.bf16.msra.mxu0 %v2956_v47 }
 0x5e0   : > { %v1733_v61 = vpop.xlane.xlu0 %1732 }
 0x5e1   : > { %v1739_v62 = vmul.f32 0.015625, %v1733_v61 }
 0x5e2   : > { %v1738_v63 = vpop.xlane.xlu1 %1737 }
 0x5e3   : > { %v1759_v4 = vmul.f32 %v1739_v62, %v1739_v62  ;;  %v1740_v8 = vmul.f32 0.015625, %v1738_v63 }
 0x5e4   : > { %v1751_v0 = vpop.xlane.xlu0 %1750 }
 0x5e5   : > { %v1757_v9 = vmul.f32 0.015625, %v1751_v0  ;;  %v1760_v14 = vmul.f32 %v1740_v8, %v1740_v8 }
 0x5e7   : > { %v1761_v10 = vsub.f32 %v1757_v9, %v1759_v4 }
 0x5e8   : > { %v1756_v12 = vpop.xlane.xlu0 %1755 }
 0x5e9   : > { %v1763_v15 = vmax.f32 %v1761_v10, 0.0  ;;  %v1758_v17 = vmul.f32 0.015625, %v1756_v12 }
 0x5eb   : > { %v1765_v18 = vadd.f32 1e-05, %v1763_v15  ;;  %v1762_v19 = vsub.f32 %v1758_v17, %v1760_v14 }
 0x5ed   : > { %2970 = vrsqrt.f32 %v1765_v18  ;;  %v1764_v20 = vmax.f32 %v1762_v19, 0.0 }
 0x5ef   : > { %v1766_v21 = vadd.f32 1e-05, %v1764_v20  ;;  %v2957_v20 = vld [vmem:[%s3701_s3 + $0x4] ss:$8 sps:$4 sm:$0xff]  }
 0x5f1   : > { %2972 = vrsqrt.f32 %v1766_v21 }
 0x5f7   : > { %v2971_v23 = vpop.eup %2970 }
 0x5f8   : > { %v1769_v24 = vmul.f32 %v2971_v23, %v1702_v22 }
 0x5fa   : > { %1773 = vperm.xlu1 %2862, %v1769_v24   ;;  %v1787_v31 = vmul.f32 %v1769_v24, %v1739_v62 }
 0x5fb   : > { %v2973_v6 = vpop.eup %2972 }
 0x5fc   : > { %v1789_v7 = vsub.f32 %v1704_v27, %v1787_v31  ;;  %v1770_v34 = vmul.f32 %v2973_v6, %v1703_v29 }
 0x5fe   : > { %1793 = vperm.xlu1 %2862, %v1789_v7   ;;  %1778 = vperm.xlu0 %2861, %v1770_v34   ;;  %v1788_v37 = vmul.f32 %v1770_v34, %v1740_v8 }
 0x600   : > { %v1790_v38 = vsub.f32 %v1705_v35, %v1788_v37 }
 0x602   : > { %1798 = vperm.xlu1 %2862, %v1790_v38  }
 0x679   : > { %v1774_v48 = vpop.permute.xlu1 %1773 }
 0x67a   : > { %v1781_v49 = vmul.f32 %v1774_v48, %v3473_v26  ;;  %v1782_v2 = vmul.f32 %v1774_v48, %v3476_v28  ;;  %v1783_v3 = vmul.f32 %v1774_v48, %v3491_v41 }
 0x67d   : > { %v1779_v50 = vpop.permute.xlu0 %1778  ;;  %v1794_v1 = vpop.permute.xlu1 %1793 }
 0x67e   : > { %v1801_v51 = vadd.f32 %v1794_v1, %v1781_v49  ;;  %v1802_v13 = vadd.f32 %v1794_v1, %v1782_v2  ;;  %v1784_v16 = vmul.f32 %v1779_v50, %v3479_v30  ;;  %v1785_v52 = vmul.f32 %v1779_v50, %v3483_v33 }
 0x67f   : > { %v1786_v11 = vmul.f32 %v1779_v50, %v3494_v44  ;;  %v1803_v53 = vadd.f32 %v1794_v1, %v1783_v3 }
 0x680   : > { %v1807_v26 = vmax.f32 %v1801_v51, 0.0  ;;  %v1808_v58 = vmax.f32 %v1802_v13, 0.0 }
 0x681   : > { %v1799_v54 = vpop.permute.xlu1 %1798  ;;  %v1809_v28 = vmax.f32 %v1803_v53, 0.0 }
 0x682   : > { %v1804_v55 = vadd.f32 %v1799_v54, %v1784_v16  ;;  %v1805_v56 = vadd.f32 %v1799_v54, %v1785_v52  ;;  %v1806_v57 = vadd.f32 %v1799_v54, %v1786_v11 }
 0x684   : > { %v1810_v59 = vmax.f32 %v1804_v55, 0.0  ;;  %v1811_v60 = vmax.f32 %v1805_v56, 0.0  ;;  %v1812_v61 = vmax.f32 %v1806_v57, 0.0 }
 0x686   : > { %v1813_v41 = vpack.c.bf16 %v1810_v59, %v1807_v26  ;;  %v1815_v62 = vpack.c.bf16 %v1812_v61, %v1809_v28  ;;  %v1814_v63 = vpack.c.bf16 %v1811_v60, %v1808_v58 }
 0x688   : > { %1997 = vmatprep.mubr.bf16.mxu0 %v1814_v63  ;;  %2814 = vmatmul.mubr.msk.bf16.vlgmr.msra.gmra.mrb[20].mxu1 %vm874_vm13, %v1815_v62 }
 0x689   : > { %1998 = vmatmul.mubr.bf16.vlgmr.msra.gmra.mrb[8].mxu0 %v1813_v41  ;;  %2662 = vmatprep.mubr.msk.bf16.mxu1 %vm2122_vm0, %v2957_v20 }
 0x75b   : > { %v2040_v30 = vpop.f32.mrb[20].mxu1 }
 0x75c   : > { %v2757_v33 = vpop.f32.mrb[8].mxu0  ;;  %v2815_v44 = vpop.f32.mrb[21].mxu1 }
 0x75d   : > { %v2758_v0 = vpop.f32.mrb[9].mxu0  ;;  %v2043_v4 = vpop.f32.mrb[22].mxu1 }
 0x75e   : > { %v2759_v8 = vadd.f32 %v2758_v0, %v2757_v33  ;;  %v2760_v9 = vpop.f32.mrb[10].mxu0  ;;  %v2816_v10 = vpop.f32.mrb[23].mxu1 }
 0x75f   : > { %v2761_v12 = vpop.f32.mrb[11].mxu0 }
 0x760   : > { %v2041_v14 = vadd.f32 %v2759_v8, %v2040_v30  ;;  %v2762_v15 = vadd.f32 %v2761_v12, %v2760_v9 }
 0x762   : > { %v2044_v17 = vadd.f32 %v2762_v15, %v2043_v4 }
 0x764   : > { %v2047_v18 = vpack.c.bf16 %v2044_v17, %v2041_v14 }
 0x766   : > { %2692 = vst [vmem:[%s595_s30] sm:$0xff] %v2047_v18   ;;  %2063 = vrot.lane.b32.xlu1 %v2047_v18, %s2992_s21  ;;  %2059 = vrot.lane.b32.xlu0 %v2047_v18, %s3735_s1  ;;  %2058 = vst.msk [vmem:[#allocation2] sm:$0xff] %vm2057_vm15, %v2047_v18 }
 0x76a   : > { %2071 = vrot.lane.b32.xlu1 %v2047_v18, %s3001_s0  ;;  %2067 = vrot.lane.b32.xlu0 %v2047_v18, %s3002_s19 }
 0x76d   : > { %v2091_v19 = vld [vmem:[#allocation2] sm:$0xff] }
 0x76e   : > { %2079 = vrot.lane.b32.xlu1 %v2047_v18, %s3737_s23  ;;  %2075 = vrot.lane.b32.xlu0 %v2047_v18, %s3003_s25  ;;  %s2679_s25 = sshll.u32 %s3742_s28, 4 }
 0x76f   : > { %2130 = vmatpush1.bf16.msra.mxu1 %v2091_v19  ;;  %s600_s21 = scalar_lea.vmem %s3716_s18, %s2679_s25 }
 0x770   : > { %2131 = vmatprep.subr.bf16.mxu1 %v3000_v5 }
 0x772   : > { %2087 = vrot.lane.b32.xlu1 %v2047_v18, %s3004_s29  ;;  %2083 = vrot.lane.b32.xlu0 %v2047_v18, %s3005_s22 }
 0x7d8   : > { %v2064_v21 = vpop.permute.xlu1 %2063  ;;  %v2060_v22 = vpop.permute.xlu0 %2059 }
 0x7d9   : > { %2066 = vst.msk [vmem:[#allocation2 + $0x30] sm:$0xff] %vm2057_vm15, %v2064_v21  ;;  %2062 = vst.msk [vmem:[#allocation2 + $0x18] sm:$0xff] %vm2057_vm15, %v2060_v22 }
 0x7dc   : > { %v2072_v23 = vpop.permute.xlu1 %2071  ;;  %v2068_v24 = vpop.permute.xlu0 %2067 }
 0x7dd   : > { %2074 = vst.msk [vmem:[#allocation2 + $0x60] sm:$0xff] %vm2057_vm15, %v2072_v23  ;;  %2070 = vst.msk [vmem:[#allocation2 + $0x48] sm:$0xff] %vm2057_vm15, %v2068_v24 }
 0x7e0   : > { %v2080_v25 = vpop.permute.xlu1 %2079  ;;  %v2076_v27 = vpop.permute.xlu0 %2075  ;;  %v2092_v29 = vld [vmem:[#allocation2 + $0x18] sm:$0xff]  ;;  %v2093_v6 = vld [vmem:[#allocation2 + $0x30] sm:$0xff] }
 0x7e1   : > { %2082 = vst.msk [vmem:[#allocation2 + $0x90] sm:$0xff] %vm2057_vm15, %v2080_v25  ;;  %2078 = vst.msk [vmem:[#allocation2 + $0x78] sm:$0xff] %vm2057_vm15, %v2076_v27  ;;  %2132 = vmatpush1.bf16.msra.mxu1 %v2092_v29 }
 0x7e2   : > { %2133 = vmatprep.subr.bf16.mxu1 %v3000_v5 }
 0x7e4   : > { %v2088_v31 = vpop.permute.xlu1 %2087  ;;  %v2084_v32 = vpop.permute.xlu0 %2083  ;;  %v2094_v7 = vld [vmem:[#allocation2 + $0x48] sm:$0xff]  ;;  %v2095_v34 = vld [vmem:[#allocation2 + $0x60] sm:$0xff] }
 0x7e5   : > { %2090 = vst.msk [vmem:[#allocation2 + $0xc0] sm:$0xff] %vm2057_vm15, %v2088_v31  ;;  %2086 = vst.msk [vmem:[#allocation2 + $0xa8] sm:$0xff] %vm2057_vm15, %v2084_v32  ;;  %2134 = vmatpush1.bf16.msra.mxu1 %v2093_v6 }
 0x7e6   : > { %2135 = vmatprep.subr.bf16.mxu1 %v3000_v5 }
 0x7e8   : > { %v2096_v35 = vld [vmem:[#allocation2 + $0x78] sm:$0xff]  ;;  %v2097_v36 = vld [vmem:[#allocation2 + $0x90] sm:$0xff] }
 0x7e9   : > { %2136 = vmatpush1.bf16.msra.mxu1 %v2094_v7 }
 0x7ea   : > { %2137 = vmatprep.subr.bf16.mxu1 %v3000_v5 }
 0x7ec   : > { %v2098_v37 = vld [vmem:[#allocation2 + $0xa8] sm:$0xff]  ;;  %v2099_v38 = vld [vmem:[#allocation2 + $0xc0] sm:$0xff] }
 0x7ed   : > { %2138 = vmatpush1.bf16.msra.mxu1 %v2095_v34  ;;  %v2179_v34 = vld [vmem:[%s3706_s8 + $0x8] sm:$0xff] }
 0x7ee   : > { %2139 = vmatprep.subr.bf16.mxu1 %v3000_v5 }
 0x7f1   : > { %2140 = vmatpush1.bf16.msra.mxu1 %v2096_v35 }
 0x7f2   : > { %2141 = vmatprep.subr.bf16.mxu1 %v3000_v5 }
 0x7f5   : > { %2142 = vmatpush1.bf16.msra.mxu1 %v2097_v36 }
 0x7f6   : > { %2143 = vmatprep.subr.bf16.mxu1 %v3000_v5 }
 0x7f9   : > { %2144 = vmatpush1.bf16.msra.mxu1 %v2098_v37  ;;  %v2178_v37 = vld [vmem:[%s3706_s8] sm:$0xff] }
 0x7fa   : > { %2145 = vmatprep.subr.bf16.mxu1 %v3000_v5  ;;  %v2664_v5 = vld [vmem:[%s3710_s12] ss:$0 sm:$0xff] }
 0x7fd   : > { %2146 = vmatpush1.bf16.msra.mxu1 %v2099_v38 }
 0x800   : > { %2162 = vmatmul.mubr.bf16.vlgmr.msra.gmra.mrb[24].mxu1 %v2959_v39 }
 0x801   : > { %2663 = vmatprep.mubr.msk.bf16.mxu1 %vm2122_vm0, %v2960_v40 }
 0x808   : > { %2170 = vmatmul.mubr.bf16.gmra.mrb[28].mxu1 %v2962_v42 }
 0x8d3   : > { %v3620_v43 = vpop.f32.mrb[24].mxu1 }
 0x8d4   : > { %v2165_v45 = vpop.f32.mrb[25].mxu1  ;;  %v2193_v46 = vmul.f32 %v2664_v5, %v3620_v43 }
 0x8d5   : > { %v3623_v47 = vpop.f32.mrb[26].mxu1  ;;  %v2182_v45 = vld [vmem:[%s3707_s9] sm:$0xff] }
 0x8d6   : > { %v2168_v48 = vpop.f32.mrb[27].mxu1  ;;  %v2197_v49 = vsel %vm2057_vm15, %v2193_v46, 0.0  ;;  %v2194_v2 = vmul.f32 %v2664_v5, %v3623_v47  ;;  %v2213_v3 = vmul.f32 %v2193_v46, %v3620_v43  ;;  %v2180_v46 = vld [vmem:[%s3706_s8 + $0x10] sm:$0xff] }
 0x8d7   : > { %2198 = vadd.xlane.f32.xlu0 %v2197_v49  ;;  %v2963_v49 = vld [vmem:[%s3713_s15] sm:$0xff]  }
 0x8d8   : > { %v2200_v50 = vsel %vm2057_vm15, %v2194_v2, 0.0  ;;  %v2214_v1 = vmul.f32 %v2194_v2, %v3623_v47  ;;  %v2217_v52 = vsel %vm2057_vm15, %v2213_v3, 0.0  ;;  %2817 = vmatprep.subr.bf16.mxu0 %v2963_v49 }
 0x8d9   : > { %2201 = vadd.xlane.f32.xlu1 %v2200_v50  ;;  %2818 = vmatpush3.bf16.msra.mxu0 %v2963_v49 }
 0x8da   : > { %v2220_v51 = vsel %vm2057_vm15, %v2214_v1, 0.0 }
 0x8db   : > { %2221 = vadd.xlane.f32.xlu0 %v2220_v51  ;;  %v3631_v13 = vpop.f32.mrb[28].mxu1  ;;  %v2184_v51 = vld [vmem:[%s3707_s9 + $0x10] sm:$0xff] }
 0x8dc   : > { %v2173_v16 = vpop.f32.mrb[29].mxu1  ;;  %v2195_v11 = vmul.f32 %v2664_v5, %v3631_v13 }
 0x8dd   : > { %2218 = vadd.xlane.f32.xlu1 %v2217_v52  ;;  %v3635_v53 = vpop.f32.mrb[30].mxu1  ;;  %v2181_v52 = vld [vmem:[%s3706_s8 + $0x18] sm:$0xff] }
 0x8de   : > { %v2176_v54 = vpop.f32.mrb[31].mxu1  ;;  %v2203_v55 = vsel %vm2057_vm15, %v2195_v11, 0.0  ;;  %v2215_v56 = vmul.f32 %v2195_v11, %v3631_v13  ;;  %v2196_v57 = vmul.f32 %v2664_v5, %v3635_v53  ;;  %v2183_v5 = vld [vmem:[%s3707_s9 + $0x8] sm:$0xff] }
 0x8df   : > { %2204 = vadd.xlane.f32.xlu0 %v2203_v55  ;;  %v2964_v11 = vld [vmem:[%s3713_s15 + $0x8] sm:$0xff]  }
 0x8e0   : > { %v2223_v26 = vsel %vm2057_vm15, %v2215_v56, 0.0  ;;  %v2206_v58 = vsel %vm2057_vm15, %v2196_v57, 0.0  ;;  %v2216_v28 = vmul.f32 %v2196_v57, %v3635_v53  ;;  %2819 = vmatprep.subr.bf16.mxu0 %v2964_v11  ;;  %v2965_v57 = vld [vmem:[%s3713_s15 + $0x10] sm:$0xff]  }
 0x8e1   : > { %2224 = vadd.xlane.f32.xlu1 %v2223_v26  ;;  %2820 = vmatpush3.bf16.msra.mxu0 %v2964_v11 }
 0x8e2   : > { %v2226_v59 = vsel %vm2057_vm15, %v2216_v28, 0.0  ;;  %2821 = vmatprep.subr.bf16.mxu0 %v2965_v57  ;;  %v2966_v28 = vld [vmem:[%s3713_s15 + $0x18] sm:$0xff]  }
 0x8e3   : > { %2207 = vadd.xlane.f32.xlu0 %v2206_v58  ;;  %v2185_v58 = vld [vmem:[%s3707_s9 + $0x18] sm:$0xff] }
 0x8e5   : > { %2822 = vmatpush3.bf16.msra.mxu0 %v2965_v57 }
 0x8e6   : > { %2823 = vmatprep.subr.bf16.mxu0 %v2966_v28 }
 0x8e7   : > { %2227 = vadd.xlane.f32.xlu0 %v2226_v59 }
 0x8e9   : > { %2824 = vmatpush3.bf16.msra.mxu0 %v2966_v28 }
 0x964   : > { %v2199_v60 = vpop.xlane.xlu0 %2198 }
 0x965   : > { %v2209_v41 = vmul.f32 0.0625, %v2199_v60  ;;  %v2967_v60 = vld [vmem:[%s3713_s15 + $0x20] sm:$0x7f]  }
 0x966   : > { %v2202_v61 = vpop.xlane.xlu1 %2201  ;;  %2835 = vmatprep.subr.msk.bf16.mxu0 %vm1279_vm14, %v2967_v60 }
 0x967   : > { %v2210_v62 = vmul.f32 0.0625, %v2202_v61  ;;  %v2233_v0 = vmul.f32 %v2209_v41, %v2209_v41  ;;  %v2365_v61 = vsel %vm1279_vm14, %v2967_v60, 0 }
 0x968   : > { %v2222_v63 = vpop.xlane.xlu0 %2221  ;;  %2826 = vmatpush3.bf16.msra.mxu0 %v2365_v61 }
 0x969   : > { %v2234_v30 = vmul.f32 %v2210_v62, %v2210_v62  ;;  %v2230_v33 = vmul.f32 0.0625, %v2222_v63 }
 0x96a   : > { %v2219_v44 = vpop.xlane.xlu1 %2218 }
 0x96b   : > { %v2238_v4 = vsub.f32 %v2230_v33, %v2234_v30  ;;  %v2229_v8 = vmul.f32 0.0625, %v2219_v44 }
 0x96c   : > { %v2205_v9 = vpop.xlane.xlu0 %2204 }
 0x96d   : > { %v2242_v10 = vmax.f32 %v2238_v4, 0.0  ;;  %v2237_v12 = vsub.f32 %v2229_v8, %v2233_v0  ;;  %v2211_v14 = vmul.f32 0.0625, %v2205_v9 }
 0x96e   : > { %v2225_v15 = vpop.xlane.xlu1 %2224 }
 0x96f   : > { %v2246_v17 = vadd.f32 1e-05, %v2242_v10  ;;  %v2241_v18 = vmax.f32 %v2237_v12, 0.0  ;;  %v2235_v19 = vmul.f32 %v2211_v14, %v2211_v14  ;;  %v2231_v20 = vmul.f32 0.0625, %v2225_v15 }
 0x970   : > { %v2208_v21 = vpop.xlane.xlu0 %2207 }
 0x971   : > { %2974 = vrsqrt.f32 %v2246_v17  ;;  %v2245_v22 = vadd.f32 1e-05, %v2241_v18  ;;  %v2239_v23 = vsub.f32 %v2231_v20, %v2235_v19  ;;  %v2212_v24 = vmul.f32 0.0625, %v2208_v21 }
 0x973   : > { %2976 = vrsqrt.f32 %v2245_v22  ;;  %v2243_v25 = vmax.f32 %v2239_v23, 0.0  ;;  %v2236_v31 = vmul.f32 %v2212_v24, %v2212_v24 }
 0x974   : > { %v2228_v27 = vpop.xlane.xlu0 %2227 }
 0x975   : > { %v2247_v29 = vadd.f32 1e-05, %v2243_v25  ;;  %v2232_v32 = vmul.f32 0.0625, %v2228_v27 }
 0x977   : > { %2978 = vrsqrt.f32 %v2247_v29  ;;  %v2240_v6 = vsub.f32 %v2232_v32, %v2236_v31 }
 0x979   : > { %v2244_v7 = vmax.f32 %v2240_v6, 0.0 }
 0x97b   : > { %v2975_v35 = vpop.eup %2974  ;;  %v2248_v36 = vadd.f32 1e-05, %v2244_v7 }
 0x97c   : > { %v2254_v38 = vmul.f32 %v2975_v35, %v2179_v34 }
 0x97d   : > { %v2977_v39 = vpop.eup %2976  ;;  %2980 = vrsqrt.f32 %v2248_v36 }
 0x97e   : > { %2264 = vperm.xlu0 %2861, %v2254_v38   ;;  %v2253_v40 = vmul.f32 %v2977_v39, %v2178_v37  ;;  %v2282_v42 = vmul.f32 %v2254_v38, %v2210_v62 }
 0x980   : > { %2259 = vperm.xlu1 %2862, %v2253_v40   ;;  %v2281_v48 = vmul.f32 %v2253_v40, %v2209_v41  ;;  %v2286_v50 = vsub.f32 %v2183_v5, %v2282_v42 }
 0x981   : > { %v2979_v2 = vpop.eup %2978 }
 0x982   : > { %v2285_v1 = vsub.f32 %v2182_v45, %v2281_v48  ;;  %v2255_v3 = vmul.f32 %v2979_v2, %v2180_v46 }
 0x984   : > { %2296 = vperm.xlu1 %2862, %v2286_v50   ;;  %2291 = vperm.xlu0 %2861, %v2285_v1   ;;  %v2283_v16 = vmul.f32 %v2255_v3, %v2211_v14 }
 0x986   : > { %v2287_v54 = vsub.f32 %v2184_v51, %v2283_v16 }
 0x987   : > { %v2981_v55 = vpop.eup %2980 }
 0x988   : > { %2269 = vperm.xlu1 %2862, %v2255_v3   ;;  %2301 = vperm.xlu0 %2861, %v2287_v54   ;;  %v2256_v56 = vmul.f32 %v2981_v55, %v2181_v52 }
 0x98a   : > { %v2284_v26 = vmul.f32 %v2256_v56, %v2212_v24 }
 0x98c   : > { %2274 = vperm.xlu1 %2862, %v2256_v56   ;;  %v2288_v59 = vsub.f32 %v2185_v58, %v2284_v26 }
 0x990   : > { %2306 = vperm.xlu1 %2862, %v2288_v59  }
 0x9fd   : > { %v2265_v41 = vpop.permute.xlu0 %2264 }
 0x9fe   : > { %v2278_v63 = vmul.f32 %v2265_v41, %v3623_v47 }
 0x9ff   : > { %v2260_v62 = vpop.permute.xlu1 %2259 }
 0xa00   : > { %v2277_v30 = vmul.f32 %v2260_v62, %v3620_v43 }
 0xa03   : > { %v2297_v33 = vpop.permute.xlu1 %2296  ;;  %v2292_v44 = vpop.permute.xlu0 %2291 }
 0xa04   : > { %v2310_v0 = vadd.f32 %v2297_v33, %v2278_v63  ;;  %v2309_v4 = vadd.f32 %v2292_v44, %v2277_v30 }
 0xa06   : > { %v2314_v8 = vmax.f32 %v2310_v0, 0.0  ;;  %v2313_v9 = vmax.f32 %v2309_v4, 0.0 }
 0xa07   : > { %v2270_v10 = vpop.permute.xlu1 %2269  ;;  %v2302_v17 = vpop.permute.xlu0 %2301 }
 0xa08   : > { %v2317_v12 = vpack.c.bf16 %v2314_v8, %v2313_v9  ;;  %v2279_v14 = vmul.f32 %v2270_v10, %v3631_v13 }
 0xa0a   : > { %2827 = vmatprep.mubr.msk.bf16.mxu0 %vm2057_vm15, %v2317_v12  ;;  %v2311_v18 = vadd.f32 %v2302_v17, %v2279_v14 }
 0xa0b   : > { %v2275_v15 = vpop.permute.xlu1 %2274 }
 0xa0c   : > { %v2280_v47 = vmul.f32 %v2275_v15, %v3635_v53  ;;  %v2315_v20 = vmax.f32 %v2311_v18, 0.0 }
 0xa0f   : > { %v2307_v19 = vpop.permute.xlu1 %2306 }
 0xa10   : > { %v2312_v43 = vadd.f32 %v2307_v19, %v2280_v47 }
 0xa12   : > { %v2316_v21 = vmax.f32 %v2312_v43, 0.0 }
 0xa14   : > { %v2318_v22 = vpack.c.bf16 %v2316_v21, %v2315_v20 }
 0xa16   : > { %2828 = vmatmul.mubr.msk.bf16.vlgmr.msra.gmra.mrb[12].mxu0 %vm2057_vm15, %v2318_v22 }
 0xae9   : > { %v2829_v23 = vpop.f32.mrb[12].mxu0 }
 0xaea   : > { %v2401_v24 = vpop.f32.mrb[13].mxu0 }
 0xaeb   : > { %v2830_v13 = vpop.f32.mrb[14].mxu0 }
 0xaec   : > { %v2701_v25 = vpack.c.bf16 %v2830_v13, %v2829_v23  ;;  %v2404_v27 = vpop.f32.mrb[15].mxu0 }
 0xaed   : > { %v2696_v29 = vpack.c.bf16 %v2404_v27, %v2401_v24 }
 0xaee   : > { %2703 = vst [vmem:[%s600_s21 + $0x8] sm:$0xff] %v2701_v25  }
 0xaef   : > { %2697 = vst [vmem:[%s600_s21] sm:$0xff] %v2696_v29  }
 0xaf0 PF: > { %s29_s27 = sadd.s32 1, %s2988_s27  }
 0xaf1   : > { %p26_p4 = scmp.ge.s32.totalorder %s29_s27, 4  }
 0xaf3   :  { %28 = sbr.rel (!%p26_p4) target bundleno = 4 (0x4), region = 138 }

// kernel: hidt_forward.3
= control target key start
LH: loop header
LB: loop body
LE: loop exit
PB: predicated region body
PF: predicated region fallthrough
CT: control target
= control target key end

     0   :  { %s5304_s0 = inlined_call_operand.vmem [shape: bf16[2,32,128], index: 0, kind: input, shape index: {}]   ;;  %s5305_s1 = inlined_call_operand.vmem [shape: bf16[2,16,128], index: 1, kind: input, shape index: {}]   ;;  %s5306_s2 = inlined_call_operand.vmem [shape: bf16[2,8,384], index: 2, kind: input, shape index: {}]   ;;  %s5307_s3 = inlined_call_operand.vmem [shape: f32[2,128,1], index: 3, kind: input, shape index: {}]   ;;  %s5308_s4 = inlined_call_operand.vmem [shape: bf16[32,288], index: 4, kind: input, shape index: {}]   ;;  %s5309_s5 = inlined_call_operand.vmem [shape: bf16[32,288], index: 5, kind: input, shape index: {}]   ;;  %s5310_s6 = inlined_call_operand.vmem [shape: bf16[16,288], index: 6, kind: input, shape index: {}]   ;;  %s5311_s7 = inlined_call_operand.vmem [shape: bf16[8,144], index: 7, kind: input, shape index: {}]   ;;  %s5312_s8 = inlined_call_operand.vmem [shape: bf16[3,72], index: 8, kind: input, shape index: {}]   ;;  %s5313_s9 = inlined_call_operand.vmem [shape: f32[16,1], index: 9, kind: input, shape index: {}]   ;;  %s5314_s10 = inlined_call_operand.vmem [shape: f32[16,1], index: 10, kind: input, shape index: {}]   ;;  %s5315_s11 = inlined_call_operand.vmem [shape: f32[8,1], index: 11, kind: input, shape index: {}]   ;;  %s5316_s12 = inlined_call_operand.vmem [shape: f32[8,1], index: 12, kind: input, shape index: {}]   ;;  %s5317_s13 = inlined_call_operand.vmem [shape: f32[3,1], index: 13, kind: input, shape index: {}]   ;;  %s5318_s14 = inlined_call_operand.vmem [shape: f32[1,22], index: 14, kind: input, shape index: {}]   ;;  %s5319_s15 = inlined_call_operand.vmem [shape: f32[1,78], index: 15, kind: input, shape index: {}]   ;;  %s5320_s16 = inlined_call_operand.vmem [shape: f32[1,286], index: 16, kind: input, shape index: {}]   ;;  %s5321_s17 = inlined_call_operand.vmem [shape: bf16[22,128], index: 17, kind: input, shape index: {}]   ;;  %s5322_s18 = inlined_call_operand.vmem [shape: bf16[22,128], index: 18, kind: input, shape index: {}]   ;;  %s5323_s19 = inlined_call_operand.vmem [shape: bf16[78,384], index: 19, kind: input, shape index: {}]   ;;  %s5324_s20 = inlined_call_operand.vmem [shape: bf16[286,384], index: 20, kind: input, shape index: {}]   ;;  %s5325_s21 = inlined_call_operand.vmem [shape: f32[286,256], index: 21, kind: input, shape index: {}]   ;;  %s5326_s22 = inlined_call_operand.vmem [shape: f32[2,3,256], index: 22, kind: output, shape index: {}]  }
   0x1   :  { %5359 = sst [smem:[#allocation3_spill]] %s5304_s0 }
   0x2   :  { %5360 = sst [smem:[#allocation4_spill]] %s5305_s1 }
   0x3   :  { %5361 = sst [smem:[#allocation5_spill]] %s5306_s2 }
   0x4   :  { %5362 = sst [smem:[#allocation6_spill]] %s5307_s3  ;;  %s4363_s3 = smov 0  }
   0x5   :  { %5363 = sst [smem:[#allocation7_spill]] %s5308_s4 }
   0x6   :  { %5364 = sst [smem:[#allocation8_spill]] %s5309_s5 }
   0x7   :  { %5365 = sst [smem:[#allocation9_spill]] %s5310_s6 }
   0x8   :  { %5366 = sst [smem:[#allocation10_spill]] %s5311_s7 }
   0x9   :  { %5367 = sst [smem:[#allocation11_spill]] %s5318_s14 }
   0xa   :  { %5368 = sst [smem:[#allocation12_spill]] %s5319_s15 }
   0xb   :  { %5369 = sst [smem:[#allocation13_spill]] %s5321_s17 }
   0xc   :  { %5370 = sst [smem:[#allocation14_spill]] %s5322_s18 }
   0xd LB: > { %s3573_s28 = sadd.s32 4294967295, %s4224_s3   ;;  %p3577_p0 = scmp.ge.s32.totalorder %s4224_s3, 1  ;;  %s4224_s3 = sphi %s4363_s3, %s32_s3  }
   0xe   : > { %p642_p1 = scmp.lt.s32.totalorder %s4224_s3, 3 }
  0x10   : > { %p643_p2 = pnand %p3577_p0, %p642_p1 }
  0x11   : > { %p719_p3 = scmp.lt.s32.totalorder (!%p643_p2), %s3573_s28, 1  ;;  %s5371_s0 = sld [smem:[#allocation3_spill]] (!%p643_p2)  ;;  %vm781_vm0 = vcmask (!%p643_p2), 179200   ;;  %vm904_vm1 = vcmask (!%p643_p2), 261120   ;;  %vm1160_vm2 = vcmask (!%p643_p2), 1042432   ;;  %vm1668_vm3 = vcmask (!%p643_p2), 637952  }
  0x12   : > { %646 = sbr.rel (%p643_p2) target bundleno = 4313 (0x10d9), region = 108  ;;  %s5342_s1 = smov (!%p643_p2), 121   ;;  %vm4241_vm4 = vmmov (!%p643_p2), 0   ;;  %vm2045_vm5 = vcmask (!%p643_p2), 1046528   ;;  %vm2144_vm6 = vcmask (!%p643_p2), 244736   ;;  %vm2303_vm7 = vcmask (!%p643_p2), 130048  }
  0x13   : > { %s4227_s5 = smov (!%p643_p2), 120   ;;  %s5338_s24 = smov (!%p643_p2), 127   ;;  %vm2170_vm8 = vcmask (!%p643_p2), 1031168   ;;  %vm2155_vm9 = vcmask (!%p643_p2), 1039360   ;;  %vm2200_vm10 = vcmask (!%p643_p2), 891904   ;;  %vm2185_vm11 = vcmask (!%p643_p2), 900096  }
  0x14   : > { %s5340_s6 = smov (!%p643_p2), 116   ;;  %s5330_s25 = smov (!%p643_p2), 126   ;;  %vm2230_vm12 = vcmask (!%p643_p2), 752640   ;;  %vm2215_vm13 = vcmask (!%p643_p2), 883712   ;;  %vm2245_vm14 = vcmask (!%p643_p2), 744448   ;;  %vm2260_vm15 = vcmask (!%p643_p2), 736256  }
  0x15   : > { %s5336_s26 = smov (!%p643_p2), 115   ;;  %s5332_s2 = smov (!%p643_p2), 122  }
  0x16   : > { %s5372_s30 = sld [smem:[#allocation7_spill]] (!%p643_p2)  ;;  %s5334_s4 = smov (!%p643_p2), 114  }
  0x17   : > { %s5373_s14 = sld [smem:[#allocation11_spill]] (!%p643_p2)  ;;  %s5374_s27 = sld [smem:[#allocation6_spill]] (!%p643_p2) }
  0x18   : > { %s5375_s17 = sld [smem:[#allocation13_spill]] (!%p643_p2)  ;;  %s5382_s18 = sld [smem:[#allocation14_spill]] (!%p643_p2) }
  0x19   : > { %s5399_s28 = smov (!%p719_p3, %s3573_s28), 1  ;;  %s5386_s15 = sld [smem:[#allocation12_spill]] }
  0x1a   : > { %s3707_s29 = sshll.u32 %s5399_s28, 4  ;;  %s5390_s7 = sld [smem:[#allocation10_spill]] }
  0x1b   : > { %s4377_s23 = scalar_lea.vmem %s5371_s0, %s3707_s29  ;;  %s5379_s0 = smov 114  }
  0x1c   : > { %v745_v0 = vld [vmem:[%s4377_s23] sm:$0xff]   ;;  %v747_v1 = vld [vmem:[%s4377_s23 + $0x8] sm:$0xff]  }
  0x1d   : > { %808 = vrot.lane.b32.xlu0 %v745_v0, %s5342_s1  ;;  %816 = vrot.lane.b32.xlu1 %v745_v0, %s4227_s5  ;;  %782 = vst.msk [vmem:[#allocation2] sm:$0xff] %vm781_vm0, %v745_v0  ;;  %783 = vst.msk [vmem:[#allocation2 + $0x18] sm:$0xff] %vm781_vm0, %v747_v1  ;;  %v4064_v2 = vld [vmem:[%s5372_s30 + $0x4] ss:$12 sps:$4 sm:$0xff]   ;;  %v4065_v3 = vld [vmem:[%s5372_s30 + $0x8] ss:$12 sps:$4 sm:$0xff]  }
  0x1e   : > { %943 = vmatprep.mubr.bf16.mxu0 %v4064_v2  ;;  %3853 = vmatprep.mubr.msk.bf16.mxu1 %vm904_vm1, %v4065_v3  ;;  %v4062_v38 = vld [vmem:[%s5372_s30] ss:$12 sps:$4 sm:$0xff]   ;;  %v4067_v39 = vld [vmem:[%s5372_s30 + $0x1c] ss:$12 sps:$4 sm:$0xff]   ;;  %v4069_v41 = vld [vmem:[%s5372_s30 + $0x18] ss:$12 sps:$4 sm:$0xff]  }
  0x1f   : > { %v4066_v40 = vld [vmem:[%s5372_s30 + $0x20] ss:$12 sps:$4 sm:$0xff]  }
  0x20   : > { %v4438_v50 = vld [vmem:[%s5373_s14] ss:$0 sm:$0xff]  ;;  %s4240_s14 = smov 106  }
  0x21   : > { %810 = vrot.lane.b32.xlu0 %v747_v1, %s5342_s1  ;;  %784 = vrot.lane.b32.xlu1 %v745_v0, %s5338_s24 }
  0x24   : > { %v848_v8 = vld [vmem:[#allocation2] sm:$0xff]  ;;  %v849_v12 = vld [vmem:[#allocation2 + $0x18] sm:$0xff] }
  0x25   : > { %818 = vrot.lane.b32.xlu0 %v747_v1, %s4227_s5  ;;  %786 = vrot.lane.b32.xlu1 %v747_v1, %s5338_s24  ;;  %s3709_s24 = sshll.u32 %s5399_s28, 7 }
  0x26   : > { %s4474_s29 = scalar_lea.vmem %s5374_s27, %s3709_s24  ;;  %s5378_s27 = smov 126  }
  0x27   : > { %s5381_s24 = sld [smem:[#allocation8_spill]] }
  0x29   : > { %824 = vrot.lane.b32.xlu0 %v745_v0, %s5340_s6  ;;  %792 = vrot.lane.b32.xlu1 %v745_v0, %s5330_s25 }
  0x2d   : > { %826 = vrot.lane.b32.xlu0 %v747_v1, %s5340_s6  ;;  %794 = vrot.lane.b32.xlu1 %v747_v1, %s5330_s25  ;;  %s4238_s25 = smov 118  }
  0x31   : > { %832 = vrot.lane.b32.xlu0 %v745_v0, %s5336_s26  ;;  %800 = vrot.lane.b32.xlu1 %v745_v0, %s5332_s2 }
  0x35   : > { %834 = vrot.lane.b32.xlu0 %v747_v1, %s5336_s26  ;;  %802 = vrot.lane.b32.xlu1 %v747_v1, %s5332_s2  ;;  %s5376_s26 = smov 127   ;;  %s4239_s2 = smov 107  }
  0x39   : > { %840 = vrot.lane.b32.xlu0 %v745_v0, %s5334_s4  ;;  %842 = vrot.lane.b32.xlu1 %v747_v1, %s5334_s4  ;;  %s5377_s4 = smov 115  }
  0x8f   : > { %v809_v4 = vpop.permute.xlu0 %808  ;;  %v817_v5 = vpop.permute.xlu1 %816 }
  0x90   : > { %814 = vst.msk [vmem:[#allocation2 + $0xc0] sm:$0xff] %vm781_vm0, %v809_v4  ;;  %822 = vst.msk [vmem:[#allocation2 + $0xf0] sm:$0xff] %vm781_vm0, %v817_v5 }
  0x93   : > { %v811_v6 = vpop.permute.xlu0 %810  ;;  %v785_v7 = vpop.permute.xlu1 %784 }
  0x94   : > { %815 = vst.msk [vmem:[#allocation2 + $0xd8] sm:$0xff] %vm781_vm0, %v811_v6  ;;  %790 = vst.msk [vmem:[#allocation2 + $0x30] sm:$0xff] %vm781_vm0, %v785_v7 }
  0x97   : > { %v819_v9 = vpop.permute.xlu0 %818  ;;  %v856_v10 = vld [vmem:[#allocation2 + $0xc0] sm:$0xff]  ;;  %v787_v11 = vpop.permute.xlu1 %786  ;;  %v858_v16 = vld [vmem:[#allocation2 + $0xf0] sm:$0xff] }
  0x98   : > { %823 = vst.msk [vmem:[#allocation2 + $0x108] sm:$0xff] %vm781_vm0, %v819_v9  ;;  %3715 = vmatprep.subr.bf16.mxu0 %v856_v10  ;;  %791 = vst.msk [vmem:[#allocation2 + $0x48] sm:$0xff] %vm781_vm0, %v787_v11 }
  0x99   : > { %3716 = vmatpush3.bf16.msra.mxu0 %v848_v8 }
  0x9b   : > { %v825_v13 = vpop.permute.xlu0 %824  ;;  %v857_v14 = vld [vmem:[#allocation2 + $0xd8] sm:$0xff]  ;;  %v793_v15 = vpop.permute.xlu1 %792  ;;  %v850_v17 = vld [vmem:[#allocation2 + $0x30] sm:$0xff] }
  0x9c   : > { %830 = vst.msk [vmem:[#allocation2 + $0x120] sm:$0xff] %vm781_vm0, %v825_v13  ;;  %3717 = vmatprep.subr.bf16.mxu0 %v857_v14  ;;  %798 = vst.msk [vmem:[#allocation2 + $0x60] sm:$0xff] %vm781_vm0, %v793_v15  ;;  %v4234_v15 = vmov 0  }
  0x9d   : > { %3718 = vmatpush3.bf16.msra.mxu0 %v849_v12  ;;  %4039 = vset.pattern.permute.xlu0 %v4234_v15 }
  0x9e   : > { %3719 = vmatprep.subr.bf16.mxu0 %v858_v16  ;;  %4038 = vset.pattern.permute.xlu1 %v4234_v15 }
  0x9f   : > { %v827_v18 = vpop.permute.xlu0 %826  ;;  %v795_v19 = vpop.permute.xlu1 %794  ;;  %v859_v20 = vld [vmem:[#allocation2 + $0x108] sm:$0xff] }
  0xa0   : > { %831 = vst.msk [vmem:[#allocation2 + $0x138] sm:$0xff] %vm781_vm0, %v827_v18  ;;  %799 = vst.msk [vmem:[#allocation2 + $0x78] sm:$0xff] %vm781_vm0, %v795_v19  ;;  %v851_v21 = vld [vmem:[#allocation2 + $0x48] sm:$0xff] }
  0xa1   : > { %3720 = vmatpush3.bf16.msra.mxu0 %v850_v17 }
  0xa2   : > { %3721 = vmatprep.subr.bf16.mxu0 %v859_v20 }
  0xa3   : > { %v833_v22 = vpop.permute.xlu0 %832  ;;  %v801_v23 = vpop.permute.xlu1 %800  ;;  %v860_v24 = vld [vmem:[#allocation2 + $0x120] sm:$0xff] }
  0xa4   : > { %838 = vst.msk [vmem:[#allocation2 + $0x150] sm:$0xff] %vm781_vm0, %v833_v22  ;;  %806 = vst.msk [vmem:[#allocation2 + $0x90] sm:$0xff] %vm781_vm0, %v801_v23  ;;  %v852_v25 = vld [vmem:[#allocation2 + $0x60] sm:$0xff] }
  0xa5   : > { %3722 = vmatpush3.bf16.msra.mxu0 %v851_v21 }
  0xa6   : > { %3723 = vmatprep.subr.bf16.mxu0 %v860_v24 }
  0xa7   : > { %v835_v26 = vpop.permute.xlu0 %834  ;;  %v803_v27 = vpop.permute.xlu1 %802  ;;  %v861_v28 = vld [vmem:[#allocation2 + $0x138] sm:$0xff] }
  0xa8   : > { %839 = vst.msk [vmem:[#allocation2 + $0x168] sm:$0xff] %vm781_vm0, %v835_v26  ;;  %807 = vst.msk [vmem:[#allocation2 + $0xa8] sm:$0xff] %vm781_vm0, %v803_v27  ;;  %v853_v29 = vld [vmem:[#allocation2 + $0x78] sm:$0xff] }
  0xa9   : > { %3724 = vmatpush3.bf16.msra.mxu0 %v852_v25 }
  0xaa   : > { %3725 = vmatprep.subr.bf16.mxu0 %v861_v28 }
  0xab   : > { %v841_v30 = vpop.permute.xlu0 %840  ;;  %v843_v31 = vpop.permute.xlu1 %842  ;;  %v862_v32 = vld [vmem:[#allocation2 + $0x150] sm:$0xff] }
  0xac   : > { %846 = vst.msk [vmem:[#allocation2 + $0x180] sm:$0xff] %vm781_vm0, %v841_v30  ;;  %847 = vst.msk [vmem:[#allocation2 + $0x198] sm:$0xff] %vm781_vm0, %v843_v31  ;;  %v854_v33 = vld [vmem:[#allocation2 + $0x90] sm:$0xff] }
  0xad   : > { %3726 = vmatpush3.bf16.msra.mxu0 %v853_v29 }
  0xae   : > { %3727 = vmatprep.subr.bf16.mxu0 %v862_v32 }
  0xaf   : > { %v863_v34 = vld [vmem:[#allocation2 + $0x168] sm:$0xff] }
  0xb0   : > { %v855_v35 = vld [vmem:[#allocation2 + $0xa8] sm:$0xff] }
  0xb1   : > { %3728 = vmatpush3.bf16.msra.mxu0 %v854_v33 }
  0xb2   : > { %3729 = vmatprep.subr.bf16.mxu0 %v863_v34 }
  0xb3   : > { %v864_v36 = vld [vmem:[#allocation2 + $0x180] sm:$0xff]  ;;  %v865_v37 = vld [vmem:[#allocation2 + $0x198] sm:$0xff] }
  0xb4   : > { %3849 = vmatprep.subr.bf16.mxu1 %v864_v36 }
  0xb5   : > { %3730 = vmatpush3.bf16.msra.mxu0 %v855_v35  ;;  %3850 = vmatpush3.bf16.msra.mxu1 %v864_v36 }
  0xb6   : > { %3851 = vmatprep.subr.bf16.mxu1 %v865_v37 }
  0xb8   : > { %944 = vmatmul.mubr.bf16.vlgmr.msra.gmra.mrb[0].mxu0 %v4062_v38 }
  0xb9   : > { %3852 = vmatpush3.bf16.msra.mxu1 %v865_v37  ;;  %951 = vmatprep.mubr.bf16.mxu0 %v4067_v39 }
  0xbc   : > { %3854 = vmatmul.mubr.msk.bf16.vlgmr.msra.gmra.mrb[0].mxu1 %vm904_vm1, %v4066_v40 }
  0xc0   : > { %952 = vmatmul.mubr.bf16.gmra.mrb[4].mxu0 %v4069_v41 }
 0x18b   : > { %v3731_v42 = vpop.f32.mrb[0].mxu0 }
 0x18c   : > { %v3732_v43 = vpop.f32.mrb[1].mxu0 }
 0x18d   : > { %v3733_v44 = vadd.f32 %v3732_v43, %v3731_v42  ;;  %v3734_v45 = vpop.f32.mrb[2].mxu0 }
 0x18e   : > { %v3735_v46 = vpop.f32.mrb[3].mxu0 }
 0x18f   : > { %v3736_v47 = vadd.f32 %v3735_v46, %v3734_v45  ;;  %v3855_v48 = vpop.f32.mrb[0].mxu1 }
 0x190   : > { %v994_v49 = vpop.f32.mrb[1].mxu1 }
 0x191   : > { %v4440_v51 = vadd.f32 %v3733_v44, %v994_v49  ;;  %v3856_v52 = vpop.f32.mrb[2].mxu1  ;;  %v753_v49 = vld [vmem:[%s4474_s29] sm:$0xff] }
 0x192   : > { %v997_v53 = vpop.f32.mrb[3].mxu1 }
 0x193   : > { %v4442_v54 = vadd.f32 %v3736_v47, %v997_v53  ;;  %v3737_v55 = vpop.f32.mrb[4].mxu0  ;;  %v1016_v56 = vmul.f32 %v4438_v50, %v4440_v51  ;;  %v754_v47 = vld [vmem:[%s4474_s29 + $0x8] sm:$0xff] }
 0x194   : > { %v3738_v57 = vpop.f32.mrb[5].mxu0 }
 0x195   : > { %v3739_v58 = vadd.f32 %v3738_v57, %v3737_v55  ;;  %v3740_v59 = vpop.f32.mrb[6].mxu0  ;;  %v1020_v60 = vsel %vm781_vm0, %v1016_v56, 0.0  ;;  %v1017_v61 = vmul.f32 %v4438_v50, %v4442_v54  ;;  %v1036_v63 = vmul.f32 %v1016_v56, %v4440_v51  ;;  %v757_v57 = vld [vmem:[%s4474_s29 + $0x20] sm:$0xff] }
 0x196   : > { %v3741_v62 = vpop.f32.mrb[7].mxu0  ;;  %1021 = vadd.xlane.f32.xlu0 %v1020_v60 }
 0x197   : > { %v4450_v0 = vadd.f32 %v3855_v48, %v3739_v58  ;;  %v3742_v1 = vadd.f32 %v3741_v62, %v3740_v59  ;;  %v1023_v2 = vsel %vm781_vm0, %v1017_v61, 0.0  ;;  %v1037_v3 = vmul.f32 %v1017_v61, %v4442_v54  ;;  %v758_v61 = vld [vmem:[%s4474_s29 + $0x28] sm:$0xff] }
 0x198   : > { %1024 = vadd.xlane.f32.xlu1 %v1023_v2  ;;  %v1040_v7 = vsel %vm781_vm0, %v1036_v63, 0.0 }
 0x199   : > { %v4454_v4 = vadd.f32 %v3856_v52, %v3742_v1  ;;  %v1043_v5 = vsel %vm781_vm0, %v1037_v3, 0.0  ;;  %v1018_v6 = vmul.f32 %v4438_v50, %v4450_v0  ;;  %v755_v1 = vld [vmem:[%s4474_s29 + $0x10] sm:$0xff] }
 0x19a   : > { %1044 = vadd.xlane.f32.xlu0 %v1043_v5  ;;  %v756_v5 = vld [vmem:[%s4474_s29 + $0x18] sm:$0xff] }
 0x19b   : > { %v1038_v8 = vmul.f32 %v1018_v6, %v4450_v0  ;;  %v1026_v9 = vsel %vm781_vm0, %v1018_v6, 0.0  ;;  %v1019_v10 = vmul.f32 %v4438_v50, %v4454_v4 }
 0x19c   : > { %1041 = vadd.xlane.f32.xlu1 %v1040_v7 }
 0x19d   : > { %v1046_v11 = vsel %vm781_vm0, %v1038_v8, 0.0  ;;  %v1029_v12 = vsel %vm781_vm0, %v1019_v10, 0.0  ;;  %v1039_v13 = vmul.f32 %v1019_v10, %v4454_v4  ;;  %v759_v8 = vld [vmem:[%s4474_s29 + $0x30] sm:$0xff] }
 0x19e   : > { %1027 = vadd.xlane.f32.xlu0 %v1026_v9 }
 0x19f   : > { %v1049_v14 = vsel %vm781_vm0, %v1039_v13, 0.0 }
 0x1a0   : > { %1047 = vadd.xlane.f32.xlu1 %v1046_v11  ;;  %v760_v11 = vld [vmem:[%s4474_s29 + $0x38] sm:$0xff] }
 0x1a2   : > { %1030 = vadd.xlane.f32.xlu0 %v1029_v12  ;;  %v4070_v12 = vld [vmem:[%s5375_s17] sm:$0xff]  }
 0x1a3   : > { %3857 = vmatprep.subr.bf16.mxu1 %v4070_v12 }
 0x1a4   : > { %3858 = vmatpush3.bf16.msra.mxu1 %v4070_v12 }
 0x1a6   : > { %1050 = vadd.xlane.f32.xlu0 %v1049_v14  ;;  %v4071_v14 = vld [vmem:[%s5375_s17 + $0x8] ss:$0 sps:$4 sm:$0x77]  }
 0x1a7   : > { %4005 = vmatprep.subr.msk.bf16.mxu1 %vm1160_vm2, %v4071_v14 }
 0x223   : > { %v1022_v16 = vpop.xlane.xlu0 %1021 }
 0x224   : > { %v1032_v18 = vmul.f32 0.0625, %v1022_v16  ;;  %v1162_v16 = vsel %vm1160_vm2, %v4071_v14, 0 }
 0x225   : > { %v1025_v17 = vpop.xlane.xlu1 %1024  ;;  %3860 = vmatpush3.bf16.msra.mxu1 %v1162_v16 }
 0x226   : > { %v1033_v19 = vmul.f32 0.0625, %v1025_v17  ;;  %v1056_v24 = vmul.f32 %v1032_v18, %v1032_v18 }
 0x227   : > { %v1045_v20 = vpop.xlane.xlu0 %1044 }
 0x228   : > { %v1057_v21 = vmul.f32 %v1033_v19, %v1033_v19  ;;  %v1053_v22 = vmul.f32 0.0625, %v1045_v20 }
 0x229   : > { %v1042_v23 = vpop.xlane.xlu1 %1041 }
 0x22a   : > { %v1061_v25 = vsub.f32 %v1053_v22, %v1057_v21  ;;  %v1052_v26 = vmul.f32 0.0625, %v1042_v23 }
 0x22b   : > { %v1028_v27 = vpop.xlane.xlu0 %1027 }
 0x22c   : > { %v1065_v28 = vmax.f32 %v1061_v25, 0.0  ;;  %v1060_v29 = vsub.f32 %v1052_v26, %v1056_v24  ;;  %v1034_v30 = vmul.f32 0.0625, %v1028_v27 }
 0x22d   : > { %v1048_v31 = vpop.xlane.xlu1 %1047 }
 0x22e   : > { %v1069_v32 = vadd.f32 1e-05, %v1065_v28  ;;  %v1064_v33 = vmax.f32 %v1060_v29, 0.0  ;;  %v1058_v34 = vmul.f32 %v1034_v30, %v1034_v30  ;;  %v1054_v35 = vmul.f32 0.0625, %v1048_v31 }
 0x22f   : > { %v1031_v36 = vpop.xlane.xlu0 %1030 }
 0x230   : > { %4182 = vrsqrt.f32 %v1069_v32  ;;  %v1068_v37 = vadd.f32 1e-05, %v1064_v33  ;;  %v1062_v38 = vsub.f32 %v1054_v35, %v1058_v34  ;;  %v1035_v39 = vmul.f32 0.0625, %v1031_v36 }
 0x232   : > { %4184 = vrsqrt.f32 %v1068_v37  ;;  %v1066_v41 = vmax.f32 %v1062_v38, 0.0  ;;  %v1059_v42 = vmul.f32 %v1035_v39, %v1035_v39 }
 0x233   : > { %v1051_v40 = vpop.xlane.xlu0 %1050 }
 0x234   : > { %v1055_v43 = vmul.f32 0.0625, %v1051_v40  ;;  %v1070_v45 = vadd.f32 1e-05, %v1066_v41 }
 0x236   : > { %v1063_v44 = vsub.f32 %v1055_v43, %v1059_v42  ;;  %4186 = vrsqrt.f32 %v1070_v45 }
 0x238   : > { %v1067_v46 = vmax.f32 %v1063_v44, 0.0 }
 0x23a   : > { %v4183_v48 = vpop.eup %4182  ;;  %v1071_v55 = vadd.f32 1e-05, %v1067_v46 }
 0x23b   : > { %v1077_v52 = vmul.f32 %v4183_v48, %v754_v47 }
 0x23c   : > { %v4185_v53 = vpop.eup %4184  ;;  %4188 = vrsqrt.f32 %v1071_v55 }
 0x23d   : > { %1087 = vperm.xlu0 %4039, %v1077_v52   ;;  %v1076_v56 = vmul.f32 %v4185_v53, %v753_v49  ;;  %v1105_v60 = vmul.f32 %v1077_v52, %v1033_v19 }
 0x23f   : > { %1082 = vperm.xlu1 %4038, %v1076_v56   ;;  %v1104_v58 = vmul.f32 %v1076_v56, %v1032_v18  ;;  %v1109_v62 = vsub.f32 %v758_v61, %v1105_v60 }
 0x240   : > { %v4187_v63 = vpop.eup %4186 }
 0x241   : > { %v1108_v59 = vsub.f32 %v757_v57, %v1104_v58  ;;  %v1078_v2 = vmul.f32 %v4187_v63, %v755_v1 }
 0x243   : > { %1114 = vperm.xlu1 %4038, %v1108_v59   ;;  %v1106_v7 = vmul.f32 %v1078_v2, %v1034_v30 }
 0x245   : > { %v1110_v9 = vsub.f32 %v759_v8, %v1106_v7 }
 0x246   : > { %v4189_v3 = vpop.eup %4188 }
 0x247   : > { %1119 = vperm.xlu1 %4038, %v1109_v62   ;;  %v1079_v6 = vmul.f32 %v4189_v3, %v756_v5 }
 0x249   : > { %v1107_v10 = vmul.f32 %v1079_v6, %v1035_v39 }
 0x24b   : > { %1092 = vperm.xlu1 %4038, %v1078_v2   ;;  %v1111_v13 = vsub.f32 %v760_v11, %v1107_v10 }
 0x24f   : > { %1097 = vperm.xlu1 %4038, %v1079_v6  }
 0x253   : > { %1124 = vperm.xlu1 %4038, %v1110_v9  }
 0x257   : > { %1129 = vperm.xlu1 %4038, %v1111_v13  }
 0x2bc   : > { %v1088_v18 = vpop.permute.xlu0 %1087 }
 0x2bd   : > { %v1101_v21 = vmul.f32 %v1088_v18, %v4442_v54  ;;  %v4072_v18 = vld [vmem:[%s5381_s24] ss:$12 sps:$4 sm:$0xff]  }
 0x2be   : > { %v1083_v17 = vpop.permute.xlu1 %1082 }
 0x2bf   : > { %v1100_v20 = vmul.f32 %v1083_v17, %v4440_v51 }
 0x2c2   : > { %v1115_v19 = vpop.permute.xlu1 %1114 }
 0x2c3   : > { %v1132_v22 = vadd.f32 %v1115_v19, %v1100_v20  ;;  %v4077_v19 = vld [vmem:[%s5381_s24 + $0x1c] ss:$12 sps:$4 sm:$0xff]  }
 0x2c5   : > { %v1136_v25 = vmax.f32 %v1132_v22, 0.0  ;;  %v4079_v22 = vld [vmem:[%s5381_s24 + $0x18] ss:$12 sps:$4 sm:$0xff]  }
 0x2c6   : > { %v1120_v23 = vpop.permute.xlu1 %1119 }
 0x2c7   : > { %v1133_v24 = vadd.f32 %v1120_v23, %v1101_v21  ;;  %v4076_v21 = vld [vmem:[%s5381_s24 + $0x20] ss:$12 sps:$4 sm:$0xff]  }
 0x2c9   : > { %v1137_v26 = vmax.f32 %v1133_v24, 0.0 }
 0x2ca   : > { %v1093_v27 = vpop.permute.xlu1 %1092 }
 0x2cb   : > { %v1140_v28 = vpack.c.bf16 %v1137_v26, %v1136_v25  ;;  %v1102_v31 = vmul.f32 %v1093_v27, %v4450_v0  ;;  %v4074_v0 = vld [vmem:[%s5381_s24 + $0x4] ss:$12 sps:$4 sm:$0xff]  }
 0x2cc   : > { %1377 = vmatprep.mubr.bf16.mxu0 %v4074_v0 }
 0x2cd   : > { %3861 = vmatprep.mubr.msk.bf16.mxu1 %vm781_vm0, %v1140_v28 }
 0x2ce   : > { %v1098_v29 = vpop.permute.xlu1 %1097 }
 0x2cf   : > { %v1103_v32 = vmul.f32 %v1098_v29, %v4454_v4  ;;  %v4075_v4 = vld [vmem:[%s5381_s24 + $0x8] ss:$12 sps:$4 sm:$0xff]  }
 0x2d2   : > { %v1125_v30 = vpop.permute.xlu1 %1124 }
 0x2d3   : > { %v1134_v33 = vadd.f32 %v1125_v30, %v1102_v31 }
 0x2d5   : > { %v1138_v35 = vmax.f32 %v1134_v33, 0.0 }
 0x2d6   : > { %v1130_v34 = vpop.permute.xlu1 %1129 }
 0x2d7   : > { %v1135_v51 = vadd.f32 %v1130_v34, %v1103_v32 }
 0x2d9   : > { %v1139_v54 = vmax.f32 %v1135_v51, 0.0 }
 0x2db   : > { %v1141_v36 = vpack.c.bf16 %v1139_v54, %v1138_v35 }
 0x2dd   : > { %3862 = vmatmul.mubr.msk.bf16.vlgmr.msra.gmra.mrb[4].mxu1 %vm781_vm0, %v1141_v36 }
 0x2de   : > { %3869 = vmatprep.mubr.msk.bf16.mxu1 %vm904_vm1, %v4075_v4 }
 0x3b0   : > { %v3863_v37 = vpop.f32.mrb[4].mxu1 }
 0x3b1   : > { %v1198_v38 = vpop.f32.mrb[5].mxu1 }
 0x3b2   : > { %v3864_v39 = vpop.f32.mrb[6].mxu1 }
 0x3b3   : > { %v1214_v40 = vpack.c.bf16 %v3864_v39, %v3863_v37  ;;  %v1201_v41 = vpop.f32.mrb[7].mxu1 }
 0x3b4   : > { %v1213_v42 = vpack.c.bf16 %v1201_v41, %v1198_v38 }
 0x3b5   : > { %1216 = vst.msk [vmem:[#allocation2 + $0x18] sm:$0xff] %vm781_vm0, %v1214_v40 }
 0x3b6   : > { %1215 = vst.msk [vmem:[#allocation2] sm:$0xff] %vm781_vm0, %v1213_v42  ;;  %1251 = vrot.lane.b32.xlu0 %v1213_v42, %s4227_s5  ;;  %1243 = vrot.lane.b32.xlu1 %v1213_v42, %s5342_s1 }
 0x3ba   : > { %1253 = vrot.lane.b32.xlu0 %v1214_v40, %s4227_s5  ;;  %1245 = vrot.lane.b32.xlu1 %v1214_v40, %s5342_s1  ;;  %s5380_s5 = smov 122   ;;  %s5348_s1 = sshll.u32 %s5399_s28, 3 }
 0x3bc   : > { %v1284_v57 = vld [vmem:[#allocation2 + $0x18] sm:$0xff] }
 0x3bd   : > { %v1283_v52 = vld [vmem:[#allocation2] sm:$0xff] }
 0x3be   : > { %1259 = vrot.lane.b32.xlu0 %v1213_v42, %s5340_s6  ;;  %1219 = vrot.lane.b32.xlu1 %v1213_v42, %s5376_s26 }
 0x3c2   : > { %1261 = vrot.lane.b32.xlu0 %v1214_v40, %s5340_s6  ;;  %1221 = vrot.lane.b32.xlu1 %v1214_v40, %s5376_s26  ;;  %s5383_s6 = smov 121  }
 0x3c6   : > { %1267 = vrot.lane.b32.xlu0 %v1213_v42, %s5377_s4  ;;  %1227 = vrot.lane.b32.xlu1 %v1213_v42, %s5378_s27 }
 0x3ca   : > { %1269 = vrot.lane.b32.xlu0 %v1214_v40, %s5377_s4  ;;  %1229 = vrot.lane.b32.xlu1 %v1214_v40, %s5378_s27  ;;  %s5385_s4 = sld [smem:[#allocation9_spill]] }
 0x3ce   : > { %1275 = vrot.lane.b32.xlu0 %v1213_v42, %s5379_s0  ;;  %1235 = vrot.lane.b32.xlu1 %v1213_v42, %s5380_s5 }
 0x3d2   : > { %1237 = vrot.lane.b32.xlu1 %v1214_v40, %s5380_s5  ;;  %s5344_s5 = smov 108  }
 0x3d6   : > { %1277 = vrot.lane.b32.xlu1 %v1214_v40, %s5379_s0  ;;  %s5355_s0 = smov 110  }
 0x428   : > { %v1252_v43 = vpop.permute.xlu0 %1251  ;;  %v1244_v44 = vpop.permute.xlu1 %1243 }
 0x429   : > { %1257 = vst.msk [vmem:[#allocation2 + $0xf0] sm:$0xff] %vm781_vm0, %v1252_v43  ;;  %1249 = vst.msk [vmem:[#allocation2 + $0xc0] sm:$0xff] %vm781_vm0, %v1244_v44 }
 0x42c   : > { %v1254_v45 = vpop.permute.xlu0 %1253  ;;  %v1246_v46 = vpop.permute.xlu1 %1245 }
 0x42d   : > { %1258 = vst.msk [vmem:[#allocation2 + $0x108] sm:$0xff] %vm781_vm0, %v1254_v45  ;;  %1250 = vst.msk [vmem:[#allocation2 + $0xd8] sm:$0xff] %vm781_vm0, %v1246_v46 }
 0x430   : > { %v1260_v47 = vpop.permute.xlu0 %1259  ;;  %v1220_v48 = vpop.permute.xlu1 %1219  ;;  %v1291_v49 = vld [vmem:[#allocation2 + $0xc0] sm:$0xff]  ;;  %v1293_v58 = vld [vmem:[#allocation2 + $0xf0] sm:$0xff] }
 0x431   : > { %1265 = vst.msk [vmem:[#allocation2 + $0x120] sm:$0xff] %vm781_vm0, %v1260_v47  ;;  %1225 = vst.msk [vmem:[#allocation2 + $0x30] sm:$0xff] %vm781_vm0, %v1220_v48  ;;  %3751 = vmatprep.subr.bf16.mxu0 %v1291_v49 }
 0x432   : > { %3752 = vmatpush3.bf16.msra.mxu0 %v1283_v52 }
 0x434   : > { %v1262_v53 = vpop.permute.xlu0 %1261  ;;  %v1222_v55 = vpop.permute.xlu1 %1221  ;;  %v1292_v56 = vld [vmem:[#allocation2 + $0xd8] sm:$0xff]  ;;  %v1294_v62 = vld [vmem:[#allocation2 + $0x108] sm:$0xff] }
 0x435   : > { %1266 = vst.msk [vmem:[#allocation2 + $0x138] sm:$0xff] %vm781_vm0, %v1262_v53  ;;  %1226 = vst.msk [vmem:[#allocation2 + $0x48] sm:$0xff] %vm781_vm0, %v1222_v55  ;;  %3753 = vmatprep.subr.bf16.mxu0 %v1292_v56 }
 0x436   : > { %3754 = vmatpush3.bf16.msra.mxu0 %v1284_v57 }
 0x437   : > { %3755 = vmatprep.subr.bf16.mxu0 %v1293_v58 }
 0x438   : > { %v1268_v59 = vpop.permute.xlu0 %1267  ;;  %v1228_v60 = vpop.permute.xlu1 %1227  ;;  %v1285_v61 = vld [vmem:[#allocation2 + $0x30] sm:$0xff]  ;;  %v1295_v3 = vld [vmem:[#allocation2 + $0x120] sm:$0xff] }
 0x439   : > { %1273 = vst.msk [vmem:[#allocation2 + $0x150] sm:$0xff] %vm781_vm0, %v1268_v59  ;;  %1233 = vst.msk [vmem:[#allocation2 + $0x60] sm:$0xff] %vm781_vm0, %v1228_v60 }
 0x43a   : > { %3756 = vmatpush3.bf16.msra.mxu0 %v1285_v61 }
 0x43b   : > { %3757 = vmatprep.subr.bf16.mxu0 %v1294_v62 }
 0x43c   : > { %v1270_v63 = vpop.permute.xlu0 %1269  ;;  %v1230_v1 = vpop.permute.xlu1 %1229  ;;  %v1286_v2 = vld [vmem:[#allocation2 + $0x48] sm:$0xff]  ;;  %v1296_v8 = vld [vmem:[#allocation2 + $0x138] sm:$0xff] }
 0x43d   : > { %1274 = vst.msk [vmem:[#allocation2 + $0x168] sm:$0xff] %vm781_vm0, %v1270_v63  ;;  %1234 = vst.msk [vmem:[#allocation2 + $0x78] sm:$0xff] %vm781_vm0, %v1230_v1 }
 0x43e   : > { %3758 = vmatpush3.bf16.msra.mxu0 %v1286_v2 }
 0x43f   : > { %3759 = vmatprep.subr.bf16.mxu0 %v1295_v3 }
 0x440   : > { %v1276_v5 = vpop.permute.xlu0 %1275  ;;  %v1236_v6 = vpop.permute.xlu1 %1235  ;;  %v1287_v7 = vld [vmem:[#allocation2 + $0x60] sm:$0xff]  ;;  %v1297_v11 = vld [vmem:[#allocation2 + $0x150] sm:$0xff] }
 0x441   : > { %1281 = vst.msk [vmem:[#allocation2 + $0x180] sm:$0xff] %vm781_vm0, %v1276_v5  ;;  %1241 = vst.msk [vmem:[#allocation2 + $0x90] sm:$0xff] %vm781_vm0, %v1236_v6 }
 0x442   : > { %3760 = vmatpush3.bf16.msra.mxu0 %v1287_v7 }
 0x443   : > { %3761 = vmatprep.subr.bf16.mxu0 %v1296_v8 }
 0x444   : > { %v1238_v9 = vpop.permute.xlu1 %1237  ;;  %v1288_v10 = vld [vmem:[#allocation2 + $0x78] sm:$0xff]  ;;  %v1298_v16 = vld [vmem:[#allocation2 + $0x168] sm:$0xff] }
 0x445   : > { %1242 = vst.msk [vmem:[#allocation2 + $0xa8] sm:$0xff] %vm781_vm0, %v1238_v9 }
 0x446   : > { %3762 = vmatpush3.bf16.msra.mxu0 %v1288_v10 }
 0x447   : > { %3763 = vmatprep.subr.bf16.mxu0 %v1297_v11 }
 0x448   : > { %v1278_v12 = vpop.permute.xlu1 %1277  ;;  %v1299_v13 = vld [vmem:[#allocation2 + $0x180] sm:$0xff]  ;;  %v1289_v14 = vld [vmem:[#allocation2 + $0x90] sm:$0xff] }
 0x449   : > { %1282 = vst.msk [vmem:[#allocation2 + $0x198] sm:$0xff] %vm781_vm0, %v1278_v12  ;;  %3865 = vmatprep.subr.bf16.mxu1 %v1299_v13 }
 0x44a   : > { %3764 = vmatpush3.bf16.msra.mxu0 %v1289_v14  ;;  %3866 = vmatpush3.bf16.msra.mxu1 %v1299_v13 }
 0x44b   : > { %3765 = vmatprep.subr.bf16.mxu0 %v1298_v16 }
 0x44c   : > { %v1290_v17 = vld [vmem:[#allocation2 + $0xa8] sm:$0xff] }
 0x44e   : > { %3766 = vmatpush3.bf16.msra.mxu0 %v1290_v17 }
 0x450   : > { %v1300_v20 = vld [vmem:[#allocation2 + $0x198] sm:$0xff] }
 0x451   : > { %1378 = vmatmul.mubr.bf16.vlgmr.msra.gmra.mrb[8].mxu0 %v4072_v18  ;;  %3867 = vmatprep.subr.bf16.mxu1 %v1300_v20 }
 0x452   : > { %3868 = vmatpush3.bf16.msra.mxu1 %v1300_v20  ;;  %1385 = vmatprep.mubr.bf16.mxu0 %v4077_v19 }
 0x455   : > { %3870 = vmatmul.mubr.msk.bf16.vlgmr.msra.gmra.mrb[8].mxu1 %vm904_vm1, %v4076_v21 }
 0x459   : > { %1386 = vmatmul.mubr.bf16.gmra.mrb[12].mxu0 %v4079_v22 }
 0x524   : > { %v3767_v23 = vpop.f32.mrb[8].mxu0 }
 0x525   : > { %v3768_v24 = vpop.f32.mrb[9].mxu0 }
 0x526   : > { %v3769_v25 = vadd.f32 %v3768_v24, %v3767_v23  ;;  %v3770_v26 = vpop.f32.mrb[10].mxu0 }
 0x527   : > { %v3771_v27 = vpop.f32.mrb[11].mxu0 }
 0x528   : > { %v3772_v28 = vadd.f32 %v3771_v27, %v3770_v26  ;;  %v3871_v29 = vpop.f32.mrb[8].mxu1  ;;  %v762_v27 = vld [vmem:[%s4474_s29 + $0x48] sm:$0xff] }
 0x529   : > { %v1428_v30 = vpop.f32.mrb[9].mxu1 }
 0x52a   : > { %v4552_v31 = vadd.f32 %v3769_v25, %v1428_v30  ;;  %v3872_v32 = vpop.f32.mrb[10].mxu1  ;;  %v761_v30 = vld [vmem:[%s4474_s29 + $0x40] sm:$0xff] }
 0x52b   : > { %v1431_v33 = vpop.f32.mrb[11].mxu1 }
 0x52c   : > { %v4554_v34 = vadd.f32 %v3772_v28, %v1431_v33  ;;  %v3773_v51 = vpop.f32.mrb[12].mxu0  ;;  %v1450_v35 = vmul.f32 %v4438_v50, %v4552_v31 }
 0x52d   : > { %v3774_v54 = vpop.f32.mrb[13].mxu0 }
 0x52e   : > { %v3775_v36 = vadd.f32 %v3774_v54, %v3773_v51  ;;  %v3776_v37 = vpop.f32.mrb[14].mxu0  ;;  %v1454_v38 = vsel %vm781_vm0, %v1450_v35, 0.0  ;;  %v1451_v39 = vmul.f32 %v4438_v50, %v4554_v34  ;;  %v1470_v41 = vmul.f32 %v1450_v35, %v4552_v31  ;;  %v765_v54 = vld [vmem:[%s4474_s29 + $0x60] sm:$0xff] }
 0x52f   : > { %v3777_v40 = vpop.f32.mrb[15].mxu0  ;;  %1455 = vadd.xlane.f32.xlu0 %v1454_v38 }
 0x530   : > { %v4562_v42 = vadd.f32 %v3871_v29, %v3775_v36  ;;  %v3778_v0 = vadd.f32 %v3777_v40, %v3776_v37  ;;  %v1457_v4 = vsel %vm781_vm0, %v1451_v39, 0.0  ;;  %v1471_v43 = vmul.f32 %v1451_v39, %v4554_v34  ;;  %v766_v36 = vld [vmem:[%s4474_s29 + $0x68] sm:$0xff]  ;;  %v763_v37 = vld [vmem:[%s4474_s29 + $0x50] sm:$0xff] }
 0x531   : > { %1458 = vadd.xlane.f32.xlu1 %v1457_v4  ;;  %v1474_v47 = vsel %vm781_vm0, %v1470_v41, 0.0  ;;  %v767_v4 = vld [vmem:[%s4474_s29 + $0x70] sm:$0xff] }
 0x532   : > { %v4566_v44 = vadd.f32 %v3872_v32, %v3778_v0  ;;  %v1477_v45 = vsel %vm781_vm0, %v1471_v43, 0.0  ;;  %v1452_v46 = vmul.f32 %v4438_v50, %v4562_v42 }
 0x533   : > { %1478 = vadd.xlane.f32.xlu0 %v1477_v45  ;;  %v4210_v45 = vld [vmem:[%s4377_s23] sm:$0xff]  }
 0x534   : > { %v1472_v48 = vmul.f32 %v1452_v46, %v4562_v42  ;;  %v1460_v49 = vsel %vm781_vm0, %v1452_v46, 0.0  ;;  %v1453_v52 = vmul.f32 %v4438_v50, %v4566_v44  ;;  %v1570_v46 = vunpack.c.l.bf16 %v4210_v45 }
 0x535   : > { %1475 = vadd.xlane.f32.xlu1 %v1474_v47  ;;  %v1571_v47 = vunpack.c.h.bf16 %v4210_v45 }
 0x536   : > { %v1480_v53 = vsel %vm781_vm0, %v1472_v48, 0.0  ;;  %v1463_v55 = vsel %vm781_vm0, %v1453_v52, 0.0  ;;  %v1473_v56 = vmul.f32 %v1453_v52, %v4566_v44  ;;  %v764_v48 = vld [vmem:[%s4474_s29 + $0x58] sm:$0xff] }
 0x537   : > { %1461 = vadd.xlane.f32.xlu0 %v1460_v49 }
 0x538   : > { %v1483_v57 = vsel %vm781_vm0, %v1473_v56, 0.0 }
 0x539   : > { %1481 = vadd.xlane.f32.xlu1 %v1480_v53 }
 0x53b   : > { %1464 = vadd.xlane.f32.xlu0 %v1463_v55  ;;  %v4040_v55 = vpack.i.bf16 %v1571_v47, %v1570_v46 }
 0x53f   : > { %1484 = vadd.xlane.f32.xlu0 %v1483_v57  ;;  %v4080_v57 = vld [vmem:[%s5382_s18] sm:$0xff]  }
 0x540   : > { %3873 = vmatprep.subr.bf16.mxu0 %v4080_v57 }
 0x541   : > { %3874 = vmatpush3.bf16.msra.mxu0 %v4080_v57 }
 0x5bc   : > { %v1456_v58 = vpop.xlane.xlu0 %1455 }
 0x5bd   : > { %v1466_v60 = vmul.f32 0.0625, %v1456_v58  ;;  %v768_v58 = vld [vmem:[%s4474_s29 + $0x78] sm:$0xff]  ;;  %s5384_s29 = smov 116  }
 0x5be   : > { %v1459_v59 = vpop.xlane.xlu1 %1458 }
 0x5bf   : > { %v1467_v61 = vmul.f32 0.0625, %v1459_v59  ;;  %v1490_v2 = vmul.f32 %v1466_v60, %v1466_v60  ;;  %v4211_v59 = vld [vmem:[%s4377_s23 + $0x8] sm:$0xff]   ;;  %s5346_s23 = smov 117  }
 0x5c0   : > { %v1479_v62 = vpop.xlane.xlu0 %1478 }
 0x5c1   : > { %v1491_v63 = vmul.f32 %v1467_v61, %v1467_v61  ;;  %v1487_v1 = vmul.f32 0.0625, %v1479_v62 }
 0x5c2   : > { %v1476_v50 = vpop.xlane.xlu1 %1475 }
 0x5c3   : > { %v1495_v3 = vsub.f32 %v1487_v1, %v1491_v63  ;;  %v1486_v5 = vmul.f32 0.0625, %v1476_v50  ;;  %v4081_v1 = vld [vmem:[%s5382_s18 + $0x8] ss:$0 sps:$4 sm:$0x77]   ;;  %s5392_s18 = smov 109  }
 0x5c4   : > { %v1462_v6 = vpop.xlane.xlu0 %1461  ;;  %4006 = vmatprep.subr.msk.bf16.mxu0 %vm1160_vm2, %v4081_v1  ;;  %v1615_v50 = vsel %vm1160_vm2, %v4081_v1, 0  ;;  %vm3159_vm2 = vcmask 1043456  }
 0x5c5   : > { %v1499_v7 = vmax.f32 %v1495_v3, 0.0  ;;  %v1494_v8 = vsub.f32 %v1486_v5, %v1490_v2  ;;  %v1468_v9 = vmul.f32 0.0625, %v1462_v6  ;;  %3876 = vmatpush3.bf16.msra.mxu0 %v1615_v50 }
 0x5c6   : > { %v1482_v10 = vpop.xlane.xlu1 %1481 }
 0x5c7   : > { %v1503_v11 = vadd.f32 1e-05, %v1499_v7  ;;  %v1498_v12 = vmax.f32 %v1494_v8, 0.0  ;;  %v1492_v13 = vmul.f32 %v1468_v9, %v1468_v9  ;;  %v1488_v14 = vmul.f32 0.0625, %v1482_v10 }
 0x5c8   : > { %v1465_v16 = vpop.xlane.xlu0 %1464 }
 0x5c9   : > { %4190 = vrsqrt.f32 %v1503_v11  ;;  %v1502_v17 = vadd.f32 1e-05, %v1498_v12  ;;  %v1496_v18 = vsub.f32 %v1488_v14, %v1492_v13  ;;  %v1469_v19 = vmul.f32 0.0625, %v1465_v16 }
 0x5cb   : > { %4192 = vrsqrt.f32 %v1502_v17  ;;  %v1500_v20 = vmax.f32 %v1496_v18, 0.0  ;;  %v1493_v23 = vmul.f32 %v1469_v19, %v1469_v19 }
 0x5cc   : > { %v1485_v21 = vpop.xlane.xlu0 %1484 }
 0x5cd   : > { %v1504_v22 = vadd.f32 1e-05, %v1500_v20  ;;  %v1489_v24 = vmul.f32 0.0625, %v1485_v21 }
 0x5cf   : > { %4194 = vrsqrt.f32 %v1504_v22  ;;  %v1497_v25 = vsub.f32 %v1489_v24, %v1493_v23 }
 0x5d1   : > { %v1501_v26 = vmax.f32 %v1497_v25, 0.0 }
 0x5d3   : > { %v4191_v28 = vpop.eup %4190  ;;  %v1505_v29 = vadd.f32 1e-05, %v1501_v26 }
 0x5d4   : > { %v1511_v32 = vmul.f32 %v4191_v28, %v762_v27 }
 0x5d5   : > { %v4193_v33 = vpop.eup %4192  ;;  %4196 = vrsqrt.f32 %v1505_v29 }
 0x5d6   : > { %1521 = vperm.xlu0 %4039, %v1511_v32   ;;  %v1510_v51 = vmul.f32 %v4193_v33, %v761_v30  ;;  %v1539_v35 = vmul.f32 %v1511_v32, %v1467_v61  ;;  %v1573_v61 = vunpack.c.h.bf16 %v4211_v59  ;;  %v4084_v32 = vld [vmem:[%s5385_s4 + $0x4] ss:$12 sps:$4 sm:$0xff]  }
 0x5d7   : > { %1809 = vmatprep.mubr.bf16.mxu1 %v4084_v32 }
 0x5d8   : > { %1516 = vperm.xlu1 %4038, %v1510_v51   ;;  %v1538_v38 = vmul.f32 %v1510_v51, %v1466_v60  ;;  %v1543_v41 = vsub.f32 %v766_v36, %v1539_v35  ;;  %v1572_v60 = vunpack.c.l.bf16 %v4211_v59 }
 0x5d9   : > { %v4195_v39 = vpop.eup %4194 }
 0x5da   : > { %v1542_v40 = vsub.f32 %v765_v54, %v1538_v38  ;;  %v1512_v0 = vmul.f32 %v4195_v39, %v763_v37  ;;  %v4045_v63 = vpack.i.bf16 %v1573_v61, %v1572_v60 }
 0x5dc   : > { %1548 = vperm.xlu0 %4039, %v1542_v40   ;;  %1553 = vperm.xlu1 %4038, %v1543_v41   ;;  %v1540_v43 = vmul.f32 %v1512_v0, %v1468_v9 }
 0x5de   : > { %v1544_v49 = vsub.f32 %v767_v4, %v1540_v43 }
 0x5df   : > { %v4197_v52 = vpop.eup %4196 }
 0x5e0   : > { %1526 = vperm.xlu1 %4038, %v1512_v0   ;;  %1558 = vperm.xlu0 %4039, %v1544_v49   ;;  %v1513_v53 = vmul.f32 %v4197_v52, %v764_v48 }
 0x5e2   : > { %v1541_v56 = vmul.f32 %v1513_v53, %v1469_v19 }
 0x5e4   : > { %1531 = vperm.xlu1 %4038, %v1513_v53   ;;  %4041 = vrot.lane.b32.xlu0 %v4040_v55, %s5383_s6  ;;  %v1545_v62 = vsub.f32 %v768_v58, %v1541_v56 }
 0x5e8   : > { %1563 = vperm.xlu1 %4038, %v1545_v62  }
 0x5ec   : > { %4046 = vrot.lane.b32.xlu1 %v4045_v63, %s5383_s6 }
 0x655   : > { %v1522_v2 = vpop.permute.xlu0 %1521 }
 0x656   : > { %v1535_v9 = vmul.f32 %v1522_v2, %v4554_v34 }
 0x657   : > { %v1517_v3 = vpop.permute.xlu1 %1516 }
 0x658   : > { %v1534_v10 = vmul.f32 %v1517_v3, %v4552_v31 }
 0x65b   : > { %v1554_v5 = vpop.permute.xlu1 %1553  ;;  %v1549_v6 = vpop.permute.xlu0 %1548 }
 0x65c   : > { %v1567_v13 = vadd.f32 %v1554_v5, %v1535_v9  ;;  %v1566_v14 = vadd.f32 %v1549_v6, %v1534_v10  ;;  %v4085_v5 = vld [vmem:[%s5385_s4 + $0x8] ss:$12 sps:$4 sm:$0xff]  }
 0x65f   : > { %v1527_v7 = vpop.permute.xlu1 %1526  ;;  %v1559_v8 = vpop.permute.xlu0 %1558 }
 0x660   : > { %v1536_v19 = vmul.f32 %v1527_v7, %v4562_v42  ;;  %v4082_v7 = vld [vmem:[%s5385_s4] ss:$12 sps:$4 sm:$0xff]   ;;  %s4007_s4 = smul.u32 12, %s5399_s28 }
 0x662   : > { %v1568_v23 = vadd.f32 %v1559_v8, %v1536_v19 }
 0x663   : > { %v1532_v11 = vpop.permute.xlu1 %1531  ;;  %v4042_v12 = vpop.permute.xlu0 %4041 }
 0x664   : > { %v4212_v16 = vadd.high.f32.bf16 %v1567_v13, %v4042_v12  ;;  %v4213_v17 = vadd.low.f32.bf16 %v1566_v14, %v4042_v12  ;;  %v1537_v21 = vmul.f32 %v1532_v11, %v4566_v44  ;;  %v4237_v44 = vmov 0.0  }
 0x665   : > { %3881 = vmatprep.subr.bf16.mxu0 %v4237_v44 }
 0x666   : > { %v1594_v20 = vpack.c.bf16 %v4212_v16, %v4213_v17 }
 0x667   : > { %v1564_v18 = vpop.permute.xlu1 %1563 }
 0x668   : > { %3877 = vmatprep.mubr.msk.bf16.mxu0 %vm781_vm0, %v1594_v20  ;;  %v1569_v24 = vadd.f32 %v1564_v18, %v1537_v21  ;;  %v3619_v18 = vld [vmem:[%s5386_s15] ss:$0 sm:$0xff]  ;;  %s5353_s15 = smov 92  }
 0x66b   : > { %v4047_v22 = vpop.permute.xlu1 %4046 }
 0x66c   : > { %v4214_v34 = vadd.high.f32.bf16 %v1569_v24, %v4047_v22  ;;  %v4215_v25 = vadd.low.f32.bf16 %v1568_v23, %v4047_v22 }
 0x66e   : > { %v1595_v31 = vpack.c.bf16 %v4214_v34, %v4215_v25 }
 0x670   : > { %3878 = vmatmul.mubr.msk.bf16.vlgmr.msra.gmra.mrb[16].mxu0 %vm781_vm0, %v1595_v31  ;;  %vm3012_vm0 = vcmask 240640  }
 0x671   : > { %3885 = vmatprep.mubr.msk.bf16.mxu0 %vm4241_vm4, %v4237_v44 }
 0x743   : > { %v3879_v26 = vpop.f32.mrb[16].mxu0 }
 0x744   : > { %v1651_v27 = vpop.f32.mrb[17].mxu0 }
 0x745   : > { %v3880_v28 = vpop.f32.mrb[18].mxu0 }
 0x746   : > { %v1667_v29 = vpack.c.bf16 %v3880_v28, %v3879_v26  ;;  %v1654_v30 = vpop.f32.mrb[19].mxu0  ;;  %v4086_v28 = vld [vmem:[%s5323_s19] ss:$12 sps:$4 sm:$0xff]  }
 0x747   : > { %v1666_v42 = vpack.c.bf16 %v1654_v30, %v1651_v27  ;;  %v4089_v30 = vld [vmem:[%s5323_s19 + $0x8] ss:$12 sps:$4 sm:$0xff]  }
 0x748   : > { %1699 = vrot.lane.b32.xlu1 %v1667_v29, %s5346_s23  ;;  %1670 = vst.msk [vmem:[#allocation2 + $0x18] sm:$0xff] %vm1668_vm3, %v1667_v29 }
 0x749   : > { %1697 = vrot.lane.b32.xlu0 %v1666_v42, %s5346_s23  ;;  %1669 = vst.msk [vmem:[#allocation2] sm:$0xff] %vm1668_vm3, %v1666_v42  ;;  %s5349_s23 = smov 91  }
 0x74c   : > { %1673 = vrot.lane.b32.xlu1 %v1666_v42, %s5376_s26 }
 0x74d   : > { %1705 = vrot.lane.b32.xlu0 %v1666_v42, %s5384_s29 }
 0x74f   : > { %v1738_v4 = vld [vmem:[#allocation2 + $0x18] sm:$0xff] }
 0x750   : > { %1675 = vrot.lane.b32.xlu1 %v1667_v29, %s5376_s26  ;;  %v1737_v39 = vld [vmem:[#allocation2] sm:$0xff] }
 0x751   : > { %1707 = vrot.lane.b32.xlu0 %v1667_v29, %s5384_s29  ;;  %s5387_s29 = sld [smem:[#allocation4_spill]] }
 0x754   : > { %1681 = vrot.lane.b32.xlu1 %v1666_v42, %s5378_s27 }
 0x755   : > { %1713 = vrot.lane.b32.xlu0 %v1666_v42, %s5344_s5 }
 0x758   : > { %1683 = vrot.lane.b32.xlu1 %v1667_v29, %s5378_s27 }
 0x759   : > { %1715 = vrot.lane.b32.xlu0 %v1667_v29, %s5344_s5  ;;  %s5351_s5 = smov 90  }
 0x75c   : > { %1689 = vrot.lane.b32.xlu1 %v1666_v42, %s4238_s25 }
 0x75d   : > { %1721 = vrot.lane.b32.xlu0 %v1666_v42, %s4239_s2 }
 0x760   : > { %1729 = vrot.lane.b32.xlu1 %v1666_v42, %s4240_s14 }
 0x761   : > { %1723 = vrot.lane.b32.xlu0 %v1667_v29, %s4239_s2 }
 0x764   : > { %1731 = vrot.lane.b32.xlu1 %v1667_v29, %s4240_s14 }
 0x765   : > { %1691 = vrot.lane.b32.xlu0 %v1667_v29, %s4238_s25  ;;  %v4088_v29 = vld [vmem:[%s5323_s19 + $0x4] ss:$12 sps:$4 sm:$0xff]   ;;  %s728_s25 = scalar_lea.vmem %s5387_s29, %s5348_s1  ;;  %s5388_s29 = smov 117  }
 0x7ba   : > { %v1700_v33 = vpop.permute.xlu1 %1699 }
 0x7bb   : > { %1704 = vst.msk [vmem:[#allocation2 + $0xd8] sm:$0xff] %vm1668_vm3, %v1700_v33  ;;  %v1698_v51 = vpop.permute.xlu0 %1697 }
 0x7bc   : > { %1703 = vst.msk [vmem:[#allocation2 + $0xc0] sm:$0xff] %vm1668_vm3, %v1698_v51 }
 0x7be   : > { %v1674_v35 = vpop.permute.xlu1 %1673 }
 0x7bf   : > { %1679 = vst.msk [vmem:[#allocation2 + $0x30] sm:$0xff] %vm1668_vm3, %v1674_v35  ;;  %v1706_v54 = vpop.permute.xlu0 %1705 }
 0x7c0   : > { %1711 = vst.msk [vmem:[#allocation2 + $0xf0] sm:$0xff] %vm1668_vm3, %v1706_v54 }
 0x7c2   : > { %v1676_v36 = vpop.permute.xlu1 %1675  ;;  %v1746_v40 = vld [vmem:[#allocation2 + $0xd8] sm:$0xff] }
 0x7c3   : > { %1680 = vst.msk [vmem:[#allocation2 + $0x48] sm:$0xff] %vm1668_vm3, %v1676_v36  ;;  %v1708_v37 = vpop.permute.xlu0 %1707  ;;  %v1745_v38 = vld [vmem:[#allocation2 + $0xc0] sm:$0xff] }
 0x7c4   : > { %1712 = vst.msk [vmem:[#allocation2 + $0x108] sm:$0xff] %vm1668_vm3, %v1708_v37  ;;  %3787 = vmatprep.subr.bf16.mxu1 %v1745_v38 }
 0x7c5   : > { %3788 = vmatpush3.bf16.msra.mxu1 %v1737_v39 }
 0x7c6   : > { %v1682_v41 = vpop.permute.xlu1 %1681  ;;  %3789 = vmatprep.subr.bf16.mxu1 %v1746_v40  ;;  %v1739_v47 = vld [vmem:[#allocation2 + $0x30] sm:$0xff] }
 0x7c7   : > { %1687 = vst.msk [vmem:[#allocation2 + $0x60] sm:$0xff] %vm1668_vm3, %v1682_v41  ;;  %v1714_v0 = vpop.permute.xlu0 %1713  ;;  %v1747_v43 = vld [vmem:[#allocation2 + $0xf0] sm:$0xff] }
 0x7c8   : > { %1719 = vst.msk [vmem:[#allocation2 + $0x120] sm:$0xff] %vm1668_vm3, %v1714_v0 }
 0x7c9   : > { %3790 = vmatpush3.bf16.msra.mxu1 %v1738_v4 }
 0x7ca   : > { %v1684_v45 = vpop.permute.xlu1 %1683  ;;  %3791 = vmatprep.subr.bf16.mxu1 %v1747_v43  ;;  %v1740_v53 = vld [vmem:[#allocation2 + $0x48] sm:$0xff] }
 0x7cb   : > { %1688 = vst.msk [vmem:[#allocation2 + $0x78] sm:$0xff] %vm1668_vm3, %v1684_v45  ;;  %v1716_v46 = vpop.permute.xlu0 %1715  ;;  %v1748_v48 = vld [vmem:[#allocation2 + $0x108] sm:$0xff] }
 0x7cc   : > { %1720 = vst.msk [vmem:[#allocation2 + $0x138] sm:$0xff] %vm1668_vm3, %v1716_v46  ;;  %v1859_v46 = vld [vmem:[%s5313_s9] sm:$0xff] }
 0x7cd   : > { %3792 = vmatpush3.bf16.msra.mxu1 %v1739_v47 }
 0x7ce   : > { %v1690_v49 = vpop.permute.xlu1 %1689  ;;  %3793 = vmatprep.subr.bf16.mxu1 %v1748_v48  ;;  %v1741_v58 = vld [vmem:[#allocation2 + $0x60] sm:$0xff] }
 0x7cf   : > { %1695 = vst.msk [vmem:[#allocation2 + $0x90] sm:$0xff] %vm1668_vm3, %v1690_v49  ;;  %v1722_v52 = vpop.permute.xlu0 %1721  ;;  %v1749_v55 = vld [vmem:[#allocation2 + $0x120] sm:$0xff] }
 0x7d0   : > { %1727 = vst.msk [vmem:[#allocation2 + $0x150] sm:$0xff] %vm1668_vm3, %v1722_v52  ;;  %v3712_v48 = vld [vmem:[%s728_s25] sm:$0xff]   ;;  %s5389_s25 = smov 108  }
 0x7d1   : > { %3794 = vmatpush3.bf16.msra.mxu1 %v1740_v53  ;;  %v1861_v52 = vld [vmem:[%s5314_s10] sm:$0xff]  ;;  %v1860_v53 = vld [vmem:[%s5313_s9 + $0x8] sm:$0xff] }
 0x7d2   : > { %v1730_v56 = vpop.permute.xlu1 %1729  ;;  %3795 = vmatprep.subr.bf16.mxu1 %v1749_v55  ;;  %v1742_v62 = vld [vmem:[#allocation2 + $0x78] sm:$0xff] }
 0x7d3   : > { %1735 = vst.msk [vmem:[#allocation2 + $0x180] sm:$0xff] %vm1668_vm3, %v1730_v56  ;;  %v1724_v57 = vpop.permute.xlu0 %1723  ;;  %v1750_v59 = vld [vmem:[#allocation2 + $0x138] sm:$0xff] }
 0x7d4   : > { %1728 = vst.msk [vmem:[#allocation2 + $0x168] sm:$0xff] %vm1668_vm3, %v1724_v57  ;;  %v4092_v55 = vld [vmem:[%s5323_s19 + $0x1c] ss:$12 sps:$4 sm:$0xff]   ;;  %v3713_v57 = vunpack.c.l.bf16 %v3712_v48 }
 0x7d5   : > { %3796 = vmatpush3.bf16.msra.mxu1 %v1741_v58  ;;  %v3714_v58 = vunpack.c.h.bf16 %v3712_v48 }
 0x7d6   : > { %v1732_v60 = vpop.permute.xlu1 %1731  ;;  %3797 = vmatprep.subr.bf16.mxu1 %v1750_v59  ;;  %v1743_v50 = vld [vmem:[#allocation2 + $0x90] sm:$0xff]  ;;  %v4090_v59 = vld [vmem:[%s5323_s19 + $0x18] ss:$12 sps:$4 sm:$0xff]  }
 0x7d7   : > { %1736 = vst.msk [vmem:[#allocation2 + $0x198] sm:$0xff] %vm1668_vm3, %v1732_v60  ;;  %v1692_v61 = vpop.permute.xlu0 %1691  ;;  %v1751_v63 = vld [vmem:[#allocation2 + $0x150] sm:$0xff]  ;;  %v4093_v60 = vld [vmem:[%s5323_s19 + $0x20] ss:$12 sps:$4 sm:$0xff]  }
 0x7d8   : > { %1696 = vst.msk [vmem:[#allocation2 + $0xa8] sm:$0xff] %vm1668_vm3, %v1692_v61 }
 0x7d9   : > { %3798 = vmatpush3.bf16.msra.mxu1 %v1742_v62 }
 0x7da   : > { %3799 = vmatprep.subr.bf16.mxu1 %v1751_v63  ;;  %v1753_v1 = vld [vmem:[#allocation2 + $0x180] sm:$0xff] }
 0x7db   : > { %3882 = vmatpush3.bf16.msra.mxu0 %v1753_v1  ;;  %v1752_v2 = vld [vmem:[#allocation2 + $0x168] sm:$0xff] }
 0x7dc   : > { %3883 = vmatprep.subr.bf16.mxu0 %v4237_v44  ;;  %v1862_v1 = vld [vmem:[%s5314_s10 + $0x8] sm:$0xff] }
 0x7dd   : > { %3800 = vmatpush3.bf16.msra.mxu1 %v1743_v50  ;;  %v4096_v50 = vld [vmem:[%s5323_s19 + $0x34] ss:$12 sps:$4 sm:$0xff]  }
 0x7de   : > { %3801 = vmatprep.subr.bf16.mxu1 %v1752_v2  ;;  %v1754_v3 = vld [vmem:[#allocation2 + $0x198] sm:$0xff] }
 0x7df   : > { %3884 = vmatpush3.bf16.msra.mxu0 %v1754_v3  ;;  %v1744_v6 = vld [vmem:[#allocation2 + $0xa8] sm:$0xff]  ;;  %v4050_v3 = vpack.i.bf16 %v3714_v58, %v3713_v57 }
 0x7e0   : > { %2055 = vmatprep.subr.bf16.mxu0 %v4088_v29 }
 0x7e1   : > { %3802 = vmatpush3.bf16.msra.mxu1 %v1744_v6  ;;  %v4097_v6 = vld [vmem:[%s5323_s19 + $0x38] ss:$12 sps:$4 sm:$0xff]  }
 0x7e2   : > { %3886 = vmatmul.mubr.msk.bf16.vlgmr.msra.gmra.mrb[20].mxu0 %vm904_vm1, %v4085_v5  ;;  %3889 = vmatprep.subr.bf16.mxu1 %v4237_v44  ;;  %v4094_v5 = vld [vmem:[%s5323_s19 + $0x30] ss:$12 sps:$4 sm:$0xff]   ;;  %vm3033_vm1 = vcmask 244740  }
 0x7e3   : > { %2087 = vmatprep.mubr.bf16.mxu0 %v4234_v15  ;;  %2056 = vmatpush1.bf16.msra.mxu0 %v4086_v28 }
 0x7e4   : > { %1810 = vmatmul.mubr.bf16.vlgmr.msra.gmra.mrb[12].mxu1 %v4082_v7  ;;  %2057 = vmatprep.subr.bf16.mxu0 %v4092_v55 }
 0x7e5   : > { %3899 = vmatprep.mubr.msk.bf16.mxu1 %vm4241_vm4, %v4237_v44  ;;  %3890 = vmatpush3.bf16.msra.mxu1 %v4089_v30 }
 0x7e6   : > { %3891 = vmatprep.subr.bf16.mxu1 %v4237_v44 }
 0x7e7   : > { %2058 = vmatpush1.bf16.msra.mxu0 %v4090_v59 }
 0x7e8   : > { %2059 = vmatprep.subr.bf16.mxu0 %v4096_v50 }
 0x7e9   : > { %3892 = vmatpush3.bf16.msra.mxu1 %v4093_v60 }
 0x7ea   : > { %3893 = vmatprep.subr.bf16.mxu1 %v4237_v44 }
 0x7eb   : > { %2060 = vmatpush1.bf16.msra.mxu0 %v4094_v5 }
 0x7ed   : > { %3894 = vmatpush3.bf16.msra.mxu1 %v4097_v6 }
 0x7ee   : > { %3895 = vmatprep.subr.bf16.mxu1 %v4237_v44 }
 0x8b5   : > { %v1852_v8 = vpop.f32.mrb[20].mxu0 }
 0x8b6   : > { %v3887_v9 = vpop.f32.mrb[21].mxu0 }
 0x8b7   : > { %v3803_v10 = vpop.f32.mrb[12].mxu1  ;;  %v1855_v11 = vpop.f32.mrb[22].mxu0  ;;  %v4098_v9 = vld [vmem:[%s5323_s19 + $0x48] ss:$12 sps:$4 sm:$0xff]  }
 0x8b8   : > { %v3804_v12 = vpop.f32.mrb[13].mxu1  ;;  %v3888_v13 = vpop.f32.mrb[23].mxu0 }
 0x8b9   : > { %v3805_v14 = vadd.f32 %v3804_v12, %v3803_v10  ;;  %v3806_v16 = vpop.f32.mrb[14].mxu1  ;;  %v4101_v10 = vld [vmem:[%s5323_s19 + $0x50] ss:$12 sps:$4 sm:$0xff]   ;;  %v4104_v12 = vld [vmem:[%s5323_s19 + $0x60] ss:$12 sps:$4 sm:$0x7f]  }
 0x8ba   : > { %v3807_v17 = vpop.f32.mrb[15].mxu1  ;;  %3896 = vmatpush3.bf16.msra.mxu1 %v4101_v10  ;;  %v4105_v13 = vld [vmem:[%s5323_s19 + $0x68] ss:$12 sps:$4 sm:$0x7f]  }
 0x8bb   : > { %v4655_v19 = vadd.f32 %v3805_v14, %v1852_v8  ;;  %v3808_v20 = vadd.f32 %v3807_v17, %v3806_v16  ;;  %v4100_v8 = vld [vmem:[%s5323_s19 + $0x4c] ss:$12 sps:$4 sm:$0xff]   ;;  %3897 = vmatprep.subr.bf16.mxu1 %v4237_v44  ;;  %v2047_v14 = vsel %vm2045_vm5, %v4104_v12, 0  ;;  %v2053_v16 = vsel %vm2045_vm5, %v4105_v13, 0 }
 0x8bc   : > { %2061 = vmatprep.subr.bf16.mxu0 %v4100_v8 }
 0x8bd   : > { %v4657_v21 = vadd.f32 %v3808_v20, %v1855_v11  ;;  %v1870_v22 = vmul.f32 %v3619_v18, %v4655_v19  ;;  %2062 = vmatpush1.bf16.msra.mxu0 %v4098_v9  ;;  %v4102_v11 = vld [vmem:[%s5323_s19 + $0x64] ss:$12 sps:$4 sm:$0x7f]  }
 0x8be   : > { %3635 = vmatprep.subr.msk.bf16.mxu0 %vm2045_vm5, %v4102_v11  ;;  %3898 = vmatpush3.bf16.msra.mxu1 %v2053_v16 }
 0x8bf   : > { %v1872_v23 = vsel %vm1668_vm3, %v1870_v22, 0.0  ;;  %v1871_v24 = vmul.f32 %v3619_v18, %v4657_v21  ;;  %v1880_v34 = vmul.f32 %v1870_v22, %v4655_v19  ;;  %2348 = vmatprep.subr.bf16.mxu1 %v4234_v15 }
 0x8c0   : > { %1873 = vadd.xlane.f32.xlu0 %v1872_v23 }
 0x8c1   : > { %v1875_v25 = vsel %vm1668_vm3, %v1871_v24, 0.0  ;;  %v1882_v31 = vsel %vm1668_vm3, %v1880_v34, 0.0  ;;  %v1881_v26 = vmul.f32 %v1871_v24, %v4657_v21  ;;  %2064 = vmatpush1.bf16.msra.mxu0 %v2047_v14 }
 0x8c2   : > { %1876 = vadd.xlane.f32.xlu1 %v1875_v25 }
 0x8c3   : > { %v1885_v27 = vsel %vm1668_vm3, %v1881_v26, 0.0 }
 0x8c4   : > { %1883 = vadd.xlane.f32.xlu0 %v1882_v31 }
 0x8c8   : > { %1886 = vadd.xlane.f32.xlu0 %v1885_v27 }
 0x94d   : > { %v1874_v42 = vpop.xlane.xlu0 %1873 }
 0x94e   : > { %v1878_v32 = vmul.f32 0.015625, %v1874_v42 }
 0x94f   : > { %v1877_v33 = vpop.xlane.xlu1 %1876 }
 0x950   : > { %v1890_v35 = vmul.f32 %v1878_v32, %v1878_v32  ;;  %v1879_v54 = vmul.f32 0.015625, %v1877_v33 }
 0x951   : > { %v1884_v51 = vpop.xlane.xlu0 %1883 }
 0x952   : > { %v1888_v36 = vmul.f32 0.015625, %v1884_v51  ;;  %v1891_v39 = vmul.f32 %v1879_v54, %v1879_v54 }
 0x954   : > { %v1892_v37 = vsub.f32 %v1888_v36, %v1890_v35 }
 0x955   : > { %v1887_v38 = vpop.xlane.xlu0 %1886 }
 0x956   : > { %v1894_v40 = vmax.f32 %v1892_v37, 0.0  ;;  %v1889_v41 = vmul.f32 0.015625, %v1887_v38 }
 0x958   : > { %v1896_v0 = vadd.f32 1e-05, %v1894_v40  ;;  %v1893_v4 = vsub.f32 %v1889_v41, %v1891_v39  ;;  %v4766_v40 = vld [vmem:[%s5390_s7] sm:$0xff]  ;;  %s5393_s7 = smov 110  }
 0x959   : > { %v3639_v41 = vcombine.high %v4766_v40, %v4766_v40 }
 0x95a   : > { %4198 = vrsqrt.f32 %v1896_v0  ;;  %v1895_v43 = vmax.f32 %v1893_v4, 0.0 }
 0x95c   : > { %v1897_v45 = vadd.f32 1e-05, %v1895_v43 }
 0x95e   : > { %4200 = vrsqrt.f32 %v1897_v45 }
 0x964   : > { %v4199_v47 = vpop.eup %4198 }
 0x965   : > { %v1900_v49 = vmul.f32 %v4199_v47, %v1859_v46 }
 0x967   : > { %1904 = vperm.xlu1 %4038, %v1900_v49   ;;  %v1914_v56 = vmul.f32 %v1900_v49, %v1878_v32 }
 0x968   : > { %v4201_v61 = vpop.eup %4200 }
 0x969   : > { %v1916_v62 = vsub.f32 %v1861_v52, %v1914_v56  ;;  %v1901_v63 = vmul.f32 %v4201_v61, %v1860_v53 }
 0x96b   : > { %1920 = vperm.xlu1 %4038, %v1916_v62   ;;  %1909 = vperm.xlu0 %4039, %v1901_v63   ;;  %v1915_v2 = vmul.f32 %v1901_v63, %v1879_v54 }
 0x96d   : > { %v1917_v7 = vsub.f32 %v1862_v1, %v1915_v2 }
 0x96f   : > { %1925 = vperm.xlu1 %4038, %v1917_v7   ;;  %4051 = vrot.lane.b32.xlu0 %v4050_v3, %s5388_s29  ;;  %s5357_s29 = smov 109  }
 0x9e6   : > { %v1905_v17 = vpop.permute.xlu1 %1904 }
 0x9e7   : > { %v1912_v22 = vmul.f32 %v1905_v17, %v4655_v19 }
 0x9ea   : > { %v1921_v18 = vpop.permute.xlu1 %1920  ;;  %v1910_v20 = vpop.permute.xlu0 %1909 }
 0x9eb   : > { %v1928_v23 = vadd.f32 %v1921_v18, %v1912_v22  ;;  %v1913_v24 = vmul.f32 %v1910_v20, %v4657_v21 }
 0x9ed   : > { %v1930_v26 = vmax.f32 %v1928_v23, 0.0 }
 0x9ee   : > { %v4052_v34 = vpop.permute.xlu0 %4051  ;;  %v1926_v25 = vpop.permute.xlu1 %1925 }
 0x9ef   : > { %v1929_v31 = vadd.f32 %v1926_v25, %v1913_v24  ;;  %v4216_v28 = vadd.low.f32.bf16 %v1930_v26, %v4052_v34 }
 0x9f1   : > { %v1931_v27 = vmax.f32 %v1929_v31, 0.0 }
 0x9f3   : > { %v4217_v29 = vadd.high.f32.bf16 %v1931_v27, %v4052_v34 }
 0x9f5   : > { %v1944_v30 = vpack.c.bf16 %v4217_v29, %v4216_v28 }
 0x9f7   : > { %3636 = vmatmul.mubr.msk.bf16.vlgmr.msra.gmra.mrb[24].mxu0 %vm1668_vm3, %v1944_v30  ;;  %3900 = vmatmul.mubr.msk.bf16.vlgmr.msra.gmra.mrb[16].mxu1 %vm1668_vm3, %v1944_v30  ;;  %v3638_v30 = vcombine.low %v4766_v40, %v4766_v40  ;;  %vm3155_vm3 = vcmask 588800  }
 0x9f8   : > { %3640 = vmatprep.mubr.msk.bf16.mxu0 %vm2303_vm7, %v3639_v41  ;;  %3641 = vmatprep.mubr.msk.bf16.mxu1 %vm2303_vm7, %v3639_v41 }
 0xaca   : > { %v2089_v42 = vpop.f32.mrb[24].mxu0  ;;  %v2132_v32 = vpop.f32.mrb[16].mxu1 }
 0xacb   : > { %v2091_v33 = vpop.f32.mrb[25].mxu0  ;;  %v3901_v51 = vpop.f32.mrb[17].mxu1 }
 0xacc   : > { %v2093_v19 = vpop.f32.mrb[26].mxu0  ;;  %v2135_v35 = vpop.f32.mrb[18].mxu1 }
 0xacd   : > { %v2139_v21 = vpack.c.bf16 %v2093_v19, %v2089_v42  ;;  %v2141_v54 = vpack.c.bf16 %v2135_v35, %v2132_v32  ;;  %v2095_v36 = vpop.f32.mrb[27].mxu0  ;;  %v3902_v37 = vpop.f32.mrb[19].mxu1  ;;  %v2392_v32 = vlaneseq  ;;  %v2390_v19 = vld [vmem:[%s5320_s16] sm:$0x7] }
 0xace   : > { %v2140_v38 = vpack.c.bf16 %v2095_v36, %v2091_v33 }
 0xacf   : > { %2142 = vst [vmem:[#allocation2] sm:$0xff] %v2139_v21  ;;  %2153 = vrot.lane.b32.xlu0 %v2141_v54, %s5376_s26  ;;  %2149 = vrot.lane.b32.xlu1 %v2139_v21, %s5376_s26  ;;  %2145 = vst.msk [vmem:[#allocation2 + $0x10] sm:$0xff] %vm2144_vm6, %v2141_v54  ;;  %v2393_v33 = vshrl.u32 %v2392_v32, 7 }
 0xad0   : > { %2143 = vst [vmem:[#allocation2 + $0x8] sm:$0xff] %v2140_v38  ;;  %2307 = vmatprep.subr.bf16.mxu0 %v2140_v38 }
 0xad1   : > { %2308 = vmatpush1.bf16.msra.mxu0 %v2139_v21  ;;  %v2394_v51 = vsub.s32 0, %v2393_v33  ;;  %v2398_v35 = vsub.s32 1, %v2393_v33  ;;  %v2402_v36 = vsub.s32 2, %v2393_v33 }
 0xad3   : > { %2164 = vrot.lane.b32.xlu0 %v2139_v21, %s5378_s27  ;;  %2168 = vrot.lane.b32.xlu1 %v2141_v54, %s5378_s27 }
 0xad6   : > { %v2271_v39 = vld [vmem:[#allocation2 + $0x10] sm:$0xff] }
 0xad7   : > { %2349 = vmatpush1.bf16.msra.mxu1 %v2271_v39  ;;  %2183 = vrot.lane.b32.xlu0 %v2141_v54, %s5355_s0 }
 0xad8   : > { %2179 = vrot.lane.b32.xlu1 %v2139_v21, %s5355_s0  ;;  %2350 = vmatprep.subr.bf16.mxu1 %v4234_v15 }
 0xadb   : > { %2194 = vrot.lane.b32.xlu0 %v2139_v21, %s5357_s29 }
 0xadc   : > { %2198 = vrot.lane.b32.xlu1 %v2141_v54, %s5357_s29 }
 0xadf   : > { %2166 = vrot.lane.b32.xlu0 %v2140_v38, %s5378_s27 }
 0xae0   : > { %2151 = vrot.lane.b32.xlu1 %v2140_v38, %s5376_s26 }
 0xae3   : > { %2213 = vrot.lane.b32.xlu0 %v2141_v54, %s5389_s25 }
 0xae4   : > { %2209 = vrot.lane.b32.xlu1 %v2139_v21, %s5389_s25 }
 0xae7   : > { %2196 = vrot.lane.b32.xlu0 %v2140_v38, %s5357_s29  ;;  %s5395_s29 = smov 90  }
 0xae8   : > { %2181 = vrot.lane.b32.xlu1 %v2140_v38, %s5355_s0  ;;  %s5394_s0 = smov 92  }
 0xaeb   : > { %2224 = vrot.lane.b32.xlu0 %v2139_v21, %s5353_s15 }
 0xaec   : > { %2228 = vrot.lane.b32.xlu1 %v2141_v54, %s5353_s15 }
 0xaef   : > { %2226 = vrot.lane.b32.xlu0 %v2140_v38, %s5353_s15 }
 0xaf0   : > { %2211 = vrot.lane.b32.xlu1 %v2140_v38, %s5389_s25 }
 0xaf3   : > { %2243 = vrot.lane.b32.xlu0 %v2141_v54, %s5349_s23 }
 0xaf4   : > { %2239 = vrot.lane.b32.xlu1 %v2139_v21, %s5349_s23 }
 0xaf7   : > { %2256 = vrot.lane.b32.xlu0 %v2140_v38, %s5351_s5 }
 0xaf8   : > { %2241 = vrot.lane.b32.xlu1 %v2140_v38, %s5349_s23  ;;  %s5391_s23 = sld [smem:[#allocation5_spill]] }
 0xafb   : > { %2254 = vrot.lane.b32.xlu0 %v2139_v21, %s5351_s5  ;;  %v2395_v21 = vrot.slane %v2390_v19, %v2394_v51 }
 0xafc   : > { %2258 = vrot.lane.b32.xlu1 %v2141_v54, %s5351_s5  ;;  %v2399_v54 = vrot.slane %v2390_v19, %v2398_v35  ;;  %s5397_s5 = sshll.u32 %s5399_s28, 3 }
 0xafd   : > { %s743_s17 = scalar_lea.vmem %s5326_s22, %s5397_s5 }
 0xafe   : > { %s733_s15 = scalar_lea.vmem %s5391_s23, %s4007_s4 }
 0xb41   : > { %v2154_v0 = vpop.permute.xlu0 %2153  ;;  %v2150_v4 = vpop.permute.xlu1 %2149 }
 0xb42   : > { %2163 = vst.msk [vmem:[#allocation2 + $0x28] sm:$0xff] %vm2144_vm6, %v2154_v0 }
 0xb45   : > { %v2165_v43 = vpop.permute.xlu0 %2164  ;;  %v2169_v45 = vpop.permute.xlu1 %2168 }
 0xb46   : > { %2178 = vst.msk [vmem:[#allocation2 + $0x40] sm:$0xff] %vm2144_vm6, %v2169_v45 }
 0xb49   : > { %v2184_v46 = vpop.permute.xlu0 %2183  ;;  %v2274_v47 = vld [vmem:[#allocation2 + $0x28] sm:$0xff] }
 0xb4a   : > { %2193 = vst.msk [vmem:[#allocation2 + $0x58] sm:$0xff] %vm2144_vm6, %v2184_v46  ;;  %v2180_v48 = vpop.permute.xlu1 %2179  ;;  %2351 = vmatpush1.bf16.msra.mxu1 %v2274_v47 }
 0xb4b   : > { %2352 = vmatprep.subr.bf16.mxu1 %v4234_v15 }
 0xb4d   : > { %v2195_v49 = vpop.permute.xlu0 %2194  ;;  %v2277_v52 = vld [vmem:[#allocation2 + $0x40] sm:$0xff] }
 0xb4e   : > { %v2199_v53 = vpop.permute.xlu1 %2198  ;;  %2353 = vmatpush1.bf16.msra.mxu1 %v2277_v52 }
 0xb4f   : > { %2208 = vst.msk [vmem:[#allocation2 + $0x70] sm:$0xff] %vm2144_vm6, %v2199_v53  ;;  %2354 = vmatprep.subr.bf16.mxu1 %v4234_v15 }
 0xb51   : > { %v2167_v55 = vpop.permute.xlu0 %2166  ;;  %v2280_v56 = vld [vmem:[#allocation2 + $0x58] sm:$0xff] }
 0xb52   : > { %v2171_v57 = vsel %vm2170_vm8, %v2165_v43, %v2167_v55  ;;  %v2172_v58 = vsel %vm2170_vm8, %v2167_v55, %v2169_v45  ;;  %v2152_v59 = vpop.permute.xlu1 %2151  ;;  %2355 = vmatpush1.bf16.msra.mxu1 %v2280_v56 }
 0xb53   : > { %2176 = vst [vmem:[#allocation2 + $0x30] sm:$0xff] %v2171_v57  ;;  %2177 = vst [vmem:[#allocation2 + $0x38] sm:$0xff] %v2172_v58  ;;  %v2156_v60 = vsel %vm2155_vm9, %v2150_v4, %v2152_v59  ;;  %v2157_v61 = vsel %vm2155_vm9, %v2152_v59, %v2154_v0  ;;  %2356 = vmatprep.subr.bf16.mxu1 %v4234_v15  ;;  %v2403_v4 = vrot.slane %v2390_v19, %v2402_v36  ;;  %v2388_v36 = vld [vmem:[%s5315_s11] sm:$0xff] }
 0xb54   : > { %2161 = vst [vmem:[#allocation2 + $0x18] sm:$0xff] %v2156_v60  ;;  %2162 = vst [vmem:[#allocation2 + $0x20] sm:$0xff] %v2157_v61  ;;  %2309 = vmatprep.subr.bf16.mxu0 %v2157_v61  ;;  %v4108_v61 = vld [vmem:[%s5324_s20] ss:$12 sps:$4 sm:$0xff]  }
 0xb55   : > { %v2214_v62 = vpop.permute.xlu0 %2213  ;;  %2310 = vmatpush1.bf16.msra.mxu0 %v2156_v60 }
 0xb56   : > { %2223 = vst.msk [vmem:[#allocation2 + $0x88] sm:$0xff] %vm2144_vm6, %v2214_v62  ;;  %v2210_v63 = vpop.permute.xlu1 %2209  ;;  %v2283_v1 = vld [vmem:[#allocation2 + $0x70] sm:$0xff]  ;;  %2311 = vmatprep.subr.bf16.mxu0 %v2172_v58 }
 0xb57   : > { %2357 = vmatpush1.bf16.msra.mxu1 %v2283_v1  ;;  %v4111_v1 = vld [vmem:[%s5324_s20 + $0x18] ss:$12 sps:$4 sm:$0xff]  }
 0xb58   : > { %2358 = vmatprep.subr.bf16.mxu1 %v4234_v15 }
 0xb59   : > { %v2197_v50 = vpop.permute.xlu0 %2196  ;;  %2312 = vmatpush1.bf16.msra.mxu0 %v2171_v57 }
 0xb5a   : > { %v2201_v2 = vsel %vm2200_vm10, %v2195_v49, %v2197_v50  ;;  %v2202_v3 = vsel %vm2200_vm10, %v2197_v50, %v2199_v53  ;;  %v2182_v5 = vpop.permute.xlu1 %2181  ;;  %v4116_v50 = vld [vmem:[%s5324_s20 + $0x34] ss:$12 sps:$4 sm:$0xff]  }
 0xb5b   : > { %2206 = vst [vmem:[#allocation2 + $0x60] sm:$0xff] %v2201_v2  ;;  %2207 = vst [vmem:[#allocation2 + $0x68] sm:$0xff] %v2202_v3  ;;  %v2186_v6 = vsel %vm2185_vm11, %v2180_v48, %v2182_v5  ;;  %v2187_v7 = vsel %vm2185_vm11, %v2182_v5, %v2184_v46  ;;  %v4114_v5 = vld [vmem:[%s5324_s20 + $0x30] ss:$12 sps:$4 sm:$0xff]  }
 0xb5c   : > { %2191 = vst [vmem:[#allocation2 + $0x48] sm:$0xff] %v2186_v6  ;;  %2192 = vst [vmem:[#allocation2 + $0x50] sm:$0xff] %v2187_v7  ;;  %2313 = vmatprep.subr.bf16.mxu0 %v2187_v7  ;;  %v4119_v7 = vld [vmem:[%s5324_s20 + $0x4c] ss:$12 sps:$4 sm:$0xff]  }
 0xb5d   : > { %v2225_v8 = vpop.permute.xlu0 %2224  ;;  %v2286_v9 = vld [vmem:[#allocation2 + $0x88] sm:$0xff]  ;;  %2314 = vmatpush1.bf16.msra.mxu0 %v2186_v6 }
 0xb5e   : > { %v2229_v10 = vpop.permute.xlu1 %2228  ;;  %2359 = vmatpush1.bf16.msra.mxu1 %v2286_v9  ;;  %2315 = vmatprep.subr.bf16.mxu0 %v2202_v3  ;;  %v4136_v3 = vld [vmem:[%s5324_s20 + $0x8] ss:$12 sps:$4 sm:$0xff]   ;;  %v4140_v6 = vld [vmem:[%s5324_s20 + $0xe0] ss:$12 sps:$4 sm:$0xff]   ;;  %v4145_v9 = vld [vmem:[%s5324_s20 + $0xf8] ss:$12 sps:$4 sm:$0xff]  }
 0xb5f   : > { %2238 = vst.msk [vmem:[#allocation2 + $0xa0] sm:$0xff] %vm2144_vm6, %v2229_v10  ;;  %2360 = vmatprep.subr.bf16.mxu1 %v4234_v15 }
 0xb61   : > { %v2227_v11 = vpop.permute.xlu0 %2226  ;;  %2316 = vmatpush1.bf16.msra.mxu0 %v2201_v2  ;;  %v4135_v2 = vld [vmem:[%s5324_s20 + $0xc8] ss:$12 sps:$4 sm:$0xff]  }
 0xb62   : > { %v2231_v12 = vsel %vm2230_vm12, %v2225_v8, %v2227_v11  ;;  %v2232_v13 = vsel %vm2230_vm12, %v2227_v11, %v2229_v10  ;;  %v2212_v14 = vpop.permute.xlu1 %2211  ;;  %v4141_v8 = vld [vmem:[%s5324_s20 + $0x20] ss:$12 sps:$4 sm:$0xff]   ;;  %v4117_v10 = vld [vmem:[%s5324_s20 + $0x48] ss:$12 sps:$4 sm:$0xff]   ;;  %v4122_v11 = vld [vmem:[%s5324_s20 + $0x64] ss:$12 sps:$4 sm:$0xff]  }
 0xb63   : > { %2236 = vst [vmem:[#allocation2 + $0x90] sm:$0xff] %v2231_v12  ;;  %v2216_v16 = vsel %vm2215_vm13, %v2210_v63, %v2212_v14  ;;  %v2217_v17 = vsel %vm2215_vm13, %v2212_v14, %v2214_v62  ;;  %v4110_v62 = vld [vmem:[%s5324_s20 + $0x4] ss:$12 sps:$4 sm:$0xff]   ;;  %v4113_v63 = vld [vmem:[%s5324_s20 + $0x1c] ss:$12 sps:$4 sm:$0xff]  }
 0xb64   : > { %2221 = vst [vmem:[#allocation2 + $0x78] sm:$0xff] %v2216_v16  ;;  %2317 = vmatprep.subr.bf16.mxu0 %v2217_v17  ;;  %v4120_v14 = vld [vmem:[%s5324_s20 + $0x60] ss:$12 sps:$4 sm:$0xff]   ;;  %v4151_v17 = vld [vmem:[%s5324_s20 + $0x50] ss:$12 sps:$4 sm:$0xff]  }
 0xb65   : > { %v2244_v18 = vpop.permute.xlu0 %2243  ;;  %2318 = vmatpush1.bf16.msra.mxu0 %v2216_v16  ;;  %v4125_v16 = vld [vmem:[%s5324_s20 + $0x7c] ss:$12 sps:$4 sm:$0xff]  }
 0xb66   : > { %2253 = vst.msk [vmem:[#allocation2 + $0xb8] sm:$0xff] %vm2144_vm6, %v2244_v18  ;;  %v2240_v20 = vpop.permute.xlu1 %2239  ;;  %v2289_v22 = vld [vmem:[#allocation2 + $0xa0] sm:$0xff]  ;;  %2319 = vmatprep.subr.bf16.mxu0 %v2232_v13  ;;  %v4150_v13 = vld [vmem:[%s5324_s20 + $0x110] ss:$12 sps:$4 sm:$0xff]  }
 0xb67   : > { %2361 = vmatpush1.bf16.msra.mxu1 %v2289_v22  ;;  %v4126_v22 = vld [vmem:[%s5324_s20 + $0x90] ss:$12 sps:$4 sm:$0xff]  }
 0xb68   : > { %2362 = vmatprep.subr.bf16.mxu1 %v4234_v15 }
 0xb69   : > { %v2257_v23 = vpop.permute.xlu0 %2256  ;;  %2320 = vmatpush1.bf16.msra.mxu0 %v2231_v12  ;;  %v4146_v12 = vld [vmem:[%s5324_s20 + $0x38] ss:$12 sps:$4 sm:$0xff]  }
 0xb6a   : > { %v2242_v24 = vpop.permute.xlu1 %2241 }
 0xb6b   : > { %v2246_v34 = vsel %vm2245_vm14, %v2240_v20, %v2242_v24  ;;  %v2247_v25 = vsel %vm2245_vm14, %v2242_v24, %v2244_v18  ;;  %v4123_v18 = vld [vmem:[%s5324_s20 + $0x78] ss:$12 sps:$4 sm:$0xff]   ;;  %v4128_v20 = vld [vmem:[%s5324_s20 + $0x94] ss:$12 sps:$4 sm:$0xff]  }
 0xb6c   : > { %2251 = vst [vmem:[#allocation2 + $0xa8] sm:$0xff] %v2246_v34  ;;  %2321 = vmatprep.subr.bf16.mxu0 %v2247_v25  ;;  %v4129_v24 = vld [vmem:[%s5324_s20 + $0xa8] ss:$12 sps:$4 sm:$0xff]   ;;  %v4132_v25 = vld [vmem:[%s5324_s20 + $0xc0] ss:$12 sps:$4 sm:$0xff]  }
 0xb6d   : > { %v2255_v31 = vpop.permute.xlu0 %2254  ;;  %v2292_v26 = vld [vmem:[#allocation2 + $0xb8] sm:$0xff]  ;;  %2322 = vmatpush1.bf16.msra.mxu0 %v2246_v34  ;;  %v4134_v34 = vld [vmem:[%s5324_s20 + $0xc4] ss:$12 sps:$4 sm:$0xff]  }
 0xb6e   : > { %v2261_v27 = vsel %vm2260_vm15, %v2255_v31, %v2257_v23  ;;  %v2259_v28 = vpop.permute.xlu1 %2258  ;;  %2363 = vmatpush1.bf16.msra.mxu1 %v2292_v26  ;;  %v4139_v31 = vld [vmem:[%s5324_s20 + $0xdc] ss:$12 sps:$4 sm:$0xff]   ;;  %v4137_v26 = vld [vmem:[%s5324_s20 + $0xd8] ss:$12 sps:$4 sm:$0xff]  }
 0xb6f   : > { %2266 = vst [vmem:[#allocation2 + $0xc0] sm:$0xff] %v2261_v27  ;;  %v2262_v29 = vsel %vm2260_vm15, %v2257_v23, %v2259_v28  ;;  %2268 = vst.msk [vmem:[#allocation2 + $0xd0] sm:$0xff] %vm2144_vm6, %v2259_v28  ;;  %2364 = vmatprep.subr.bf16.mxu1 %v4234_v15  ;;  %v4131_v23 = vld [vmem:[%s5324_s20 + $0xac] ss:$12 sps:$4 sm:$0xff]   ;;  %v4142_v28 = vld [vmem:[%s5324_s20 + $0xf0] ss:$12 sps:$4 sm:$0xff]  }
 0xb70   : > { %2323 = vmatprep.subr.bf16.mxu0 %v2262_v29  ;;  %v4149_v29 = vld [vmem:[%s5324_s20 + $0x10c] ss:$12 sps:$4 sm:$0xff]  }
 0xb71   : > { %2324 = vmatpush1.bf16.msra.mxu0 %v2261_v27  ;;  %v4144_v27 = vld [vmem:[%s5324_s20 + $0xf4] ss:$12 sps:$4 sm:$0xff]  }
 0xb72   : > { %2845 = vmatprep.subr.bf16.mxu0 %v4110_v62  ;;  %v4164_v62 = vld [vmem:[%s5324_s20 + $0x154] ss:$12 sps:$4 sm:$0xff]  }
 0xb74   : > { %2340 = vmatmul.mubr.bf16.vlgmr.msra.gmra.mrb[28].mxu0 %v3638_v30 }
 0xb75   : > { %2846 = vmatpush1.bf16.msra.mxu0 %v4108_v61 }
 0xb76   : > { %v2295_v42 = vld [vmem:[#allocation2 + $0xd0] sm:$0xff]  ;;  %2847 = vmatprep.subr.bf16.mxu0 %v4113_v63  ;;  %v4165_v63 = vld [vmem:[%s5324_s20 + $0x158] ss:$12 sps:$4 sm:$0xff]  }
 0xb77   : > { %2365 = vmatpush1.bf16.msra.mxu1 %v2295_v42 }
 0xb78   : > { %3818 = vmatprep.subr.bf16.mxu1 %v4135_v2  ;;  %v4169_v2 = vld [vmem:[%s5324_s20 + $0x16c] ss:$12 sps:$4 sm:$0xff]  }
 0xb79   : > { %2848 = vmatpush1.bf16.msra.mxu0 %v4111_v1  ;;  %v4162_v1 = vld [vmem:[%s5324_s20 + $0x150] ss:$12 sps:$4 sm:$0xff]  }
 0xb7a   : > { %2381 = vmatmul.mubr.bf16.vlgmr.msra.gmra.mrb[20].mxu1 %v3638_v30  ;;  %2849 = vmatprep.subr.bf16.mxu0 %v4116_v50  ;;  %v4147_v30 = vld [vmem:[%s5324_s20 + $0x108] ss:$12 sps:$4 sm:$0xff]   ;;  %v4166_v50 = vld [vmem:[%s5324_s20 + $0x98] ss:$12 sps:$4 sm:$0xff]  }
 0xb7b   : > { %3819 = vmatpush3.bf16.msra.mxu1 %v4136_v3  ;;  %v4170_v3 = vld [vmem:[%s5324_s20 + $0x170] ss:$12 sps:$4 sm:$0xff]  }
 0xb7c   : > { %3820 = vmatprep.subr.bf16.mxu1 %v4140_v6  ;;  %v4171_v6 = vld [vmem:[%s5324_s20 + $0xb0] ss:$12 sps:$4 sm:$0xff]  }
 0xb7d   : > { %2850 = vmatpush1.bf16.msra.mxu0 %v4114_v5  ;;  %v4167_v5 = vld [vmem:[%s5324_s20 + $0x168] ss:$12 sps:$4 sm:$0xff]  }
 0xb7e   : > { %2851 = vmatprep.subr.bf16.mxu0 %v4119_v7  ;;  %v4175_v7 = vld [vmem:[%s5324_s20 + $0x184] ss:$12 sps:$4 sm:$0xff]  }
 0xb7f   : > { %3821 = vmatpush3.bf16.msra.mxu1 %v4141_v8 }
 0xb80   : > { %3822 = vmatprep.subr.bf16.mxu1 %v4145_v9 }
 0xb81   : > { %2852 = vmatpush1.bf16.msra.mxu0 %v4117_v10 }
 0xb82   : > { %2853 = vmatprep.subr.bf16.mxu0 %v4122_v11 }
 0xb83   : > { %3823 = vmatpush3.bf16.msra.mxu1 %v4146_v12 }
 0xb84   : > { %3824 = vmatprep.subr.bf16.mxu1 %v4150_v13 }
 0xb85   : > { %2854 = vmatpush1.bf16.msra.mxu0 %v4120_v14 }
 0xb86   : > { %2855 = vmatprep.subr.bf16.mxu0 %v4125_v16 }
 0xb87   : > { %3825 = vmatpush3.bf16.msra.mxu1 %v4151_v17 }
 0xb89   : > { %2856 = vmatpush1.bf16.msra.mxu0 %v4123_v18 }
 0xb8a   : > { %2857 = vmatprep.subr.bf16.mxu0 %v4128_v20 }
 0xb8d   : > { %2858 = vmatpush1.bf16.msra.mxu0 %v4126_v22 }
 0xb8e   : > { %2859 = vmatprep.subr.bf16.mxu0 %v4131_v23 }
 0xb91   : > { %2860 = vmatpush1.bf16.msra.mxu0 %v4129_v24 }
 0xb92   : > { %2861 = vmatprep.subr.bf16.mxu0 %v4134_v34 }
 0xb95   : > { %2862 = vmatpush1.bf16.msra.mxu0 %v4132_v25 }
 0xb96   : > { %2863 = vmatprep.subr.bf16.mxu0 %v4139_v31 }
 0xb99   : > { %2864 = vmatpush1.bf16.msra.mxu0 %v4137_v26 }
 0xb9a   : > { %2865 = vmatprep.subr.bf16.mxu0 %v4144_v27  ;;  %v4172_v27 = vld [vmem:[%s5324_s20 + $0x188] ss:$12 sps:$4 sm:$0xff]  }
 0xb9d   : > { %2866 = vmatpush1.bf16.msra.mxu0 %v4142_v28  ;;  %v4173_v28 = vld [vmem:[%s5324_s20 + $0x180] ss:$12 sps:$4 sm:$0xff]  }
 0xb9e   : > { %2867 = vmatprep.subr.bf16.mxu0 %v4149_v29  ;;  %v4179_v29 = vld [vmem:[%s5324_s20 + $0x198] ss:$12 sps:$4 sm:$0x7f]  }
 0xba1   : > { %2868 = vmatpush1.bf16.msra.mxu0 %v4147_v30  ;;  %v4177_v30 = vld [vmem:[%s5324_s20 + $0x19c] ss:$12 sps:$4 sm:$0x7f]  }
 0xc47   : > { %v4812_v37 = vpop.f32.mrb[28].mxu0 }
 0xc48   : > { %v2407_v38 = vmul.f32 %v2395_v21, %v4812_v37  ;;  %v4815_v39 = vpop.f32.mrb[29].mxu0 }
 0xc49   : > { %v2408_v40 = vmul.f32 %v2399_v54, %v4815_v39  ;;  %v2345_v41 = vpop.f32.mrb[30].mxu0 }
 0xc4a   : > { %v2416_v0 = vmul.f32 %v2407_v38, %v4812_v37  ;;  %v2346_v43 = vpop.f32.mrb[31].mxu0  ;;  %v752_v41 = vld [vmem:[%s733_s15 + $0x8] sm:$0xf] }
 0xc4b   : > { %v2410_v45 = vadd.f32 %v2408_v40, %v2407_v38  ;;  %v2417_v46 = vmul.f32 %v2408_v40, %v4815_v39  ;;  %v751_v40 = vld [vmem:[%s733_s15] sm:$0xff]  ;;  %v4155_v43 = vld [vmem:[%s5324_s20 + $0x128] ss:$12 sps:$4 sm:$0xff]  }
 0xc4c   : > { %3826 = vmatprep.subr.bf16.mxu1 %v4155_v43 }
 0xc4d   : > { %v4820_v47 = vpop.f32.mrb[20].mxu1  ;;  %v2419_v48 = vadd.f32 %v2417_v46, %v2416_v0  ;;  %v4152_v46 = vld [vmem:[%s5324_s20 + $0x120] ss:$12 sps:$4 sm:$0xff]  }
 0xc4e   : > { %v2409_v49 = vmul.f32 %v2403_v4, %v4820_v47  ;;  %v2384_v52 = vpop.f32.mrb[21].mxu1  ;;  %v4154_v4 = vld [vmem:[%s5324_s20 + $0x124] ss:$12 sps:$4 sm:$0xff]  }
 0xc4f   : > { %v2385_v53 = vpop.f32.mrb[22].mxu1  ;;  %v2453_v52 = vunpack.c.h.bf16 %v751_v40  ;;  %2869 = vmatprep.subr.bf16.mxu0 %v4154_v4 }
 0xc50   : > { %v2418_v55 = vmul.f32 %v2409_v49, %v4820_v47  ;;  %v2386_v56 = vpop.f32.mrb[23].mxu1  ;;  %v2411_v57 = vsel %vm2144_vm6, %v2409_v49, 0.0  ;;  %v2454_v53 = vunpack.c.l.bf16 %v752_v41  ;;  %2870 = vmatpush1.bf16.msra.mxu0 %v4152_v46 }
 0xc51   : > { %v2412_v58 = vadd.f32 %v2411_v57, %v2410_v45  ;;  %v2389_v45 = vld [vmem:[%s5316_s12] sm:$0xff]  ;;  %v4159_v57 = vld [vmem:[%s5324_s20 + $0x13c] ss:$12 sps:$4 sm:$0xff]  }
 0xc52   : > { %v2420_v59 = vsel %vm2144_vm6, %v2418_v55, 0.0  ;;  %v2452_v55 = vunpack.c.l.bf16 %v751_v40  ;;  %v4055_v61 = vpack.i.bf16 %v2454_v53, %v2453_v52  ;;  %2871 = vmatprep.subr.bf16.mxu0 %v4159_v57 }
 0xc53   : > { %2413 = vadd.xlane.f32.xlu1 %v2412_v58  ;;  %v2421_v60 = vadd.f32 %v2420_v59, %v2419_v48  ;;  %v4156_v48 = vld [vmem:[%s5324_s20 + $0x68] ss:$12 sps:$4 sm:$0xff]   ;;  %v4160_v58 = vld [vmem:[%s5324_s20 + $0x140] ss:$12 sps:$4 sm:$0xff]   ;;  %v4157_v59 = vld [vmem:[%s5324_s20 + $0x138] ss:$12 sps:$4 sm:$0xff]  }
 0xc54   : > { %3827 = vmatpush3.bf16.msra.mxu1 %v4156_v48  ;;  %2872 = vmatpush1.bf16.msra.mxu0 %v4157_v59 }
 0xc55   : > { %2422 = vadd.xlane.f32.xlu0 %v2421_v60  ;;  %v4161_v60 = vld [vmem:[%s5324_s20 + $0x80] ss:$12 sps:$4 sm:$0xff]   ;;  %3828 = vmatprep.subr.bf16.mxu1 %v4160_v58 }
 0xc56   : > { %2873 = vmatprep.subr.bf16.mxu0 %v4164_v62  ;;  %v3149_v58 = vld [vmem:[%s5317_s13] sm:$0x7] }
 0xc58   : > { %3829 = vmatpush3.bf16.msra.mxu1 %v4161_v60  ;;  %2874 = vmatpush1.bf16.msra.mxu0 %v4162_v1 }
 0xc59   : > { %3830 = vmatprep.subr.bf16.mxu1 %v4165_v63  ;;  %2875 = vmatprep.subr.bf16.mxu0 %v4169_v2 }
 0xc5c   : > { %3831 = vmatpush3.bf16.msra.mxu1 %v4166_v50  ;;  %2876 = vmatpush1.bf16.msra.mxu0 %v4167_v5 }
 0xc5d   : > { %3832 = vmatprep.subr.bf16.mxu1 %v4170_v3  ;;  %2886 = vmatprep.subr.bf16.mxu0 %v4175_v7 }
 0xc60   : > { %3833 = vmatpush3.bf16.msra.mxu1 %v4171_v6 }
 0xc61   : > { %3903 = vmatprep.subr.bf16.mxu1 %v4237_v44 }
 0xce0   : > { %v2414_v42 = vpop.xlane.xlu1 %2413 }
 0xce1   : > { %v2415_v32 = vmul.f32 0.00390625, %v2414_v42 }
 0xce2   : > { %v2423_v33 = vpop.xlane.xlu0 %2422 }
 0xce3   : > { %v2425_v51 = vmul.f32 %v2415_v32, %v2415_v32  ;;  %v2424_v19 = vmul.f32 0.00390625, %v2423_v33 }
 0xce5   : > { %v2426_v35 = vsub.f32 %v2424_v19, %v2425_v51  ;;  %v2837_v51 = vsel %vm2045_vm5, %v4179_v29, 0 }
 0xce7   : > { %v2427_v21 = vmax.f32 %v2426_v35, 0.0 }
 0xce9   : > { %v2428_v54 = vadd.f32 1e-05, %v2427_v21 }
 0xceb   : > { %4202 = vrsqrt.f32 %v2428_v54 }
 0xcf5   : > { %v4203_v38 = vpop.eup %4202 }
 0xcf6   : > { %v2430_v0 = vmul.f32 %v4203_v38, %v2388_v36 }
 0xcf8   : > { %2433 = vperm.xlu0 %4039, %v2430_v0   ;;  %v2439_v49 = vmul.f32 %v2430_v0, %v2415_v32 }
 0xcfa   : > { %v2440_v56 = vsub.f32 %v2389_v45, %v2439_v49 }
 0xcfc   : > { %2443 = vperm.xlu1 %4038, %v2440_v56   ;;  %2458 = vrot.lane.b32.xlu0 %v2452_v55, %s5392_s18 }
 0xd00   : > { %4056 = vrot.lane.b32.xlu1 %v4055_v61, %s5392_s18 }
 0xd77   : > { %v2434_v8 = vpop.permute.xlu0 %2433 }
 0xd78   : > { %v2436_v9 = vmul.f32 %v2434_v8, %v4812_v37  ;;  %v2437_v10 = vmul.f32 %v2434_v8, %v4815_v39  ;;  %v2438_v23 = vmul.f32 %v2434_v8, %v4820_v47  ;;  %v4176_v47 = vld [vmem:[%s5324_s20 + $0x1a0] ss:$12 sps:$4 sm:$0x7f]  }
 0xd79   : > { %v2843_v33 = vsel %vm2045_vm5, %v4176_v47, 0 }
 0xd7b   : > { %v2444_v11 = vpop.permute.xlu1 %2443  ;;  %v2459_v16 = vpop.permute.xlu0 %2458 }
 0xd7c   : > { %v2446_v12 = vadd.f32 %v2444_v11, %v2436_v9  ;;  %v2447_v13 = vadd.f32 %v2444_v11, %v2437_v10  ;;  %v2448_v37 = vadd.f32 %v2444_v11, %v2438_v23 }
 0xd7e   : > { %v2449_v20 = vmax.f32 %v2446_v12, 0.0  ;;  %v2450_v22 = vmax.f32 %v2447_v13, 0.0  ;;  %v2451_v42 = vmax.f32 %v2448_v37, 0.0 }
 0xd7f   : > { %v4057_v14 = vpop.permute.xlu1 %4056 }
 0xd80   : > { %v4059_v17 = vunpack.i.h.bf16 %v4057_v14  ;;  %v4058_v18 = vunpack.i.l.bf16 %v4057_v14 }
 0xd82   : > { %v2465_v24 = vsel %vm2200_vm10, %v2459_v16, %v4058_v18  ;;  %v2466_v34 = vsel %vm2200_vm10, %v4058_v18, %v4059_v17  ;;  %v2472_v32 = vadd.f32 %v4059_v17, %v2451_v42 }
 0xd83   : > { %v2470_v25 = vadd.f32 %v2465_v24, %v2449_v20  ;;  %v2471_v31 = vadd.f32 %v2466_v34, %v2450_v22 }
 0xd84   : > { %v2475_v19 = vpack.c.bf16 %v2472_v32, %v2472_v32 }
 0xd85   : > { %v2473_v26 = vpack.c.bf16 %v2470_v25, %v2470_v25  ;;  %v2474_v39 = vpack.c.bf16 %v2471_v31, %v2471_v31 }
 0xd87   : > { %2877 = vmatprep.mubr.bf16.mxu0 %v2474_v39  ;;  %2959 = vmatprep.mubr.bf16.mxu1 %v2474_v39 }
 0xd88   : > { %2878 = vmatmul.mubr.bf16.vlgmr.msra.gmra.mrb[32].mxu0 %v2473_v26  ;;  %2960 = vmatmul.mubr.bf16.vlgmr.msra.gmra.mrb[24].mxu1 %v2473_v26 }
 0xd89   : > { %3904 = vmatpush3.bf16.msra.mxu1 %v4172_v27  ;;  %2887 = vmatpush1.bf16.msra.mxu0 %v4173_v28 }
 0xd8a   : > { %3905 = vmatprep.subr.bf16.mxu1 %v4237_v44  ;;  %3907 = vmatprep.mubr.msk.bf16.mxu1 %vm4241_vm4, %v4237_v44 }
 0xd8b   : > { %3696 = vmatprep.subr.msk.bf16.mxu0 %vm2045_vm5, %v4177_v30  ;;  %2918 = vmatprep.mubr.bf16.mxu0 %v4234_v15  ;;  %vm4247_vm5 = vmmov 1  }
 0xd8d   : > { %3906 = vmatpush3.bf16.msra.mxu1 %v2843_v33  ;;  %2889 = vmatpush1.bf16.msra.mxu0 %v2837_v51 }
 0xd8e   : > { %3911 = vmatprep.subr.bf16.mxu0 %v4237_v44 }
 0xd90   : > { %3908 = vmatmul.mubr.msk.bf16.vlgmr.msra.gmra.mrb[28].mxu1 %vm2144_vm6, %v2475_v19 }
 0xd91   : > { %3201 = vmatprep.mubr.bf16.mxu1 %v4234_v15 }
 0xd94   : > { %3697 = vmatmul.mubr.msk.bf16.vlgmr.msra.gmra.mrb[32].mxu0 %vm2144_vm6, %v2475_v19 }
 0xd95   : > { %3921 = vmatprep.mubr.msk.bf16.mxu0 %vm4241_vm4, %v4237_v44  ;;  %vm3328_vm4 = vcmask 1045504  }
 0xd96   : > { %vm3994_vm7 = vmpackc.low %vm3328_vm4, %vm4247_vm5 }
 0xe5b   : > { %v3834_v35 = vpop.f32.mrb[24].mxu1 }
 0xe5c   : > { %v3835_v21 = vpop.f32.mrb[25].mxu1 }
 0xe5d   : > { %v3836_v54 = vadd.f32 %v3835_v21, %v3834_v35  ;;  %v3837_v36 = vpop.f32.mrb[26].mxu1 }
 0xe5e   : > { %v3838_v38 = vpop.f32.mrb[27].mxu1 }
 0xe63   : > { %v3001_v40 = vpop.f32.mrb[28].mxu1 }
 0xe64   : > { %v3002_v41 = vadd.f32 %v3836_v54, %v3001_v40  ;;  %v3909_v0 = vpop.f32.mrb[29].mxu1 }
 0xe65   : > { %v3004_v4 = vpop.f32.mrb[30].mxu1 }
 0xe66   : > { %v3009_v43 = vpack.c.bf16 %v3002_v41, %v3002_v41  ;;  %v3910_v45 = vpop.f32.mrb[31].mxu1  ;;  %v3254_v4 = vld [vmem:[%s5325_s21 + $0x8] sm:$0xff] }
 0xe67   : > { %v2920_v46 = vpop.f32.mrb[32].mxu0 }
 0xe68   : > { %v3007_v48 = vpack.c.bf16 %v2920_v46, %v2920_v46  ;;  %3039 = vrot.lane.b32.xlu1 %v3009_v43, %s5378_s27  ;;  %v2922_v15 = vpop.f32.mrb[33].mxu0  ;;  %v3019_v49 = vrot.slane %v3009_v43, 4  ;;  %3013 = vst.msk [vmem:[#allocation2 + $0x10] sm:$0xf] %vm3012_vm0, %v3009_v43  ;;  %v3256_v46 = vld [vmem:[%s5325_s21 + $0x18] sm:$0xff] }
 0xe69   : > { %v3008_v52 = vpack.c.bf16 %v2922_v15, %v2922_v15  ;;  %v2924_v53 = vpop.f32.mrb[34].mxu0 }
 0xe6a   : > { %3010 = vst [vmem:[#allocation2] sm:$0xf] %v3007_v48  ;;  %3024 = vrot.lane.b32.xlu0 %v3019_v49, %s5376_s26  ;;  %v2925_v55 = vpop.f32.mrb[35].mxu0  ;;  %v3017_v56 = vrot.slane %v3007_v48, 4  ;;  %v3255_v53 = vld [vmem:[%s5325_s21 + $0x10] sm:$0xff] }
 0xe6b   : > { %3011 = vst [vmem:[#allocation2 + $0x8] sm:$0xf] %v3008_v52  ;;  %v3018_v57 = vrot.slane %v3008_v52, 4 }
 0xe6c   : > { %3067 = vrot.lane.b32.xlu1 %v3009_v43, %s5392_s18 }
 0xe6e   : > { %3035 = vrot.lane.b32.xlu0 %v3007_v48, %s5378_s27 }
 0xe70   : > { %3053 = vrot.lane.b32.xlu1 %v3019_v49, %s5393_s7 }
 0xe72   : > { %3063 = vrot.lane.b32.xlu0 %v3007_v48, %s5392_s18 }
 0xe74   : > { %3081 = vrot.lane.b32.xlu1 %v3019_v49, %s5389_s25 }
 0xe76   : > { %3037 = vrot.lane.b32.xlu0 %v3008_v52, %s5378_s27  ;;  %s5396_s27 = smov 91  }
 0xe78   : > { %3020 = vrot.lane.b32.xlu1 %v3017_v56, %s5376_s26 }
 0xe7a   : > { %3065 = vrot.lane.b32.xlu0 %v3008_v52, %s5392_s18 }
 0xe7c   : > { %3049 = vrot.lane.b32.xlu1 %v3017_v56, %s5393_s7 }
 0xe7e   : > { %3093 = vrot.lane.b32.xlu0 %v3008_v52, %s5394_s0 }
 0xe80   : > { %3077 = vrot.lane.b32.xlu1 %v3017_v56, %s5389_s25 }
 0xe82   : > { %3091 = vrot.lane.b32.xlu0 %v3007_v48, %s5394_s0 }
 0xe84   : > { %3022 = vrot.lane.b32.xlu1 %v3018_v57, %s5376_s26 }
 0xe86   : > { %3119 = vrot.lane.b32.xlu0 %v3007_v48, %s5395_s29 }
 0xe88   : > { %3095 = vrot.lane.b32.xlu1 %v3009_v43, %s5394_s0 }
 0xe8a   : > { %3051 = vrot.lane.b32.xlu0 %v3018_v57, %s5393_s7 }
 0xe8c   : > { %3109 = vrot.lane.b32.xlu1 %v3019_v49, %s5396_s27  ;;  %v3925_v49 = vpack.c.bf16 %v3256_v46, %v3254_v4  ;;  %v3291_v46 = vld [vmem:[%s5325_s21 + $0x130] sm:$0xff] }
 0xe8e   : > { %3079 = vrot.lane.b32.xlu0 %v3018_v57, %s5389_s25 }
 0xe90   : > { %3105 = vrot.lane.b32.xlu1 %v3017_v56, %s5396_s27 }
 0xe92   : > { %3107 = vrot.lane.b32.xlu0 %v3018_v57, %s5396_s27  ;;  %v3258_v57 = vld [vmem:[%s5325_s21 + $0x28] sm:$0xff] }
 0xe94   : > { %3121 = vrot.lane.b32.xlu1 %v3008_v52, %s5395_s29  ;;  %v3253_v52 = vld [vmem:[%s5325_s21] sm:$0xff] }
 0xe96   : > { %3123 = vrot.lane.b32.xlu0 %v3009_v43, %s5395_s29 }
 0xe98   : > { %3152 = vperm.xlu1 %4038, %v3149_v58   ;;  %v3260_v58 = vld [vmem:[%s5325_s21 + $0x38] sm:$0xff] }
 0xeda   : > { %v3040_v59 = vpop.permute.xlu1 %3039 }
 0xedb   : > { %3048 = vst.msk [vmem:[#allocation2 + $0x28] sm:$0xf] %vm3012_vm0, %v3040_v59 }
 0xedc   : > { %v3025_v60 = vpop.permute.xlu0 %3024 }
 0xedd   : > { %3034 = vst.msk [vmem:[#allocation2 + $0x10] sm:$0xf0] %vm3033_vm1, %v3025_v60 }
 0xede   : > { %v3068_v61 = vpop.permute.xlu1 %3067 }
 0xedf   : > { %3076 = vst.msk [vmem:[#allocation2 + $0x40] sm:$0xf] %vm3012_vm0, %v3068_v61 }
 0xee0   : > { %v3036_v62 = vpop.permute.xlu0 %3035 }
 0xee2   : > { %v3054_v63 = vpop.permute.xlu1 %3053 }
 0xee3   : > { %3062 = vst.msk [vmem:[#allocation2 + $0x28] sm:$0xf0] %vm3033_vm1, %v3054_v63 }
 0xee4   : > { %v3064_v1 = vpop.permute.xlu0 %3063  ;;  %v3135_v50 = vld [vmem:[#allocation2 + $0x10] sm:$0xff] }
 0xee5   : > { %3912 = vmatpush3.bf16.msra.mxu0 %v3135_v50  ;;  %v3262_v50 = vld [vmem:[%s5325_s21 + $0x48] sm:$0xff] }
 0xee6   : > { %v3082_v2 = vpop.permute.xlu1 %3081  ;;  %3913 = vmatprep.subr.bf16.mxu0 %v4237_v44 }
 0xee7   : > { %3090 = vst.msk [vmem:[#allocation2 + $0x40] sm:$0xf0] %vm3033_vm1, %v3082_v2 }
 0xee8   : > { %v3038_v3 = vpop.permute.xlu0 %3037 }
 0xee9   : > { %v3041_v5 = vsel %vm2170_vm8, %v3036_v62, %v3038_v3  ;;  %v3042_v6 = vsel %vm2170_vm8, %v3038_v3, %v3040_v59  ;;  %v3929_v62 = vpack.c.bf16 %v3260_v58, %v3258_v57  ;;  %v3300_v57 = vld [vmem:[%s5325_s21 + $0x178] sm:$0xff] }
 0xeea   : > { %3046 = vst [vmem:[#allocation2 + $0x18] sm:$0xf] %v3041_v5  ;;  %3047 = vst [vmem:[#allocation2 + $0x20] sm:$0xf] %v3042_v6  ;;  %v3021_v7 = vpop.permute.xlu1 %3020  ;;  %v3138_v8 = vld [vmem:[#allocation2 + $0x28] sm:$0xff]  ;;  %v3261_v6 = vld [vmem:[%s5325_s21 + $0x40] sm:$0xff] }
 0xeeb   : > { %3914 = vmatpush3.bf16.msra.mxu0 %v3138_v8  ;;  %v3266_v8 = vld [vmem:[%s5325_s21 + $0x68] sm:$0xff] }
 0xeec   : > { %v3066_v9 = vpop.permute.xlu0 %3065  ;;  %3915 = vmatprep.subr.bf16.mxu0 %v4237_v44 }
 0xeed   : > { %v3069_v10 = vsel %vm2200_vm10, %v3064_v1, %v3066_v9  ;;  %v3070_v11 = vsel %vm2200_vm10, %v3066_v9, %v3068_v61  ;;  %v3927_v61 = vpack.c.bf16 %v3255_v53, %v3253_v52  ;;  %v3259_v1 = vld [vmem:[%s5325_s21 + $0x30] sm:$0xff]  ;;  %v3268_v9 = vld [vmem:[%s5325_s21 + $0x78] sm:$0xff]  ;;  %v3293_v53 = vld [vmem:[%s5325_s21 + $0x140] sm:$0xff] }
 0xeee   : > { %3074 = vst [vmem:[#allocation2 + $0x30] sm:$0xf] %v3069_v10  ;;  %3075 = vst [vmem:[#allocation2 + $0x38] sm:$0xf] %v3070_v11  ;;  %v3050_v12 = vpop.permute.xlu1 %3049  ;;  %v3141_v13 = vld [vmem:[#allocation2 + $0x40] sm:$0xff]  ;;  %v3937_v11 = vpack.c.bf16 %v3268_v9, %v3266_v8 }
 0xeef   : > { %3916 = vmatpush3.bf16.msra.mxu0 %v3141_v13  ;;  %v3267_v13 = vld [vmem:[%s5325_s21 + $0x70] sm:$0xff]  ;;  %v3305_v9 = vld [vmem:[%s5325_s21 + $0x1a0] sm:$0xff] }
 0xef0   : > { %v3094_v14 = vpop.permute.xlu0 %3093  ;;  %3917 = vmatprep.subr.bf16.mxu0 %v4237_v44 }
 0xef2   : > { %v3078_v16 = vpop.permute.xlu1 %3077 }
 0xef4   : > { %v3092_v17 = vpop.permute.xlu0 %3091 }
 0xef5   : > { %v3097_v18 = vsel %vm2230_vm12, %v3092_v17, %v3094_v14 }
 0xef6   : > { %3102 = vst [vmem:[#allocation2 + $0x48] sm:$0xf] %v3097_v18  ;;  %v3023_v20 = vpop.permute.xlu1 %3022 }
 0xef7   : > { %v3026_v22 = vsel %vm2155_vm9, %v3021_v7, %v3023_v20  ;;  %v3027_v23 = vsel %vm2155_vm9, %v3023_v20, %v3025_v60  ;;  %v3148_v60 = vld [vmem:[%s5312_s8] sm:$0x3]  ;;  %v3263_v7 = vld [vmem:[%s5325_s21 + $0x50] sm:$0xff] }
 0xef8   : > { %3031 = vst [vmem:[#allocation2] sm:$0xf0] %v3026_v22  ;;  %3032 = vst [vmem:[#allocation2 + $0x8] sm:$0xf0] %v3027_v23  ;;  %v3120_v24 = vpop.permute.xlu0 %3119  ;;  %v3935_v10 = vpack.c.bf16 %v3263_v7, %v3261_v6  ;;  %v3269_v20 = vld [vmem:[%s5325_s21 + $0x80] sm:$0xff]  ;;  %v3271_v22 = vld [vmem:[%s5325_s21 + $0x90] sm:$0xff] }
 0xef9   : > { %v3274_v23 = vld [vmem:[%s5325_s21 + $0xa8] sm:$0xff]  ;;  %v3308_v7 = vld [vmem:[%s5325_s21 + $0x1b8] sm:$0xff] }
 0xefa   : > { %v3096_v34 = vpop.permute.xlu1 %3095  ;;  %v3306_v6 = vld [vmem:[%s5325_s21 + $0x1a8] sm:$0xff] }
 0xefb   : > { %v3098_v25 = vsel %vm2230_vm12, %v3094_v14, %v3096_v34  ;;  %3104 = vst.msk [vmem:[#allocation2 + $0x58] sm:$0xf] %vm3012_vm0, %v3096_v34  ;;  %v3270_v14 = vld [vmem:[%s5325_s21 + $0x88] sm:$0xff]  ;;  %v3943_v34 = vpack.c.bf16 %v3271_v22, %v3269_v20  ;;  %v3977_v8 = vpack.c.bf16 %v3308_v7, %v3306_v6  ;;  %v3316_v20 = vld [vmem:[%s5325_s21 + $0x1f8] sm:$0xff] }
 0xefc   : > { %3103 = vst [vmem:[#allocation2 + $0x50] sm:$0xf] %v3098_v25  ;;  %v3052_v31 = vpop.permute.xlu0 %3051 }
 0xefd   : > { %v3055_v37 = vsel %vm2185_vm11, %v3050_v12, %v3052_v31  ;;  %v3056_v26 = vsel %vm2185_vm11, %v3052_v31, %v3054_v63  ;;  %v3257_v63 = vld [vmem:[%s5325_s21 + $0x20] sm:$0xff] }
 0xefe   : > { %3060 = vst [vmem:[#allocation2 + $0x18] sm:$0xf0] %v3055_v37  ;;  %3061 = vst [vmem:[#allocation2 + $0x20] sm:$0xf0] %v3056_v26  ;;  %v3110_v39 = vpop.permute.xlu1 %3109  ;;  %v3931_v3 = vpack.c.bf16 %v3259_v1, %v3257_v63  ;;  %v3265_v12 = vld [vmem:[%s5325_s21 + $0x60] sm:$0xff]  ;;  %v3275_v37 = vld [vmem:[%s5325_s21 + $0xb0] sm:$0xff] }
 0xeff   : > { %3118 = vst.msk [vmem:[#allocation2 + $0x58] sm:$0xf0] %vm3033_vm1, %v3110_v39  ;;  %v3134_v27 = vld [vmem:[#allocation2 + $0x8] sm:$0xff]  ;;  %v3133_v28 = vld [vmem:[#allocation2] sm:$0xff]  ;;  %v3939_v17 = vpack.c.bf16 %v3267_v13, %v3265_v12  ;;  %v3304_v1 = vld [vmem:[%s5325_s21 + $0x198] sm:$0xff] }
 0xf00   : > { %v3080_v47 = vpop.permute.xlu0 %3079  ;;  %3169 = vmatprep.subr.bf16.mxu1 %v3134_v27  ;;  %v3273_v31 = vld [vmem:[%s5325_s21 + $0xa0] sm:$0xff]  ;;  %v3278_v26 = vld [vmem:[%s5325_s21 + $0xc8] sm:$0xff]  ;;  %v3312_v13 = vld [vmem:[%s5325_s21 + $0x1d8] sm:$0xff] }
 0xf01   : > { %v3083_v29 = vsel %vm2215_vm13, %v3078_v16, %v3080_v47  ;;  %v3084_v30 = vsel %vm2215_vm13, %v3080_v47, %v3082_v2  ;;  %3170 = vmatpush1.bf16.msra.mxu1 %v3133_v28  ;;  %v3264_v2 = vld [vmem:[%s5325_s21 + $0x58] sm:$0xff]  ;;  %v3947_v27 = vpack.c.bf16 %v3275_v37, %v3273_v31  ;;  %v3277_v47 = vld [vmem:[%s5325_s21 + $0xc0] sm:$0xff]  ;;  %v3302_v63 = vld [vmem:[%s5325_s21 + $0x188] sm:$0xff] }
 0xf02   : > { %3088 = vst [vmem:[#allocation2 + $0x30] sm:$0xf0] %v3083_v29  ;;  %3089 = vst [vmem:[#allocation2 + $0x38] sm:$0xf0] %v3084_v30  ;;  %v3106_v42 = vpop.permute.xlu1 %3105  ;;  %v3933_v5 = vpack.c.bf16 %v3264_v2, %v3262_v50  ;;  %v3272_v16 = vld [vmem:[%s5325_s21 + $0x98] sm:$0xff]  ;;  %v3279_v29 = vld [vmem:[%s5325_s21 + $0xd0] sm:$0xff]  ;;  %v3973_v50 = vpack.c.bf16 %v3304_v1, %v3302_v63 }
 0xf03   : > { %v3941_v18 = vpack.c.bf16 %v3272_v16, %v3270_v14  ;;  %v3282_v30 = vld [vmem:[%s5325_s21 + $0xe8] sm:$0xff]  ;;  %v3301_v2 = vld [vmem:[%s5325_s21 + $0x180] sm:$0xff]  ;;  %v3320_v37 = vld [vmem:[%s5325_s21 + $0x218] sm:$0xff] }
 0xf04   : > { %v3108_v32 = vpop.permute.xlu0 %3107  ;;  %v3310_v12 = vld [vmem:[%s5325_s21 + $0x1c8] sm:$0xff]  ;;  %v3309_v14 = vld [vmem:[%s5325_s21 + $0x1c0] sm:$0xff] }
 0xf05   : > { %v3111_v33 = vsel %vm2245_vm14, %v3106_v42, %v3108_v32  ;;  %v3112_v51 = vsel %vm2245_vm14, %v3108_v32, %v3110_v39  ;;  %v3137_v19 = vld [vmem:[#allocation2 + $0x20] sm:$0xff]  ;;  %v3136_v35 = vld [vmem:[#allocation2 + $0x18] sm:$0xff]  ;;  %v3951_v32 = vpack.c.bf16 %v3279_v29, %v3277_v47  ;;  %v3981_v16 = vpack.c.bf16 %v3312_v13, %v3310_v12  ;;  %v3318_v31 = vld [vmem:[%s5325_s21 + $0x208] sm:$0xff] }
 0xf06   : > { %3116 = vst [vmem:[#allocation2 + $0x48] sm:$0xf0] %v3111_v33  ;;  %3117 = vst [vmem:[#allocation2 + $0x50] sm:$0xf0] %v3112_v51  ;;  %v3122_v21 = vpop.permute.xlu1 %3121  ;;  %3171 = vmatprep.subr.bf16.mxu1 %v3137_v19  ;;  %v3144_v54 = vld [vmem:[#allocation2 + $0x58] sm:$0xff]  ;;  %v3281_v51 = vld [vmem:[%s5325_s21 + $0xe0] sm:$0xff] }
 0xf07   : > { %v3125_v36 = vsel %vm2260_vm15, %v3120_v24, %v3122_v21  ;;  %3172 = vmatpush1.bf16.msra.mxu1 %v3136_v35  ;;  %3918 = vmatpush3.bf16.msra.mxu0 %v3144_v54  ;;  %v3276_v24 = vld [vmem:[%s5325_s21 + $0xb8] sm:$0xff]  ;;  %v3283_v19 = vld [vmem:[%s5325_s21 + $0xf0] sm:$0xff]  ;;  %v3286_v35 = vld [vmem:[%s5325_s21 + $0x108] sm:$0xff] }
 0xf08   : > { %3130 = vst [vmem:[#allocation2 + $0x60] sm:$0xf] %v3125_v36  ;;  %v3124_v38 = vpop.permute.xlu0 %3123  ;;  %3919 = vmatprep.subr.bf16.mxu0 %v4237_v44  ;;  %v3945_v25 = vpack.c.bf16 %v3276_v24, %v3274_v23  ;;  %v3280_v39 = vld [vmem:[%s5325_s21 + $0xd8] sm:$0xff]  ;;  %v3955_v54 = vpack.c.bf16 %v3283_v19, %v3281_v51  ;;  %v3313_v24 = vld [vmem:[%s5325_s21 + $0x1e0] sm:$0xff] }
 0xf09   : > { %v3126_v40 = vsel %vm2260_vm15, %v3122_v21, %v3124_v38  ;;  %3132 = vst.msk [vmem:[#allocation2 + $0x70] sm:$0xf] %vm3012_vm0, %v3124_v38  ;;  %v3140_v41 = vld [vmem:[#allocation2 + $0x38] sm:$0xff]  ;;  %v3139_v0 = vld [vmem:[#allocation2 + $0x30] sm:$0xff]  ;;  %v3949_v28 = vpack.c.bf16 %v3280_v39, %v3278_v26  ;;  %v3285_v38 = vld [vmem:[%s5325_s21 + $0x100] sm:$0xff]  ;;  %v3989_v26 = vpack.c.bf16 %v3320_v37, %v3318_v31 }
 0xf0a   : > { %3131 = vst [vmem:[#allocation2 + $0x68] sm:$0xf] %v3126_v40  ;;  %3173 = vmatprep.subr.bf16.mxu1 %v3140_v41  ;;  %v3284_v42 = vld [vmem:[%s5325_s21 + $0xf8] sm:$0xff]  ;;  %v3287_v40 = vld [vmem:[%s5325_s21 + $0x110] sm:$0xff]  ;;  %v3290_v41 = vld [vmem:[%s5325_s21 + $0x128] sm:$0xff] }
 0xf0b   : > { %3174 = vmatpush1.bf16.msra.mxu1 %v3139_v0  ;;  %v3953_v33 = vpack.c.bf16 %v3284_v42, %v3282_v30  ;;  %v3288_v21 = vld [vmem:[%s5325_s21 + $0x118] sm:$0xff]  ;;  %v3959_v4 = vpack.c.bf16 %v3287_v40, %v3285_v38 }
 0xf0c   : > { %v3957_v36 = vpack.c.bf16 %v3288_v21, %v3286_v35  ;;  %v3292_v0 = vld [vmem:[%s5325_s21 + $0x138] sm:$0xff]  ;;  %v3317_v21 = vld [vmem:[%s5325_s21 + $0x200] sm:$0xff] }
 0xf0d   : > { %v3143_v43 = vld [vmem:[#allocation2 + $0x50] sm:$0xff]  ;;  %v3142_v45 = vld [vmem:[#allocation2 + $0x48] sm:$0xff]  ;;  %v3324_v38 = vld [vmem:[%s5325_s21 + $0x238] sm:$0x3f] }
 0xf0e   : > { %3175 = vmatprep.subr.bf16.mxu1 %v3143_v43  ;;  %v3961_v43 = vpack.c.bf16 %v3292_v0, %v3290_v41 }
 0xf0f   : > { %3176 = vmatpush1.bf16.msra.mxu1 %v3142_v45  ;;  %v3145_v48 = vld [vmem:[#allocation2 + $0x60] sm:$0xf] }
 0xf10   : > { %v3147_v15 = vld [vmem:[#allocation2 + $0x70] sm:$0xf]  ;;  %v3161_v59 = vsel %vm3159_vm2, %v3145_v48, 0  ;;  %v3289_v45 = vld [vmem:[%s5325_s21 + $0x120] sm:$0xff]  ;;  %v3294_v48 = vld [vmem:[%s5325_s21 + $0x148] sm:$0xff] }
 0xf11   : > { %v3146_v55 = vld [vmem:[#allocation2 + $0x68] sm:$0xf]  ;;  %v3167_v56 = vsel %vm3159_vm2, %v3147_v15, 0  ;;  %v3296_v15 = vld [vmem:[%s5325_s21 + $0x158] sm:$0xff] }
 0xf12   : > { %3699 = vmatprep.subr.msk.bf16.mxu1 %vm3159_vm2, %v3146_v55  ;;  %3920 = vmatpush3.bf16.msra.mxu0 %v3167_v56  ;;  %v3965_v52 = vpack.c.bf16 %v3296_v15, %v3294_v48  ;;  %v3295_v55 = vld [vmem:[%s5325_s21 + $0x150] sm:$0xff]  ;;  %v3298_v56 = vld [vmem:[%s5325_s21 + $0x168] sm:$0xff] }
 0xf13   : > { %3178 = vmatpush1.bf16.msra.mxu1 %v3161_v59  ;;  %v3967_v58 = vpack.c.bf16 %v3295_v55, %v3293_v53  ;;  %v3969_v59 = vpack.c.bf16 %v3300_v57, %v3298_v56 }
 0xf14   : > { %3926 = vmatprep.subr.bf16.mxu1 %v3925_v49  ;;  %v3963_v49 = vpack.c.bf16 %v3291_v46, %v3289_v45 }
 0xf15   : > { %3922 = vmatmul.mubr.msk.bf16.vlgmr.msra.gmra.mrb[36].mxu0 %vm3155_vm3, %v3148_v60 }
 0xf16   : > { %3700 = vmatmul.mubr.msk.bf16.vlgmr.msra.gmra.mrb[32].mxu1 %vm3155_vm3, %v3148_v60  ;;  %v3297_v60 = vld [vmem:[%s5325_s21 + $0x160] sm:$0xff] }
 0xf17   : > { %3928 = vmatpush1.bf16.msra.mxu1 %v3927_v61  ;;  %v3299_v61 = vld [vmem:[%s5325_s21 + $0x170] sm:$0xff]  ;;  %v3153_v39 = vpop.permute.xlu1 %3152 }
 0xf18   : > { %3930 = vmatprep.subr.bf16.mxu1 %v3929_v62  ;;  %v3971_v62 = vpack.c.bf16 %v3299_v61, %v3297_v60 }
 0xf1b   : > { %3932 = vmatpush1.bf16.msra.mxu1 %v3931_v3  ;;  %v3303_v3 = vld [vmem:[%s5325_s21 + $0x190] sm:$0xff] }
 0xf1c   : > { %3934 = vmatprep.subr.bf16.mxu1 %v3933_v5  ;;  %v3975_v5 = vpack.c.bf16 %v3303_v3, %v3301_v2 }
 0xf1f   : > { %3936 = vmatpush1.bf16.msra.mxu1 %v3935_v10  ;;  %v3307_v10 = vld [vmem:[%s5325_s21 + $0x1b0] sm:$0xff] }
 0xf20   : > { %3938 = vmatprep.subr.bf16.mxu1 %v3937_v11  ;;  %v3979_v11 = vpack.c.bf16 %v3307_v10, %v3305_v9 }
 0xf23   : > { %3940 = vmatpush1.bf16.msra.mxu1 %v3939_v17  ;;  %v3311_v17 = vld [vmem:[%s5325_s21 + $0x1d0] sm:$0xff] }
 0xf24   : > { %3942 = vmatprep.subr.bf16.mxu1 %v3941_v18  ;;  %v3314_v18 = vld [vmem:[%s5325_s21 + $0x1e8] sm:$0xff]  ;;  %v3983_v22 = vpack.c.bf16 %v3311_v17, %v3309_v14 }
 0xf25   : > { %v3985_v23 = vpack.c.bf16 %v3316_v20, %v3314_v18 }
 0xf27   : > { %3944 = vmatpush1.bf16.msra.mxu1 %v3943_v34  ;;  %v3315_v34 = vld [vmem:[%s5325_s21 + $0x1f0] sm:$0xff] }
 0xf28   : > { %3946 = vmatprep.subr.bf16.mxu1 %v3945_v25  ;;  %v3987_v25 = vpack.c.bf16 %v3315_v34, %v3313_v24 }
 0xf2b   : > { %3948 = vmatpush1.bf16.msra.mxu1 %v3947_v27 }
 0xf2c   : > { %3950 = vmatprep.subr.bf16.mxu1 %v3949_v28 }
 0xf2f   : > { %3952 = vmatpush1.bf16.msra.mxu1 %v3951_v32 }
 0xf30   : > { %3954 = vmatprep.subr.bf16.mxu1 %v3953_v33 }
 0xf33   : > { %3956 = vmatpush1.bf16.msra.mxu1 %v3955_v54  ;;  %v3319_v54 = vld [vmem:[%s5325_s21 + $0x210] sm:$0xff] }
 0xf34   : > { %3958 = vmatprep.subr.bf16.mxu1 %v3957_v36  ;;  %v3322_v36 = vld [vmem:[%s5325_s21 + $0x228] sm:$0xff]  ;;  %v3991_v40 = vpack.c.bf16 %v3319_v54, %v3317_v21 }
 0xf35   : > { %v3993_v0 = vpack.c.bf16 %v3324_v38, %v3322_v36 }
 0xf37   : > { %3960 = vmatpush1.bf16.msra.mxu1 %v3959_v4  ;;  %v3321_v4 = vld [vmem:[%s5325_s21 + $0x220] sm:$0xff] }
 0xf38   : > { %3962 = vmatprep.subr.bf16.mxu1 %v3961_v43  ;;  %v3323_v43 = vld [vmem:[%s5325_s21 + $0x230] sm:$0x3f] }
 0xf39   : > { %v3996_v46 = vpack.c.bf16 %v3323_v43, %v3321_v4 }
 0xf3b   : > { %3964 = vmatpush1.bf16.msra.mxu1 %v3963_v49 }
 0xf3c   : > { %3966 = vmatprep.subr.bf16.mxu1 %v3965_v52 }
 0xf3f   : > { %3968 = vmatpush1.bf16.msra.mxu1 %v3967_v58 }
 0xf40   : > { %3970 = vmatprep.subr.bf16.mxu1 %v3969_v59 }
 0xf43   : > { %3972 = vmatpush1.bf16.msra.mxu1 %v3971_v62 }
 0xf44   : > { %3974 = vmatprep.subr.bf16.mxu1 %v3973_v50 }
 0xf47   : > { %3976 = vmatpush1.bf16.msra.mxu1 %v3975_v5 }
 0xf48   : > { %3978 = vmatprep.subr.bf16.mxu1 %v3977_v8 }
 0xf4b   : > { %3980 = vmatpush1.bf16.msra.mxu1 %v3979_v11 }
 0xf4c   : > { %3982 = vmatprep.subr.bf16.mxu1 %v3981_v16 }
 0xf4f   : > { %3984 = vmatpush1.bf16.msra.mxu1 %v3983_v22 }
 0xf50   : > { %3986 = vmatprep.subr.bf16.mxu1 %v3985_v23 }
 0xf53   : > { %3988 = vmatpush1.bf16.msra.mxu1 %v3987_v25 }
 0xf54   : > { %3990 = vmatprep.subr.bf16.mxu1 %v3989_v26 }
 0xfe8   : > { %v3244_v27 = vpop.f32.mrb[36].mxu0 }
 0xfe9   : > { %v3203_v28 = vpop.f32.mrb[32].mxu1  ;;  %v3923_v47 = vpop.f32.mrb[37].mxu0  ;;  %v3245_v35 = vadd.f32 %v3244_v27, %v3153_v39 }
 0xfea   : > { %v3204_v29 = vadd.f32 %v3203_v28, %v3153_v39  ;;  %v3205_v30 = vpop.f32.mrb[33].mxu1  ;;  %v3247_v42 = vpop.f32.mrb[38].mxu0 }
 0xfeb   : > { %v3206_v32 = vadd.f32 %v3205_v30, %v3153_v39  ;;  %v3207_v33 = vpop.f32.mrb[34].mxu1  ;;  %v3924_v51 = vpop.f32.mrb[39].mxu0 }
 0xfec   : > { %v3208_v19 = vpop.f32.mrb[35].mxu1 }
 0xfed   : > { %4204 = vtanh.f32 %v3206_v32 }
 0xfee   : > { %4206 = vtanh.f32 %v3204_v29 }
 0xfef   : > { %4208 = vtanh.f32 %v3245_v35 }
 0xff7   : > { %v4205_v41 = vpop.eup %4204 }
 0xff8   : > { %v4207_v45 = vpop.eup %4206  ;;  %3399 = vmatprep.mubr.f32.mxu1 %v4205_v41 }
 0xff9   : > { %3400 = vmatmul.mubr.f32.vlgmr.msra.gmra.mrb[36].mxu1 %v4207_v45  ;;  %v4209_v48 = vpop.eup %4208 }
 0xffa   : > { %3992 = vmatpush1.bf16.msra.mxu1 %v3991_v40  ;;  %3470 = vmatprep.mubr.f32.mxu1 %v4237_v44 }
 0xffb   : > { %3995 = vmatprep.subr.msk.bf16.mxu1 %vm3994_vm7, %v3993_v0 }
 0xffe   : > { %3998 = vmatpush1.bf16.msk.msra.mxu1 %vm3994_vm7, %v3996_v46 }
0x1001   : > { %3704 = vmatmul.mubr.msk.f32.vlgmr.msra.gmra.mrb[36].mxu1 %vm2144_vm6, %v4209_v48 }
0x10d4   : > { %v3472_v15 = vpop.f32.mrb[36].mxu1 }
0x10d5   : > { %v3474_v49 = vpop.f32.mrb[37].mxu1 }
0x10d6   : > { %v3479_v52 = vcombine.low %v3472_v15, %v3474_v49 }
0x10d8   : > { %3481 = vst [vmem:[%s743_s17] sm:$0x77] %v3479_v52 }
0x10d9 PF: > { %s32_s3 = sadd.s32 1, %s4224_s3  }
0x10da   : > { %p29_p4 = scmp.ge.s32.totalorder %s32_s3, 4  }
0x10dc   :  { %31 = sbr.rel (!%p29_p4) target bundleno = 13 (0xd), region = 147 }

</bundles_post_ra>
